<compile_context>
chip_gen: v6e
topology: v6e:2x2x1
jax: 0.10.0
libtpu: 0.0.40
codegen_flags: <defaults>
</compile_context>

<pallas_src>
import jax
import jax.numpy as jnp
import numpy as np
from jax import lax
from jax.experimental import pallas as pl
from jax.experimental.pallas import tpu as pltpu

EPS = 1e-5  # PyTorch InstanceNorm2d default (affine=False, no running stats)


def _make_kernel(Nb, Cp, H, W):
    P = H * W          # flattened spatial extent per sample (lane axis)
    L = Nb * P         # matmul lane extent (batch folded into lanes)
    f32 = jnp.float32

    def kernel(x_ref, w1_ref, w2_ref, out_ref, pad_ref, im_ref):
        # Lane-position masks for the left/right reflect fix-up (computed once, reused by both convs).
        col = lax.broadcasted_iota(jnp.int32, (Cp, Nb, P), 2) % W
        first_col = col == 0
        last_col = col == W - 1

        def fill_pad(a):
            # a: (Cp, Nb, P).  Row-reflect-padded copy, flat row layout of width W, (H + 4) rows:
            #   pad row 0     : don't-care (<- row 0, never read by any tap)
            #   pad row 1     : row 1        (vertical reflect of row -1)
            #   pad row 2 + i : row i
            #   pad row H + 2 : row H - 2    (vertical reflect of row H)
            #   pad row H + 3 : don't-care (<- row H - 1, never read by any tap)
            pad_ref[:, :, 0:2 * W] = a[:, :, 0:2 * W]
            pad_ref[:, :, 2 * W:2 * W + P] = a
            pad_ref[:, :, 2 * W + P:4 * W + P] = a[:, :, P - 2 * W:P]

        def build_im2col():
            # Stack the 9 shifted tap slabs along sublanes into the (9*Cp, Nb*P) im2col scratch.
            # For tap (kh, kw) the input slab is a contiguous lane slice of pad_ref; only the
            # first/last column of each image row needs the horizontal reflect fix-up (masked
            # select between the +-1 shifted slices).
            for kh in range(3):                               # dh = kh - 1
                base = (kh + 1) * W
                a_m = pad_ref[:, :, base - 1:base - 1 + P]    # candidate value at col j - 1
                a_0 = pad_ref[:, :, base:base + P]            # value at col j
                a_p = pad_ref[:, :, base + 1:base + 1 + P]    # candidate value at col j + 1
                taps = (
                    jnp.where(first_col, a_p, a_m),           # kw = 0 (reflect at j == 0)
                    a_0,                                      # kw = 1
                    jnp.where(last_col, a_m, a_p),            # kw = 2 (reflect at j == W - 1)
                )
                for kw in range(3):
                    t = kh * 3 + kw
                    # Full-tile aligned sublane window (Cp is a multiple of 8).
                    im_ref[t * Cp:(t + 1) * Cp, :] = taps[kw].reshape(Cp, L)

        def conv(w_ref):
            # Single MXU contraction over all 9 taps * Cp input channels.
            return jnp.dot(w_ref[...], im_ref[...], preferred_element_type=f32)  # (Cp, L)

        def instance_norm(y):
            # Fused single-pass statistics per (channel, sample) over the spatial lanes; rsqrt on EUP.
            y3 = y.reshape(Cp, Nb, P)
            s1 = jnp.sum(y3, axis=-1, keepdims=True)
            s2 = jnp.sum(y3 * y3, axis=-1, keepdims=True)
            mu = s1 * (1.0 / P)
            var = s2 * (1.0 / P) - mu * mu
            return (y3 - mu) * lax.rsqrt(var + EPS)           # (Cp, Nb, P)

        x = x_ref[...].astype(f32)                            # (Nb, Cp, P)
        if Nb == 1:
            xt = x.reshape(Cp, Nb, P)                         # pure relabel when Nb == 1
        else:
            xt = jnp.transpose(x, (1, 0, 2))                  # (Cp, Nb, P)

        # conv1 -> InstanceNorm -> ReLU
        fill_pad(xt)
        build_im2col()
        h = instance_norm(conv(w1_ref))
        h = jnp.maximum(h, 0.0)

        # conv2 -> InstanceNorm
        fill_pad(h)
        build_im2col()
        h = instance_norm(conv(w2_ref))                       # (Cp, Nb, P)

        if Nb == 1:
            hb = h.reshape(Nb, Cp, P)
        else:
            hb = jnp.transpose(h, (1, 0, 2))
        out_ref[...] = (x + hb).astype(out_ref.dtype)         # residual skip

    return kernel


def _vmem_limit_bytes():
    """Generation-aware scoped VMEM limit (v5e/v6e: 128 MiB physical, v7x: 64 MiB per core)."""
    cap = None
    try:
        cap = int(getattr(pltpu.get_tpu_info(), "vmem_capacity_bytes", 0)) or None
    except Exception:
        cap = None
    if cap is None:
        cap = 64 * 1024 * 1024          # conservative fallback == v7x per-core VMEM
    return int(min(cap * 3 // 4, 96 * 1024 * 1024))


def residual_block(x, w1, b1, w2, b2):
    # b1 / b2 are accepted for API parity with the PyTorch module but are algebraically dead:
    # InstanceNorm2d(affine=False) immediately follows each conv, so the per-channel bias cancels
    # exactly in the mean subtraction and the variance is shift-invariant.
    del b1, b2

    N, C, H, W = x.shape
    assert H >= 2 and W >= 2, "reflect padding of 1 requires H, W >= 2"
    P = H * W
    PADR = (H + 4) * W
    Cp = ((C + 7) // 8) * 8             # sublane-aligned channel count (padded channels stay zero)

    vmem_limit = _vmem_limit_bytes()
    act_budget = vmem_limit // 2

    # Samples per grid step: as many as fit the activation VMEM budget (double-buffered in/out
    # blocks + padded-activation scratch + im2col scratch, all f32) while keeping >= 2 grid steps
    # so both v7x TensorCores get work on the "parallel" batch axis.
    per_sample = Cp * 4 * (2 * 2 * P + PADR + 9 * P)
    max_nb = N if N < 2 else max(1, N // 2)
    Nb = 1
    for d in range(1, max_nb + 1):
        if N % d == 0 and d * per_sample <= act_budget:
            Nb = d
    grid = (N // Nb,)
    # TODO(synk): for very large H*W even Nb=1 can exceed the scoped VMEM limit; that regime would
    # need spatial tiling of the convolution (not required for these shapes).

    # Wrapper-side layout plumbing: lane-dense (N, Cp, H*W) activations and im2col-ordered
    # (Cp, 9*Cp) weights whose column block t*Cp:(t+1)*Cp matches im2col rows for tap t = kh*3+kw.
    x2 = jnp.pad(x.reshape(N, C, P), ((0, 0), (0, Cp - C), (0, 0)))

    def im2col_weights(w):
        wt = jnp.transpose(w, (0, 2, 3, 1))                                   # (O, KH, KW, I)
        wt = jnp.pad(wt, ((0, Cp - C), (0, 0), (0, 0), (0, Cp - C)))
        return wt.reshape(Cp, 9 * Cp).astype(jnp.float32)

    w1m = im2col_weights(w1)
    w2m = im2col_weights(w2)

    out2 = pl.pallas_call(
        _make_kernel(Nb, Cp, H, W),
        out_shape=jax.ShapeDtypeStruct((N, Cp, P), x.dtype),
        grid=grid,
        in_specs=[
            pl.BlockSpec((Nb, Cp, P), lambda i: (i, 0, 0)),    # activations (lane-dense slab)
            pl.BlockSpec((Cp, 9 * Cp), lambda i: (0, 0)),      # conv1 im2col weights (VMEM matmul operand)
            pl.BlockSpec((Cp, 9 * Cp), lambda i: (0, 0)),      # conv2 im2col weights
        ],
        out_specs=pl.BlockSpec((Nb, Cp, P), lambda i: (i, 0, 0)),
        scratch_shapes=[
            pltpu.VMEM((Cp, Nb, PADR), jnp.float32),           # row-reflect-padded activations (canonical buffer)
            pltpu.VMEM((9 * Cp, Nb * P), jnp.float32),         # im2col slab (9 taps stacked on sublanes)
        ],
        compiler_params=pltpu.CompilerParams(
            dimension_semantics=("parallel",),                 # independent batch blocks (v7x megacore)
            vmem_limit_bytes=vmem_limit,
        ),
    )(x2, w1m, w2m)
    return out2[:, :C, :].reshape(N, C, H, W)


def residual_block_ref(x, w1, b1, w2, b2):
    """Pure-JAX reference matching PyTorch semantics (bias included) for validation."""
    def conv(y, w, b):
        yp = jnp.pad(y, ((0, 0), (0, 0), (1, 1), (1, 1)), mode="reflect")
        out = lax.conv_general_dilated(
            yp, w, window_strides=(1, 1), padding="VALID",
            dimension_numbers=("NCHW", "OIHW", "NCHW"))
        return out + b[None, :, None, None]

    def inorm(y):
        mu = jnp.mean(y, axis=(2, 3), keepdims=True)
        var = jnp.mean((y - mu) ** 2, axis=(2, 3), keepdims=True)
        return (y - mu) * lax.rsqrt(var + EPS)

    h = conv(x, w1, b1)
    h = inorm(h)
    h = jnp.maximum(h, 0.0)
    h = conv(h, w2, b2)
    h = inorm(h)
    return x + h


if __name__ == "__main__":
    N, C, H, W = 2, 4, 16, 16

    key = jax.random.PRNGKey(0)
    kx, kw1, kb1, kw2, kb2 = jax.random.split(key, 5)

    x = jax.random.normal(kx, (N, C, H, W), dtype=jnp.float32)

    # PyTorch-style uniform init bound 1/sqrt(fan_in).
    bound = 1.0 / np.sqrt(C * 3 * 3)
    w1 = jax.random.uniform(kw1, (C, C, 3, 3), jnp.float32, -bound, bound)
    b1 = jax.random.uniform(kb1, (C,), jnp.float32, -bound, bound)
    w2 = jax.random.uniform(kw2, (C, C, 3, 3), jnp.float32, -bound, bound)
    b2 = jax.random.uniform(kb2, (C,), jnp.float32, -bound, bound)

    out = jax.block_until_ready(residual_block(x, w1, b1, w2, b2))
    ref = jax.block_until_ready(residual_block_ref(x, w1, b1, w2, b2))

    assert out.shape == (N, C, H, W) and out.dtype == jnp.float32
    np.testing.assert_allclose(np.asarray(out), np.asarray(ref), rtol=2e-4, atol=2e-4)

    print("KERNEL_OK")
</pallas_src>

<mosaic_0001>
module attributes {stable_mosaic.version = 11 : i64} {
  func.func @kernel(%arg0: i32, %arg1: memref<1x8x256xf32, #tpu.memory_space<vmem>>, %arg2: memref<8x72xf32, #tpu.memory_space<vmem>>, %arg3: memref<8x72xf32, #tpu.memory_space<vmem>>, %arg4: memref<1x8x256xf32, #tpu.memory_space<vmem>>, %arg5: memref<8x1x320xf32, #tpu.memory_space<vmem>>, %arg6: memref<72x256xf32, #tpu.memory_space<vmem>>) attributes {dimension_semantics = [#tpu.dimension_semantics<parallel>], iteration_bounds = array<i64: 2>, scalar_prefetch = 0 : i64, scratch_operands = 2 : i64, tpu.core_type = #tpu.core_type<tc>, window_params = [{transform_indices = @transform_0, window_bounds = array<i64: 1, 8, 256>}, {pipeline_mode = #tpu.pipeline_mode<synchronous>, transform_indices = @transform_1, window_bounds = array<i64: 8, 72>}, {pipeline_mode = #tpu.pipeline_mode<synchronous>, transform_indices = @transform_2, window_bounds = array<i64: 8, 72>}, {transform_indices = @transform_3, window_bounds = array<i64: 1, 8, 256>}]} {
    %0 = tpu.iota {dimensions = array<i32: 2>} : vector<8x1x256xi32>
    %c16_i32 = arith.constant 16 : i32
    %c0_i32 = arith.constant 0 : i32
    %1 = arith.cmpi eq, %c16_i32, %c0_i32 : i32
    %c1_i32 = arith.constant 1 : i32
    %2 = arith.select %1, %c1_i32, %c16_i32 : i32
    %3 = vector.broadcast %2 : i32 to vector<8x1x256xi32>
    %4 = arith.remsi %0, %3 : vector<8x1x256xi32>
    %c0_i32_0 = arith.constant 0 : i32
    %5 = vector.broadcast %c0_i32_0 : i32 to vector<8x1x256xi32>
    %6 = arith.cmpi ne, %4, %5 : vector<8x1x256xi32>
    %c0_i32_1 = arith.constant 0 : i32
    %7 = vector.broadcast %c0_i32_1 : i32 to vector<8x1x256xi32>
    %8 = arith.cmpi slt, %4, %7 : vector<8x1x256xi32>
    %c0_i32_2 = arith.constant 0 : i32
    %9 = arith.cmpi slt, %2, %c0_i32_2 : i32
    %10 = vector.broadcast %9 : i1 to vector<8x1x256xi1>
    %11 = vector.broadcast %10 : vector<8x1x256xi1> to vector<8x1x256xi1>
    %12 = arith.xori %8, %11 : vector<8x1x256xi1>
    %13 = arith.andi %12, %6 : vector<8x1x256xi1>
    %14 = vector.broadcast %2 : i32 to vector<8x1x256xi32>
    %15 = arith.addi %4, %14 : vector<8x1x256xi32>
    %16 = arith.select %13, %15, %4 : vector<8x1x256xi1>, vector<8x1x256xi32>
    %c0_i32_3 = arith.constant 0 : i32
    %17 = vector.broadcast %c0_i32_3 : i32 to vector<8x1x256xi32>
    %18 = arith.cmpi eq, %16, %17 : vector<8x1x256xi32>
    %c15_i32 = arith.constant 15 : i32
    %19 = vector.broadcast %c15_i32 : i32 to vector<8x1x256xi32>
    %20 = arith.cmpi eq, %16, %19 : vector<8x1x256xi32>
    %c0 = arith.constant 0 : index
    %c0_4 = arith.constant 0 : index
    %c0_5 = arith.constant 0 : index
    %21 = vector.load %arg1[%c0, %c0_4, %c0_5] : memref<1x8x256xf32, #tpu.memory_space<vmem>>, vector<1x8x256xf32>
    %22 = vector.shape_cast %21 : vector<1x8x256xf32> to vector<8x1x256xf32>
    %23 = vector.extract_strided_slice %22 {offsets = [0, 0, 0], sizes = [8, 1, 32], strides = [1, 1, 1]} : vector<8x1x256xf32> to vector<8x1x32xf32>
    %c0_6 = arith.constant 0 : index
    %c0_7 = arith.constant 0 : index
    %c0_8 = arith.constant 0 : index
    %24 = vector.load %arg5[%c0_6, %c0_7, %c0_8] : memref<8x1x320xf32, #tpu.memory_space<vmem>>, vector<8x1x32xf32>
    tpu.vector_store %arg5[%c0_6, %c0_7, %c0_8], %23 {strides = array<i32>} : memref<8x1x320xf32, #tpu.memory_space<vmem>>, vector<8x1x32xf32>,
    %c0_9 = arith.constant 0 : index
    %c0_10 = arith.constant 0 : index
    %c32 = arith.constant 32 : index
    %25 = vector.load %arg5[%c0_9, %c0_10, %c32] : memref<8x1x320xf32, #tpu.memory_space<vmem>>, vector<8x1x256xf32>
    tpu.vector_store %arg5[%c0_9, %c0_10, %c32], %22 {strides = array<i32>} : memref<8x1x320xf32, #tpu.memory_space<vmem>>, vector<8x1x256xf32>,
    %26 = vector.extract_strided_slice %22 {offsets = [0, 0, 224], sizes = [8, 1, 32], strides = [1, 1, 1]} : vector<8x1x256xf32> to vector<8x1x32xf32>
    %c0_11 = arith.constant 0 : index
    %c0_12 = arith.constant 0 : index
    %c288 = arith.constant 288 : index
    %27 = vector.load %arg5[%c0_11, %c0_12, %c288] : memref<8x1x320xf32, #tpu.memory_space<vmem>>, vector<8x1x32xf32>
    tpu.vector_store %arg5[%c0_11, %c0_12, %c288], %26 {strides = array<i32>} : memref<8x1x320xf32, #tpu.memory_space<vmem>>, vector<8x1x32xf32>,
    %c0_13 = arith.constant 0 : index
    %c0_14 = arith.constant 0 : index
    %c15 = arith.constant 15 : index
    %28 = vector.load %arg5[%c0_13, %c0_14, %c15] : memref<8x1x320xf32, #tpu.memory_space<vmem>>, vector<8x1x256xf32>
    %c0_15 = arith.constant 0 : index
    %c0_16 = arith.constant 0 : index
    %c16 = arith.constant 16 : index
    %29 = vector.load %arg5[%c0_15, %c0_16, %c16] : memref<8x1x320xf32, #tpu.memory_space<vmem>>, vector<8x1x256xf32>
    %c0_17 = arith.constant 0 : index
    %c0_18 = arith.constant 0 : index
    %c17 = arith.constant 17 : index
    %30 = vector.load %arg5[%c0_17, %c0_18, %c17] : memref<8x1x320xf32, #tpu.memory_space<vmem>>, vector<8x1x256xf32>
    %31 = arith.select %18, %30, %28 : vector<8x1x256xi1>, vector<8x1x256xf32>
    %32 = arith.select %20, %28, %30 : vector<8x1x256xi1>, vector<8x1x256xf32>
    %33 = vector.shape_cast %31 : vector<8x1x256xf32> to vector<8x256xf32>
    %c0_19 = arith.constant 0 : index
    %c0_20 = arith.constant 0 : index
    %34 = vector.load %arg6[%c0_19, %c0_20] : memref<72x256xf32, #tpu.memory_space<vmem>>, vector<8x256xf32>
    tpu.vector_store %arg6[%c0_19, %c0_20], %33 {strides = array<i32>} : memref<72x256xf32, #tpu.memory_space<vmem>>, vector<8x256xf32>,
    %35 = vector.shape_cast %29 : vector<8x1x256xf32> to vector<8x256xf32>
    %c8 = arith.constant 8 : index
    %c0_21 = arith.constant 0 : index
    %36 = vector.load %arg6[%c8, %c0_21] : memref<72x256xf32, #tpu.memory_space<vmem>>, vector<8x256xf32>
    tpu.vector_store %arg6[%c8, %c0_21], %35 {strides = array<i32>} : memref<72x256xf32, #tpu.memory_space<vmem>>, vector<8x256xf32>,
    %37 = vector.shape_cast %32 : vector<8x1x256xf32> to vector<8x256xf32>
    %c16_22 = arith.constant 16 : index
    %c0_23 = arith.constant 0 : index
    %38 = vector.load %arg6[%c16_22, %c0_23] : memref<72x256xf32, #tpu.memory_space<vmem>>, vector<8x256xf32>
    tpu.vector_store %arg6[%c16_22, %c0_23], %37 {strides = array<i32>} : memref<72x256xf32, #tpu.memory_space<vmem>>, vector<8x256xf32>,
    %c0_24 = arith.constant 0 : index
    %c0_25 = arith.constant 0 : index
    %c31 = arith.constant 31 : index
    %39 = vector.load %arg5[%c0_24, %c0_25, %c31] : memref<8x1x320xf32, #tpu.memory_space<vmem>>, vector<8x1x256xf32>
    %c0_26 = arith.constant 0 : index
    %c0_27 = arith.constant 0 : index
    %c32_28 = arith.constant 32 : index
    %40 = vector.load %arg5[%c0_26, %c0_27, %c32_28] : memref<8x1x320xf32, #tpu.memory_space<vmem>>, vector<8x1x256xf32>
    %c0_29 = arith.constant 0 : index
    %c0_30 = arith.constant 0 : index
    %c33 = arith.constant 33 : index
    %41 = vector.load %arg5[%c0_29, %c0_30, %c33] : memref<8x1x320xf32, #tpu.memory_space<vmem>>, vector<8x1x256xf32>
    %42 = arith.select %18, %41, %39 : vector<8x1x256xi1>, vector<8x1x256xf32>
    %43 = arith.select %20, %39, %41 : vector<8x1x256xi1>, vector<8x1x256xf32>
    %44 = vector.shape_cast %42 : vector<8x1x256xf32> to vector<8x256xf32>
    %c24 = arith.constant 24 : index
    %c0_31 = arith.constant 0 : index
    %45 = vector.load %arg6[%c24, %c0_31] : memref<72x256xf32, #tpu.memory_space<vmem>>, vector<8x256xf32>
    tpu.vector_store %arg6[%c24, %c0_31], %44 {strides = array<i32>} : memref<72x256xf32, #tpu.memory_space<vmem>>, vector<8x256xf32>,
    %46 = vector.shape_cast %40 : vector<8x1x256xf32> to vector<8x256xf32>
    %c32_32 = arith.constant 32 : index
    %c0_33 = arith.constant 0 : index
    %47 = vector.load %arg6[%c32_32, %c0_33] : memref<72x256xf32, #tpu.memory_space<vmem>>, vector<8x256xf32>
    tpu.vector_store %arg6[%c32_32, %c0_33], %46 {strides = array<i32>} : memref<72x256xf32, #tpu.memory_space<vmem>>, vector<8x256xf32>,
    %48 = vector.shape_cast %43 : vector<8x1x256xf32> to vector<8x256xf32>
    %c40 = arith.constant 40 : index
    %c0_34 = arith.constant 0 : index
    %49 = vector.load %arg6[%c40, %c0_34] : memref<72x256xf32, #tpu.memory_space<vmem>>, vector<8x256xf32>
    tpu.vector_store %arg6[%c40, %c0_34], %48 {strides = array<i32>} : memref<72x256xf32, #tpu.memory_space<vmem>>, vector<8x256xf32>,
    %c0_35 = arith.constant 0 : index
    %c0_36 = arith.constant 0 : index
    %c47 = arith.constant 47 : index
    %50 = vector.load %arg5[%c0_35, %c0_36, %c47] : memref<8x1x320xf32, #tpu.memory_space<vmem>>, vector<8x1x256xf32>
    %c0_37 = arith.constant 0 : index
    %c0_38 = arith.constant 0 : index
    %c48 = arith.constant 48 : index
    %51 = vector.load %arg5[%c0_37, %c0_38, %c48] : memref<8x1x320xf32, #tpu.memory_space<vmem>>, vector<8x1x256xf32>
    %c0_39 = arith.constant 0 : index
    %c0_40 = arith.constant 0 : index
    %c49 = arith.constant 49 : index
    %52 = vector.load %arg5[%c0_39, %c0_40, %c49] : memref<8x1x320xf32, #tpu.memory_space<vmem>>, vector<8x1x256xf32>
    %53 = arith.select %18, %52, %50 : vector<8x1x256xi1>, vector<8x1x256xf32>
    %54 = arith.select %20, %50, %52 : vector<8x1x256xi1>, vector<8x1x256xf32>
    %55 = vector.shape_cast %53 : vector<8x1x256xf32> to vector<8x256xf32>
    %c48_41 = arith.constant 48 : index
    %c0_42 = arith.constant 0 : index
    %56 = vector.load %arg6[%c48_41, %c0_42] : memref<72x256xf32, #tpu.memory_space<vmem>>, vector<8x256xf32>
    tpu.vector_store %arg6[%c48_41, %c0_42], %55 {strides = array<i32>} : memref<72x256xf32, #tpu.memory_space<vmem>>, vector<8x256xf32>,
    %57 = vector.shape_cast %51 : vector<8x1x256xf32> to vector<8x256xf32>
    %c56 = arith.constant 56 : index
    %c0_43 = arith.constant 0 : index
    %58 = vector.load %arg6[%c56, %c0_43] : memref<72x256xf32, #tpu.memory_space<vmem>>, vector<8x256xf32>
    tpu.vector_store %arg6[%c56, %c0_43], %57 {strides = array<i32>} : memref<72x256xf32, #tpu.memory_space<vmem>>, vector<8x256xf32>,
    %59 = vector.shape_cast %54 : vector<8x1x256xf32> to vector<8x256xf32>
    %c64 = arith.constant 64 : index
    %c0_44 = arith.constant 0 : index
    %60 = vector.load %arg6[%c64, %c0_44] : memref<72x256xf32, #tpu.memory_space<vmem>>, vector<8x256xf32>
    tpu.vector_store %arg6[%c64, %c0_44], %59 {strides = array<i32>} : memref<72x256xf32, #tpu.memory_space<vmem>>, vector<8x256xf32>,
    %c0_45 = arith.constant 0 : index
    %c0_46 = arith.constant 0 : index
    %61 = vector.load %arg2[%c0_45, %c0_46] : memref<8x72xf32, #tpu.memory_space<vmem>>, vector<8x72xf32>
    %c0_47 = arith.constant 0 : index
    %c0_48 = arith.constant 0 : index
    %62 = vector.load %arg6[%c0_47, %c0_48] : memref<72x256xf32, #tpu.memory_space<vmem>>, vector<72x256xf32>
    %cst = arith.constant dense<0.000000e+00> : vector<8x256xf32>
    %63 = tpu.matmul %61, %62, %cst {dimension_numbers = #tpu.dot_dimension_numbers<[1], [0], [0], [1], [0, 0, 1, 1], [], []>} : vector<8x72xf32>, vector<72x256xf32>, vector<8x256xf32> -> vector<8x256xf32>
    %64 = vector.shape_cast %63 : vector<8x256xf32> to vector<8x1x256xf32>
    %cst_49 = arith.constant dense<0.000000e+00> : vector<8x1xf32>
    %65 = vector.multi_reduction <add>, %64, %cst_49 [2] : vector<8x1x256xf32> to vector<8x1xf32>
    %66 = vector.shape_cast %65 : vector<8x1xf32> to vector<8x1x1xf32>
    %67 = arith.mulf %64, %64 : vector<8x1x256xf32>
    %cst_50 = arith.constant dense<0.000000e+00> : vector<8x1xf32>
    %68 = vector.multi_reduction <add>, %67, %cst_50 [2] : vector<8x1x256xf32> to vector<8x1xf32>
    %69 = vector.shape_cast %68 : vector<8x1xf32> to vector<8x1x1xf32>
    %cst_51 = arith.constant 3.906250e-03 : f32
    %70 = vector.broadcast %cst_51 : f32 to vector<8x1x1xf32>
    %71 = arith.mulf %66, %70 : vector<8x1x1xf32>
    %cst_52 = arith.constant 3.906250e-03 : f32
    %72 = vector.broadcast %cst_52 : f32 to vector<8x1x1xf32>
    %73 = arith.mulf %69, %72 : vector<8x1x1xf32>
    %74 = arith.mulf %71, %71 : vector<8x1x1xf32>
    %75 = arith.subf %73, %74 : vector<8x1x1xf32>
    %76 = vector.broadcast %71 : vector<8x1x1xf32> to vector<8x1x256xf32>
    %77 = arith.subf %64, %76 : vector<8x1x256xf32>
    %cst_53 = arith.constant 9.99999974E-6 : f32
    %78 = vector.broadcast %cst_53 : f32 to vector<8x1x1xf32>
    %79 = arith.addf %75, %78 : vector<8x1x1xf32>
    %80 = math.rsqrt %79 : vector<8x1x1xf32>
    %81 = vector.broadcast %80 : vector<8x1x1xf32> to vector<8x1x256xf32>
    %82 = arith.mulf %77, %81 : vector<8x1x256xf32>
    %cst_54 = arith.constant 0.000000e+00 : f32
    %83 = vector.broadcast %cst_54 : f32 to vector<8x1x256xf32>
    %84 = arith.maximumf %82, %83 : vector<8x1x256xf32>
    %85 = vector.extract_strided_slice %84 {offsets = [0, 0, 0], sizes = [8, 1, 32], strides = [1, 1, 1]} : vector<8x1x256xf32> to vector<8x1x32xf32>
    %c0_55 = arith.constant 0 : index
    %c0_56 = arith.constant 0 : index
    %c0_57 = arith.constant 0 : index
    %86 = vector.load %arg5[%c0_55, %c0_56, %c0_57] : memref<8x1x320xf32, #tpu.memory_space<vmem>>, vector<8x1x32xf32>
    tpu.vector_store %arg5[%c0_55, %c0_56, %c0_57], %85 {strides = array<i32>} : memref<8x1x320xf32, #tpu.memory_space<vmem>>, vector<8x1x32xf32>,
    %c0_58 = arith.constant 0 : index
    %c0_59 = arith.constant 0 : index
    %c32_60 = arith.constant 32 : index
    %87 = vector.load %arg5[%c0_58, %c0_59, %c32_60] : memref<8x1x320xf32, #tpu.memory_space<vmem>>, vector<8x1x256xf32>
    tpu.vector_store %arg5[%c0_58, %c0_59, %c32_60], %84 {strides = array<i32>} : memref<8x1x320xf32, #tpu.memory_space<vmem>>, vector<8x1x256xf32>,
    %88 = vector.extract_strided_slice %84 {offsets = [0, 0, 224], sizes = [8, 1, 32], strides = [1, 1, 1]} : vector<8x1x256xf32> to vector<8x1x32xf32>
    %c0_61 = arith.constant 0 : index
    %c0_62 = arith.constant 0 : index
    %c288_63 = arith.constant 288 : index
    %89 = vector.load %arg5[%c0_61, %c0_62, %c288_63] : memref<8x1x320xf32, #tpu.memory_space<vmem>>, vector<8x1x32xf32>
    tpu.vector_store %arg5[%c0_61, %c0_62, %c288_63], %88 {strides = array<i32>} : memref<8x1x320xf32, #tpu.memory_space<vmem>>, vector<8x1x32xf32>,
    %c0_64 = arith.constant 0 : index
    %c0_65 = arith.constant 0 : index
    %c15_66 = arith.constant 15 : index
    %90 = vector.load %arg5[%c0_64, %c0_65, %c15_66] : memref<8x1x320xf32, #tpu.memory_space<vmem>>, vector<8x1x256xf32>
    %c0_67 = arith.constant 0 : index
    %c0_68 = arith.constant 0 : index
    %c16_69 = arith.constant 16 : index
    %91 = vector.load %arg5[%c0_67, %c0_68, %c16_69] : memref<8x1x320xf32, #tpu.memory_space<vmem>>, vector<8x1x256xf32>
    %c0_70 = arith.constant 0 : index
    %c0_71 = arith.constant 0 : index
    %c17_72 = arith.constant 17 : index
    %92 = vector.load %arg5[%c0_70, %c0_71, %c17_72] : memref<8x1x320xf32, #tpu.memory_space<vmem>>, vector<8x1x256xf32>
    %93 = arith.select %18, %92, %90 : vector<8x1x256xi1>, vector<8x1x256xf32>
    %94 = arith.select %20, %90, %92 : vector<8x1x256xi1>, vector<8x1x256xf32>
    %95 = vector.shape_cast %93 : vector<8x1x256xf32> to vector<8x256xf32>
    %c0_73 = arith.constant 0 : index
    %c0_74 = arith.constant 0 : index
    %96 = vector.load %arg6[%c0_73, %c0_74] : memref<72x256xf32, #tpu.memory_space<vmem>>, vector<8x256xf32>
    tpu.vector_store %arg6[%c0_73, %c0_74], %95 {strides = array<i32>} : memref<72x256xf32, #tpu.memory_space<vmem>>, vector<8x256xf32>,
    %97 = vector.shape_cast %91 : vector<8x1x256xf32> to vector<8x256xf32>
    %c8_75 = arith.constant 8 : index
    %c0_76 = arith.constant 0 : index
    %98 = vector.load %arg6[%c8_75, %c0_76] : memref<72x256xf32, #tpu.memory_space<vmem>>, vector<8x256xf32>
    tpu.vector_store %arg6[%c8_75, %c0_76], %97 {strides = array<i32>} : memref<72x256xf32, #tpu.memory_space<vmem>>, vector<8x256xf32>,
    %99 = vector.shape_cast %94 : vector<8x1x256xf32> to vector<8x256xf32>
    %c16_77 = arith.constant 16 : index
    %c0_78 = arith.constant 0 : index
    %100 = vector.load %arg6[%c16_77, %c0_78] : memref<72x256xf32, #tpu.memory_space<vmem>>, vector<8x256xf32>
    tpu.vector_store %arg6[%c16_77, %c0_78], %99 {strides = array<i32>} : memref<72x256xf32, #tpu.memory_space<vmem>>, vector<8x256xf32>,
    %c0_79 = arith.constant 0 : index
    %c0_80 = arith.constant 0 : index
    %c31_81 = arith.constant 31 : index
    %101 = vector.load %arg5[%c0_79, %c0_80, %c31_81] : memref<8x1x320xf32, #tpu.memory_space<vmem>>, vector<8x1x256xf32>
    %c0_82 = arith.constant 0 : index
    %c0_83 = arith.constant 0 : index
    %c32_84 = arith.constant 32 : index
    %102 = vector.load %arg5[%c0_82, %c0_83, %c32_84] : memref<8x1x320xf32, #tpu.memory_space<vmem>>, vector<8x1x256xf32>
    %c0_85 = arith.constant 0 : index
    %c0_86 = arith.constant 0 : index
    %c33_87 = arith.constant 33 : index
    %103 = vector.load %arg5[%c0_85, %c0_86, %c33_87] : memref<8x1x320xf32, #tpu.memory_space<vmem>>, vector<8x1x256xf32>
    %104 = arith.select %18, %103, %101 : vector<8x1x256xi1>, vector<8x1x256xf32>
    %105 = arith.select %20, %101, %103 : vector<8x1x256xi1>, vector<8x1x256xf32>
    %106 = vector.shape_cast %104 : vector<8x1x256xf32> to vector<8x256xf32>
    %c24_88 = arith.constant 24 : index
    %c0_89 = arith.constant 0 : index
    %107 = vector.load %arg6[%c24_88, %c0_89] : memref<72x256xf32, #tpu.memory_space<vmem>>, vector<8x256xf32>
    tpu.vector_store %arg6[%c24_88, %c0_89], %106 {strides = array<i32>} : memref<72x256xf32, #tpu.memory_space<vmem>>, vector<8x256xf32>,
    %108 = vector.shape_cast %102 : vector<8x1x256xf32> to vector<8x256xf32>
    %c32_90 = arith.constant 32 : index
    %c0_91 = arith.constant 0 : index
    %109 = vector.load %arg6[%c32_90, %c0_91] : memref<72x256xf32, #tpu.memory_space<vmem>>, vector<8x256xf32>
    tpu.vector_store %arg6[%c32_90, %c0_91], %108 {strides = array<i32>} : memref<72x256xf32, #tpu.memory_space<vmem>>, vector<8x256xf32>,
    %110 = vector.shape_cast %105 : vector<8x1x256xf32> to vector<8x256xf32>
    %c40_92 = arith.constant 40 : index
    %c0_93 = arith.constant 0 : index
    %111 = vector.load %arg6[%c40_92, %c0_93] : memref<72x256xf32, #tpu.memory_space<vmem>>, vector<8x256xf32>
    tpu.vector_store %arg6[%c40_92, %c0_93], %110 {strides = array<i32>} : memref<72x256xf32, #tpu.memory_space<vmem>>, vector<8x256xf32>,
    %c0_94 = arith.constant 0 : index
    %c0_95 = arith.constant 0 : index
    %c47_96 = arith.constant 47 : index
    %112 = vector.load %arg5[%c0_94, %c0_95, %c47_96] : memref<8x1x320xf32, #tpu.memory_space<vmem>>, vector<8x1x256xf32>
    %c0_97 = arith.constant 0 : index
    %c0_98 = arith.constant 0 : index
    %c48_99 = arith.constant 48 : index
    %113 = vector.load %arg5[%c0_97, %c0_98, %c48_99] : memref<8x1x320xf32, #tpu.memory_space<vmem>>, vector<8x1x256xf32>
    %c0_100 = arith.constant 0 : index
    %c0_101 = arith.constant 0 : index
    %c49_102 = arith.constant 49 : index
    %114 = vector.load %arg5[%c0_100, %c0_101, %c49_102] : memref<8x1x320xf32, #tpu.memory_space<vmem>>, vector<8x1x256xf32>
    %115 = arith.select %18, %114, %112 : vector<8x1x256xi1>, vector<8x1x256xf32>
    %116 = arith.select %20, %112, %114 : vector<8x1x256xi1>, vector<8x1x256xf32>
    %117 = vector.shape_cast %115 : vector<8x1x256xf32> to vector<8x256xf32>
    %c48_103 = arith.constant 48 : index
    %c0_104 = arith.constant 0 : index
    %118 = vector.load %arg6[%c48_103, %c0_104] : memref<72x256xf32, #tpu.memory_space<vmem>>, vector<8x256xf32>
    tpu.vector_store %arg6[%c48_103, %c0_104], %117 {strides = array<i32>} : memref<72x256xf32, #tpu.memory_space<vmem>>, vector<8x256xf32>,
    %119 = vector.shape_cast %113 : vector<8x1x256xf32> to vector<8x256xf32>
    %c56_105 = arith.constant 56 : index
    %c0_106 = arith.constant 0 : index
    %120 = vector.load %arg6[%c56_105, %c0_106] : memref<72x256xf32, #tpu.memory_space<vmem>>, vector<8x256xf32>
    tpu.vector_store %arg6[%c56_105, %c0_106], %119 {strides = array<i32>} : memref<72x256xf32, #tpu.memory_space<vmem>>, vector<8x256xf32>,
    %121 = vector.shape_cast %116 : vector<8x1x256xf32> to vector<8x256xf32>
    %c64_107 = arith.constant 64 : index
    %c0_108 = arith.constant 0 : index
    %122 = vector.load %arg6[%c64_107, %c0_108] : memref<72x256xf32, #tpu.memory_space<vmem>>, vector<8x256xf32>
    tpu.vector_store %arg6[%c64_107, %c0_108], %121 {strides = array<i32>} : memref<72x256xf32, #tpu.memory_space<vmem>>, vector<8x256xf32>,
    %c0_109 = arith.constant 0 : index
    %c0_110 = arith.constant 0 : index
    %123 = vector.load %arg3[%c0_109, %c0_110] : memref<8x72xf32, #tpu.memory_space<vmem>>, vector<8x72xf32>
    %c0_111 = arith.constant 0 : index
    %c0_112 = arith.constant 0 : index
    %124 = vector.load %arg6[%c0_111, %c0_112] : memref<72x256xf32, #tpu.memory_space<vmem>>, vector<72x256xf32>
    %cst_113 = arith.constant dense<0.000000e+00> : vector<8x256xf32>
    %125 = tpu.matmul %123, %124, %cst_113 {dimension_numbers = #tpu.dot_dimension_numbers<[1], [0], [0], [1], [0, 0, 1, 1], [], []>} : vector<8x72xf32>, vector<72x256xf32>, vector<8x256xf32> -> vector<8x256xf32>
    %126 = vector.shape_cast %125 : vector<8x256xf32> to vector<8x1x256xf32>
    %cst_114 = arith.constant dense<0.000000e+00> : vector<8x1xf32>
    %127 = vector.multi_reduction <add>, %126, %cst_114 [2] : vector<8x1x256xf32> to vector<8x1xf32>
    %128 = vector.shape_cast %127 : vector<8x1xf32> to vector<8x1x1xf32>
    %129 = arith.mulf %126, %126 : vector<8x1x256xf32>
    %cst_115 = arith.constant dense<0.000000e+00> : vector<8x1xf32>
    %130 = vector.multi_reduction <add>, %129, %cst_115 [2] : vector<8x1x256xf32> to vector<8x1xf32>
    %131 = vector.shape_cast %130 : vector<8x1xf32> to vector<8x1x1xf32>
    %cst_116 = arith.constant 3.906250e-03 : f32
    %132 = vector.broadcast %cst_116 : f32 to vector<8x1x1xf32>
    %133 = arith.mulf %128, %132 : vector<8x1x1xf32>
    %cst_117 = arith.constant 3.906250e-03 : f32
    %134 = vector.broadcast %cst_117 : f32 to vector<8x1x1xf32>
    %135 = arith.mulf %131, %134 : vector<8x1x1xf32>
    %136 = arith.mulf %133, %133 : vector<8x1x1xf32>
    %137 = arith.subf %135, %136 : vector<8x1x1xf32>
    %138 = vector.broadcast %133 : vector<8x1x1xf32> to vector<8x1x256xf32>
    %139 = arith.subf %126, %138 : vector<8x1x256xf32>
    %cst_118 = arith.constant 9.99999974E-6 : f32
    %140 = vector.broadcast %cst_118 : f32 to vector<8x1x1xf32>
    %141 = arith.addf %137, %140 : vector<8x1x1xf32>
    %142 = math.rsqrt %141 : vector<8x1x1xf32>
    %143 = vector.broadcast %142 : vector<8x1x1xf32> to vector<8x1x256xf32>
    %144 = arith.mulf %139, %143 : vector<8x1x256xf32>
    %145 = vector.shape_cast %144 : vector<8x1x256xf32> to vector<1x8x256xf32>
    %146 = arith.addf %21, %145 : vector<1x8x256xf32>
    %c0_119 = arith.constant 0 : index
    %c0_120 = arith.constant 0 : index
    %c0_121 = arith.constant 0 : index
    %147 = vector.load %arg4[%c0_119, %c0_120, %c0_121] : memref<1x8x256xf32, #tpu.memory_space<vmem>>, vector<1x8x256xf32>
    tpu.vector_store %arg4[%c0_119, %c0_120, %c0_121], %146 {strides = array<i32>} : memref<1x8x256xf32, #tpu.memory_space<vmem>>, vector<1x8x256xf32>,
    return
  }
  func.func @transform_0(%arg0: i32) -> (i32, i32, i32) {
    %c0_i32 = arith.constant 0 : i32
    %c0_i32_0 = arith.constant 0 : i32
    %c0_i32_1 = arith.constant 0 : i32
    return %arg0, %c0_i32, %c0_i32_0 : i32, i32, i32
  }
  func.func @transform_1(%arg0: i32) -> (i32, i32) {
    %c0_i32 = arith.constant 0 : i32
    %c0_i32_0 = arith.constant 0 : i32
    %c0_i32_1 = arith.constant 0 : i32
    return %c0_i32, %c0_i32_0 : i32, i32
  }
  func.func @transform_2(%arg0: i32) -> (i32, i32) {
    %c0_i32 = arith.constant 0 : i32
    %c0_i32_0 = arith.constant 0 : i32
    %c0_i32_1 = arith.constant 0 : i32
    return %c0_i32, %c0_i32_0 : i32, i32
  }
  func.func @transform_3(%arg0: i32) -> (i32, i32, i32) {
    %c0_i32 = arith.constant 0 : i32
    %c0_i32_0 = arith.constant 0 : i32
    %c0_i32_1 = arith.constant 0 : i32
    return %arg0, %c0_i32, %c0_i32_0 : i32, i32, i32
  }
}

</mosaic_0001>

<bundles_post_ra>
// kernel: tpu_custom_call.1
= control target key start
LH: loop header
LB: loop body
LE: loop exit
PB: predicated region body
PF: predicated region fallthrough
CT: control target
= control target key end

     0   :  { %8 = vsyncpa [#allocation5], 0  ;;  %s8463_s0 = inlined_call_operand.hbm [shape: f32[2,8,256], index: 0, kind: input, shape index: {}]   ;;  %s8464_s1 = inlined_call_operand.hbm [shape: f32[8,72], index: 1, kind: input, shape index: {}]   ;;  %s8465_s2 = inlined_call_operand.hbm [shape: f32[8,72], index: 2, kind: input, shape index: {}]   ;;  %s8466_s3 = inlined_call_operand.hbm [shape: f32[2,8,256], index: 3, kind: output, shape index: {}]  }
   0x1   :  { %10 = vsyncpa [#allocation5 + $0x1], 0 }
   0x2   :  { %11 = vsyncpa [#allocation8], 0 }
   0x3   :  { %12 = vsyncpa [#allocation6], 0 }
   0x4   :  { %14 = vsyncpa [#allocation6 + $0x1], 0  ;;  %s5062_s12 = smov 0   ;;  %s5064_s13 = smov 0  }
   0x5   :  { %s5066_s14 = smov 0   ;;  %s5068_s15 = smov 0  }
   0x6 LB: > { %s5083_s16 = sadd.s32 4294967295, %s5023_s15   ;;  %s4737_s17 = sadd.s32 4294967294, %s5023_s15   ;;  %s5023_s15 = sphi %s5068_s15, %s8940_s15   ;;  %s5019_s14 = sphi %s5066_s14, %s8939_s14   ;;  %s5015_s13 = sphi %s5064_s13, %s8938_s13   ;;  %s5011_s12 = sphi %s5062_s12, %s8937_s12  }
   0x7   : > { %p40_p0 = scmp.ne.s32.totalorder %s5015_s13, %s5011_s12  ;;  %p8467_p1 = scmp.eq.s32.totalorder %s5083_s16, 0 }
   0x8   : > { %p112_p3 = scmp.eq.s32.totalorder %s4737_s17, 1  ;;  %p4738_p5 = scmp.ge.s32.totalorder %s5023_s15, 1 }
   0x9   : > { %p5092_p4 = por %p8467_p1, %p40_p0  ;;  %p119_p7 = scmp.lt.s32.totalorder %s5023_s15, 3 }
   0xa   : > { %p5097_p6 = por %p112_p3, %p40_p0  ;;  %s5025_s21 = smov [#allocation7]  }
   0xb   : > { %s8544_s18 = scalar_select %p5092_p4, 1, 0 }
   0xc   : > { %s8545_s19 = scalar_select %p5097_p6, 1, 0 }
   0xd   : > { %p5102_p8 = pnand %p4738_p5, %p119_p7  ;;  %s132_s22 = sshll.u32 %s5025_s21, 4  ;;  %s133_s22 = int_to_ptr.vmem [resolvable:$true] %s132_s22 }
   0xe   : > { %s5026_s23 = smov [#allocation9]   ;;  %s5116_s26 = sadd.s32 1, %s5023_s15  }
   0xf   : > { %s8546_s20 = scalar_select %p5102_p8, 1, 0 }
  0x10   : > { %p4771_p10 = pneg %p5102_p8  ;;  %s143_s24 = sshll.u32 %s5026_s23, 4  ;;  %s144_s24 = int_to_ptr.vmem [resolvable:$true] %s143_s24 }
  0x11   : > { %s24_s27 = ssub.s32 %s5023_s15, %s5116_s26  ;;  %s4886_s28 = scalar_lea.vmem %s133_s22, 128 }
  0x12   : > { %p5111_p11 = pnand %p4771_p10, %p8467_p1  ;;  %p4887_p13 = scmp.ne.s32.totalorder %s133_s22, %s4886_s28 }
  0x13   : > { %p4894_p5 = scmp.lt.s32.totalorder %s133_s22, %s133_s22  ;;  %p4895_p7 = scmp.lt.s32.totalorder %s4886_s28, %s4886_s28 }
  0x14   : > { %p4877_p12 = pneg %p5111_p11 }
  0x15   : > { %p4896_p10 = por %p4895_p7, %p4894_p5 }
  0x16   : > { %p4889_p0 = pnand %p4887_p13, %p4877_p12 }
  0x18   : > { %p4890_p3 = pneg %p4889_p0 }
  0x1a   : > { %p4897_p9 = pnand %p4896_p10, %p4890_p3 }
  0x1c   : > { %4900 = shalt.err (!%p4897_p9)
}
  0x1d   : > { %4774 = dma.hbm_to_vmem [thread:$0]  (!%p5111_p11), %s8464_s1, 128, %s133_s22, [#allocation8]  }
  0x1e   : > { %s4912_s4 = scalar_lea.vmem %s144_s24, 128  ;;  %p4920_p13 = scmp.lt.s32.totalorder %s144_s24, %s144_s24 }
  0x1f   : > { %p4913_p1 = scmp.ne.s32.totalorder %s144_s24, %s4912_s4  ;;  %p4921_p0 = scmp.lt.s32.totalorder %s4912_s4, %s4912_s4 }
  0x21   : > { %p4915_p2 = pnand %p4913_p1, %p4877_p12  ;;  %p4922_p4 = por %p4921_p0, %p4920_p13 }
  0x23   : > { %p4916_p6 = pneg %p4915_p2 }
  0x25   : > { %p4923_p8 = pnand %p4922_p4, %p4916_p6 }
  0x27   : > { %4926 = shalt.err (!%p4923_p8)
}
  0x28   : > { %4777 = dma.hbm_to_vmem [thread:$0]  (!%p5111_p11), %s8465_s2, 128, %s144_s24, [#allocation8]  }
  0x29   : > { %p25_p1 = scmp.eq.s32.totalorder %s24_s27, 0  ;;  %s27_s7 = sadd.s32 1, %s5019_s14 }
  0x2a   : > { %p34_p2 = scmp.ne.s32.totalorder %s5019_s14, %s5015_s13  ;;  %p35_p4 = scmp.eq.s32.totalorder %s5023_s15, 0 }
  0x2b   : > { %s5143_s8 = scalar_select %p25_p1, %s5019_s14, %s27_s7  }
  0x2c   : > { %p36_p6 = por %p35_p4, %p34_p2  ;;  %p8548_p8 = scmp.eq.s32.totalorder %s5083_s16, 1 }
  0x2d   : > { %p4788_p12 = scmp.lt.s32.totalorder %s5023_s15, 2  ;;  %s154_s10 = sand.u32 1, %s5019_s14  }
  0x2e   : > { %p5147_p9 = por %p8548_p8, %p34_p2  ;;  %s4742_s11 = sshll.u32 %s154_s10, 4 }
  0x2f   : > { %s4757_s17 = sshll.u32 %s5023_s15, 8  ;;  %s158_s24 = scalar_lea.vmem [#allocation4], %s4742_s11 }
  0x30   : > { %s8549_s9 = scalar_select %p5147_p9, 1, 0 }
  0x31   : > { %s5157_s23 = scalar_lea.hbm %s8463_s0, %s4757_s17  ;;  %s166_s25 = sshll.u32 %s158_s24, 4  ;;  %s167_s25 = int_to_ptr.vmem [resolvable:$true] %s166_s25 }
  0x32   : > { %p5159_p11 = pnand %p4788_p12, %p36_p6  ;;  %s155_s28 = scalar_lea.sflag [#allocation5], %s154_s10 }
  0x33   : > { %s4927_s29 = scalar_lea.hbm %s5157_s23, 256  ;;  %s4932_s5 = scalar_lea.hbm %s8463_s0, 512 }
  0x34   : > { %p4928_p3 = scmp.ne.s32.totalorder %s5157_s23, %s4927_s29  ;;  %p4929_p5 = pneg %p5159_p11 }
  0x35   : > { %p4933_p13 = scmp.lt.s32.totalorder %s5157_s23, %s8463_s0  ;;  %p4934_p0 = scmp.lt.s32.totalorder %s4932_s5, %s4927_s29 }
  0x36   : > { %p4930_p7 = pnand %p4929_p5, %p4928_p3 }
  0x37   : > { %p4935_p1 = por %p4934_p0, %p4933_p13 }
  0x38   : > { %p4931_p10 = pneg %p4930_p7 }
  0x3a   : > { %p4936_p2 = pnand %p4935_p1, %p4931_p10 }
  0x3c   : > { %4939 = shalt.err (!%p4936_p2)
}
  0x3d   : > { %s4940_s11 = scalar_lea.vmem %s167_s25, 256  ;;  %s5027_s10 = smov [#allocation4]  }
  0x3e   : > { %p4941_p4 = scmp.ne.s32.totalorder %s167_s25, %s4940_s11  ;;  %s4945_s17 = sshll.u32 %s5027_s10, 4  ;;  %s4946_s17 = int_to_ptr.vmem [resolvable:$false] %s4945_s17 }
  0x3f   : > { %s4947_s21 = scalar_lea.vmem %s4946_s17, 512  ;;  %p4948_p12 = scmp.lt.s32.totalorder %s167_s25, %s4946_s17 }
  0x40   : > { %p4943_p6 = pnand %p4941_p4, %p4929_p5  ;;  %p4949_p3 = scmp.lt.s32.totalorder %s4947_s21, %s4940_s11 }
  0x42   : > { %p4944_p8 = pneg %p4943_p6  ;;  %p4950_p7 = por %p4949_p3, %p4948_p12 }
  0x44   : > { %p4951_p9 = pnand %p4950_p7, %p4944_p8 }
  0x46   : > { %4954 = shalt.err (!%p4951_p9)
}
  0x47   : > { %4781 = dma.hbm_to_vmem [thread:$0]  (!%p5159_p11), %s5157_s23, 256, %s167_s25, %s155_s28  }
  0x48   : > { %p8551_p10 = scmp.ne.s32.totalorder %s8546_s20, 0 }
  0x4a   : > { %175 = sbr.rel (%p8551_p10) target bundleno = 2034 (0x7f2), region = 32 }
  0x4f   : > { %s5180_s22 = sand.u32 1, %s5015_s13   ;;  %p8552_p9 = scmp.ne.s32.totalorder %s8544_s18, 0 }
  0x50   : > { %s4746_s24 = sshll.u32 %s5180_s22, 4  ;;  %s178_s29 = scalar_lea.sflag [#allocation5], %s5180_s22 }
  0x51   : > { %s5186_s30 = scalar_lea.vmem [#allocation4], %s4746_s24 }
  0x52   : > { %4998 = dma.done.wait (%p8552_p9), %s178_s29, 256  }
  0x53   : > { %5000 = vsyncadd (%p8552_p9), %s178_s29, 4294967040  ;;  %p8553_p11 = scmp.eq.s32.totalorder %s5083_s16, 0 }
  0x55   : > { %5002 = dma.done.wait (%p8553_p11), [#allocation8], 256   ;;  %p8554_p5 = pmov %p8553_p11 }
  0x56   : > { %v212_v0 = vlaneseq  ;;  %v5028_v1 = vmov 1966171168   ;;  %v243_v6 = vld [vmem:[%s5186_s30] sm:$0xff]  ;;  %v244_v7 = vld [vmem:[%s5186_s30 + $0x8] sm:$0xff]  ;;  %v8556_v16 = vmov 0  ;;  %s5029_s18 = smov 32  }
  0x57   : > { %5004 = vsyncadd (%p8554_p5), [#allocation8], 4294967040  ;;  %v250_v2 = vunpack.c.l.s4 %v5028_v1  ;;  %v247_v8 = vcombine.low %v243_v6, %v244_v7  ;;  %v248_v9 = vcombine.high %v243_v6, %v244_v7  ;;  %s5030_s20 = smov 64   ;;  %vm8481_vm3 = vcmask 261120   ;;  %s5031_s23 = smov 79  }
  0x58   : > { %v5197_v3 = vshrl.u32 %v212_v0, 7  ;;  %vm5209_vm0 = vcmp.lt.s32.totalorder %v212_v0, 32  ;;  %vm5248_vm1 = vcmp.ge.s32.totalorder %v212_v0, 32  ;;  %vm359_vm2 = vcmp.lt.s32.totalorder %v212_v0, 288  ;;  %s5032_s25 = smov 81   ;;  %s5033_s27 = smov 95  }
  0x59   : > { %v251_v4 = vunpack.c.0.s8 %v250_v2  ;;  %v8557_v16 = vsel %vm5209_vm0, 4294967295, %v8556_v16  ;;  %vm5255_vm4 = vmand %vm5248_vm1, %vm359_vm2  ;;  %v8561_v27 = vmov 0  ;;  %vm401_vm5 = vcmp.lt.s32.totalorder %v212_v0, 64  ;;  %s5034_s28 = smov 97   ;;  %s5035_s4 = smov 111  }
  0x5a   : > { %8558 = vst [vmem:[#allocation15_spill] sm:$0xff] %v8557_v16  ;;  %v8562_v27 = vsel %vm5255_vm4, 4294967295, %v8561_v27  ;;  %vm5272_vm6 = vmand %vm5248_vm1, %vm401_vm5  ;;  %v8564_v39 = vmov 0  ;;  %v5303_v2 = vsub.s32 1, %v5197_v3  ;;  %v5308_v6 = vsub.s32 2, %v5197_v3  ;;  %s5036_s5 = smov 113  }
  0x5b   : > { %v5200_v5 = vsub.s32 %v251_v4, %v5197_v3  ;;  %8563 = vst [vmem:[#allocation16_spill] sm:$0xff] %v8562_v27  ;;  %v8565_v39 = vsel %vm5272_vm6, 4294967295, %v8564_v39  ;;  %vm8488_vm7 = vcmask 646144   ;;  %vm8489_vm8 = vcmask 662528   ;;  %s5037_s6 = smov 80   ;;  %s5038_s7 = smov 96  }
  0x5c   : > { %8566 = vst [vmem:[#allocation17_spill] sm:$0xff] %v8565_v39  ;;  %8567 = vst [vmem:[#allocation18_spill] sm:$0xff] %v5303_v2  ;;  %vm8490_vm11 = vcmask 1041409   ;;  %vm8495_vm12 = vcmask 1042434   ;;  %vm8493_vm13 = vcmask 777216   ;;  %vm8484_vm14 = vcmask 793600  }
  0x5d   : > { %8555 = vst [vmem:[#allocation14_spill] sm:$0xff] %v5200_v5  ;;  %v255_v10 = vrot.slane %v247_v8, %v5200_v5  ;;  %v262_v11 = vrot.slane %v248_v9, %v5200_v5  ;;  %vm8487_vm2 = vcmask 1043459   ;;  %vm743_vm5 = vcmask 1044484   ;;  %s5040_s11 = smov 112   ;;  %s4758_s10 = sshll.u32 %s5083_s16, 8 }
  0x5e   : > { %s211_s17 = scalar_lea.vmem [#allocation10], %s4746_s24  ;;  %p8934_p0 = scmp.ne.s32.totalorder %s8549_s9, 0 }
  0x5f   : > { %v271_v12 = vrot.slane %v255_v10, %v5200_v5  ;;  %v263_v13 = vcombine.high %v255_v10, %v255_v10  ;;  %v278_v14 = vrot.slane %v262_v11, %v5200_v5  ;;  %v264_v15 = vcombine.high %v262_v11, %v262_v11  ;;  %s4648_s21 = sshll.u32 %s211_s17, 4  ;;  %s5041_s24 = smov [#allocation10]   ;;  %s4649_s21 = int_to_ptr.vmem [resolvable:$true] %s4648_s21 }
  0x60   : > { %v5323_v11 = vsub.s32 0, %v5197_v3  ;;  %s4955_s16 = scalar_lea.vmem %s4649_s21, 256 }
  0x61   : > { %317 = vrot.lane.b32.xlu1 %v271_v12, %s5029_s18  ;;  %v285_v17 = vrot.slane %v263_v13, %v5200_v5  ;;  %v293_v18 = vcombine.high %v271_v12, %v271_v12  ;;  %309 = vst.msk [vmem:[#allocation2] sm:$0x1] %vm5209_vm0, %v271_v12  ;;  %313 = vst.msk [vmem:[#allocation2 + $0xc] sm:$0x1] %vm5209_vm0, %v278_v14  ;;  %v292_v19 = vrot.slane %v264_v15, %v5200_v5  ;;  %p4956_p13 = scmp.ne.s32.totalorder %s4649_s21, %s4955_s16 }
  0x62   : > { %v294_v20 = vcombine.high %v278_v14, %v278_v14  ;;  %8568 = vst [vmem:[#allocation19_spill] sm:$0xff] %v5323_v11 }
  0x63   : > { %319 = vrot.lane.b32.xlu0 %v285_v17, %s5029_s18  ;;  %311 = vst.msk [vmem:[#allocation2 + $0x6] sm:$0x1] %vm5209_vm0, %v293_v18  ;;  %310 = vst.msk [vmem:[#allocation2 + $0x3] sm:$0x1] %vm5209_vm0, %v285_v17  ;;  %v295_v21 = vcombine.high %v285_v17, %v285_v17  ;;  %v296_v22 = vcombine.high %v292_v19, %v292_v19  ;;  %p4957_p1 = pnand %p4956_p13, %p8934_p0 }
  0x64   : > { %314 = vst.msk [vmem:[#allocation2 + $0xf] sm:$0x1] %vm5209_vm0, %v292_v19  ;;  %315 = vst.msk [vmem:[#allocation2 + $0x12] sm:$0x1] %vm5209_vm0, %v294_v20 }
  0x65   : > { %325 = vrot.lane.b32.xlu1 %v278_v14, %s5029_s18  ;;  %312 = vst.msk [vmem:[#allocation2 + $0x9] sm:$0x1] %vm5209_vm0, %v295_v21  ;;  %316 = vst.msk [vmem:[#allocation2 + $0x15] sm:$0x1] %vm5209_vm0, %v296_v22  ;;  %p4958_p2 = pneg %p4957_p1 }
  0x67   : > { %321 = vrot.lane.b32.xlu0 %v293_v18, %s5029_s18 }
  0x69   : > { %327 = vrot.lane.b32.xlu1 %v292_v19, %s5029_s18 }
  0x6b   : > { %371 = vrot.lane.b32.xlu0 %v285_v17, %s5030_s20 }
  0x6d   : > { %323 = vrot.lane.b32.xlu1 %v295_v21, %s5029_s18 }
  0x6f   : > { %373 = vrot.lane.b32.xlu0 %v293_v18, %s5030_s20 }
  0x71   : > { %331 = vrot.lane.b32.xlu1 %v296_v22, %s5029_s18 }
  0x73   : > { %329 = vrot.lane.b32.xlu0 %v294_v20, %s5029_s18 }
  0x75   : > { %375 = vrot.lane.b32.xlu1 %v295_v21, %s5030_s20 }
  0x77   : > { %369 = vrot.lane.b32.xlu0 %v271_v12, %s5030_s20 }
  0x79   : > { %379 = vrot.lane.b32.xlu1 %v292_v19, %s5030_s20 }
  0x7b   : > { %377 = vrot.lane.b32.xlu0 %v278_v14, %s5030_s20 }
  0x7d   : > { %383 = vrot.lane.b32.xlu1 %v296_v22, %s5030_s20 }
  0x7f   : > { %381 = vrot.lane.b32.xlu0 %v294_v20, %s5030_s20 }
  0xd3   : > { %v318_v24 = vpop.permute.xlu1 %317 }
  0xd4   : > { %v333_v25 = vrot.slane %v318_v24, 7 }
  0xd5   : > { %v320_v26 = vpop.permute.xlu0 %319 }
  0xd6   : > { %v342_v28 = vsel %vm8481_vm3, %v333_v25, %v318_v24  ;;  %v334_v29 = vrot.slane %v320_v26, 7 }
  0xd7   : > { %361 = vst.msk [vmem:[#allocation2] sm:$0x7] %vm5255_vm4, %v342_v28  ;;  %v326_v30 = vpop.permute.xlu1 %325 }
  0xd8   : > { %v343_v31 = vsel %vm8481_vm3, %v334_v29, %v320_v26  ;;  %v337_v32 = vrot.slane %v326_v30, 7 }
  0xd9   : > { %362 = vst.msk [vmem:[#allocation2 + $0x3] sm:$0x7] %vm5255_vm4, %v343_v31  ;;  %v322_v33 = vpop.permute.xlu0 %321 }
  0xda   : > { %v346_v34 = vsel %vm8481_vm3, %v337_v32, %v326_v30  ;;  %v335_v35 = vrot.slane %v322_v33, 7 }
  0xdb   : > { %365 = vst.msk [vmem:[#allocation2 + $0xc] sm:$0x7] %vm5255_vm4, %v346_v34  ;;  %v328_v36 = vpop.permute.xlu1 %327 }
  0xdc   : > { %v344_v37 = vsel %vm8481_vm3, %v335_v35, %v322_v33  ;;  %v338_v38 = vrot.slane %v328_v36, 7 }
  0xdd   : > { %363 = vst.msk [vmem:[#allocation2 + $0x6] sm:$0x7] %vm5255_vm4, %v344_v37  ;;  %v372_v40 = vpop.permute.xlu0 %371 }
  0xde   : > { %v347_v41 = vsel %vm8481_vm3, %v338_v38, %v328_v36  ;;  %v386_v42 = vrot.slane %v372_v40, 1 }
  0xdf   : > { %366 = vst.msk [vmem:[#allocation2 + $0xf] sm:$0x7] %vm5255_vm4, %v347_v41  ;;  %v324_v43 = vpop.permute.xlu1 %323 }
  0xe0   : > { %404 = vst.msk [vmem:[#allocation2 + $0x5] sm:$0x1] %vm5272_vm6, %v386_v42  ;;  %v336_v44 = vrot.slane %v324_v43, 7 }
  0xe1   : > { %v374_v45 = vpop.permute.xlu0 %373 }
  0xe2   : > { %v345_v46 = vsel %vm8481_vm3, %v336_v44, %v324_v43  ;;  %v387_v47 = vrot.slane %v374_v45, 1 }
  0xe3   : > { %364 = vst.msk [vmem:[#allocation2 + $0x9] sm:$0x7] %vm5255_vm4, %v345_v46  ;;  %v332_v48 = vpop.permute.xlu1 %331 }
  0xe4   : > { %405 = vst.msk [vmem:[#allocation2 + $0x8] sm:$0x1] %vm5272_vm6, %v387_v47  ;;  %v340_v49 = vrot.slane %v332_v48, 7 }
  0xe5   : > { %v330_v50 = vpop.permute.xlu0 %329 }
  0xe6   : > { %v349_v51 = vsel %vm8481_vm3, %v340_v49, %v332_v48  ;;  %v339_v52 = vrot.slane %v330_v50, 7  ;;  %v5446_v48 = vand.u32 127, %v212_v0 }
  0xe7   : > { %368 = vst.msk [vmem:[#allocation2 + $0x15] sm:$0x7] %vm5255_vm4, %v349_v51  ;;  %v376_v53 = vpop.permute.xlu1 %375  ;;  %v5339_v15 = vld [vmem:[#allocation2 + $0x3] sm:$0x7] }
  0xe8   : > { %v348_v54 = vsel %vm8481_vm3, %v339_v52, %v330_v50  ;;  %v388_v55 = vrot.slane %v376_v53, 1  ;;  %v1421_v17 = vrot.slane %v5339_v15, %v5308_v6  ;;  %v1417_v19 = vrot.slane %v5339_v15, %v5303_v2  ;;  %v5391_v32 = vld [vmem:[#allocation2 + $0x3] sm:$0x7] }
  0xe9   : > { %367 = vst.msk [vmem:[#allocation2 + $0x12] sm:$0x7] %vm5255_vm4, %v348_v54  ;;  %v370_v56 = vpop.permute.xlu0 %369  ;;  %v1413_v21 = vrot.slane %v5339_v15, %v5323_v11  ;;  %v939_v33 = vrot.slane %v5391_v32, %v5308_v6  ;;  %v935_v35 = vrot.slane %v5391_v32, %v5303_v2  ;;  %v931_v38 = vrot.slane %v5391_v32, %v5323_v11 }
  0xea   : > { %406 = vst.msk [vmem:[#allocation2 + $0xb] sm:$0x1] %vm5272_vm6, %v388_v55  ;;  %v385_v57 = vrot.slane %v370_v56, 1  ;;  %v5451_v49 = vadd.s32 128, %v5446_v48  ;;  %vm746_vm3 = vcmask 1045509  }
  0xeb   : > { %v380_v58 = vpop.permute.xlu1 %379  ;;  %v5347_v18 = vld [vmem:[#allocation2 + $0x6] sm:$0x7] }
  0xec   : > { %403 = vst.msk [vmem:[#allocation2 + $0x2] sm:$0x1] %vm5272_vm6, %v385_v57  ;;  %v390_v59 = vrot.slane %v380_v58, 1  ;;  %v1429_v20 = vrot.slane %v5347_v18, %v5303_v2  ;;  %v1433_v22 = vrot.slane %v5347_v18, %v5308_v6  ;;  %v1425_v23 = vrot.slane %v5347_v18, %v5323_v11  ;;  %v5405_v36 = vld [vmem:[#allocation2 + $0x6] sm:$0x7] }
  0xed   : > { %v378_v60 = vpop.permute.xlu0 %377  ;;  %8569 = vst [vmem:[#allocation20_spill] sm:$0xff] %v5405_v36  ;;  %v947_v37 = vrot.slane %v5405_v36, %v5303_v2  ;;  %v951_v40 = vrot.slane %v5405_v36, %v5308_v6  ;;  %v8472_v52 = vand.u32 15, %v5451_v49 }
  0xee   : > { %v389_v61 = vrot.slane %v378_v60, 1  ;;  %408 = vst.msk [vmem:[#allocation2 + $0x11] sm:$0x1] %vm5272_vm6, %v390_v59  ;;  %v943_v60 = vrot.slane %v5405_v36, %v5323_v11 }
  0xef   : > { %v384_v62 = vpop.permute.xlu1 %383  ;;  %vm5468_vm9 = vcmp.eq.s32.totalorder %v8472_v52, 0 }
  0xf0   : > { %407 = vst.msk [vmem:[#allocation2 + $0xe] sm:$0x1] %vm5272_vm6, %v389_v61  ;;  %v392_v63 = vrot.slane %v384_v62, 1 }
  0xf1   : > { %v382_v1 = vpop.permute.xlu0 %381  ;;  %v5421_v41 = vld [vmem:[#allocation2 + $0x9] sm:$0x7] }
  0xf2   : > { %v391_v4 = vrot.slane %v382_v1, 1  ;;  %410 = vst.msk [vmem:[#allocation2 + $0x17] sm:$0x1] %vm5272_vm6, %v392_v63  ;;  %v1441_v42 = vrot.slane %v5421_v41, %v5303_v2  ;;  %v1445_v43 = vrot.slane %v5421_v41, %v5308_v6  ;;  %v1437_v44 = vrot.slane %v5421_v41, %v5323_v11  ;;  %v5472_v57 = vld [vmem:[#allocation2 + $0x9] sm:$0x7] }
  0xf3   : > { %v5310_v7 = vld [vmem:[#allocation2] sm:$0x7]  ;;  %8572 = vst [vmem:[#allocation21_spill] sm:$0xff] %v5472_v57  ;;  %v959_v61 = vrot.slane %v5472_v57, %v5303_v2 }
  0xf4   : > { %409 = vst.msk [vmem:[#allocation2 + $0x14] sm:$0x1] %vm5272_vm6, %v391_v4  ;;  %v1405_v8 = vrot.slane %v5310_v7, %v5303_v2  ;;  %v1409_v9 = vrot.slane %v5310_v7, %v5308_v6  ;;  %v1401_v13 = vrot.slane %v5310_v7, %v5323_v11  ;;  %v5455_v51 = vld [vmem:[#allocation2] sm:$0x7] }
  0xf5   : > { %v5369_v24 = vld [vmem:[#allocation2 + $0xf] sm:$0x7]  ;;  %v923_v54 = vrot.slane %v5455_v51, %v5303_v2  ;;  %v927_v55 = vrot.slane %v5455_v51, %v5308_v6 }
  0xf6   : > { %1496 = vrot.lane.b32.xlu0 %v1405_v8, %s5031_s23  ;;  %1498 = vrot.lane.b32.xlu1 %v1409_v9, %s5031_s23  ;;  %v1465_v25 = vrot.slane %v5369_v24, %v5303_v2  ;;  %v1469_v26 = vrot.slane %v5369_v24, %v5308_v6  ;;  %v1461_v30 = vrot.slane %v5369_v24, %v5323_v11 }
  0xf7   : > { %v5320_v10 = vld [vmem:[#allocation2 + $0xc] sm:$0x7] }
  0xf8   : > { %v1457_v12 = vrot.slane %v5320_v10, %v5308_v6  ;;  %v1453_v14 = vrot.slane %v5320_v10, %v5303_v2  ;;  %v1449_v3 = vrot.slane %v5320_v10, %v5323_v11 }
  0xf9   : > { %v5437_v45 = vld [vmem:[#allocation2 + $0x15] sm:$0x7] }
  0xfa   : > { %1579 = vrot.lane.b32.xlu0 %v1409_v9, %s5032_s25  ;;  %1577 = vrot.lane.b32.xlu1 %v1405_v8, %s5032_s25  ;;  %v1493_v46 = vrot.slane %v5437_v45, %v5308_v6  ;;  %v1489_v47 = vrot.slane %v5437_v45, %v5303_v2  ;;  %v1485_v50 = vrot.slane %v5437_v45, %v5323_v11 }
  0xfb   : > { %v5377_v28 = vld [vmem:[#allocation2 + $0x12] sm:$0x7]  ;;  %v963_v9 = vrot.slane %v5472_v57, %v5308_v6 }
  0xfc   : > { %v1477_v29 = vrot.slane %v5377_v28, %v5303_v2  ;;  %v1481_v31 = vrot.slane %v5377_v28, %v5308_v6  ;;  %v1473_v34 = vrot.slane %v5377_v28, %v5323_v11 }
  0xfe   : > { %1494 = vrot.lane.b32.xlu0 %v1401_v13, %s5031_s23  ;;  %1522 = vrot.lane.b32.xlu1 %v1457_v12, %s5031_s23 }
 0x102   : > { %1520 = vrot.lane.b32.xlu0 %v1453_v14, %s5031_s23  ;;  %1603 = vrot.lane.b32.xlu1 %v1457_v12, %s5032_s25  ;;  %v8471_v12 = vand.u32 15, %v5446_v48 }
 0x104   : > { %vm5499_vm10 = vcmp.eq.s32.totalorder %v8471_v12, 0 }
 0x106   : > { %1575 = vrot.lane.b32.xlu0 %v1401_v13, %s5032_s25  ;;  %1599 = vrot.lane.b32.xlu1 %v1449_v3, %s5032_s25 }
 0x10a   : > { %1601 = vrot.lane.b32.xlu0 %v1453_v14, %s5032_s25  ;;  %1504 = vrot.lane.b32.xlu1 %v1421_v17, %s5031_s23 }
 0x10e   : > { %1518 = vrot.lane.b32.xlu0 %v1449_v3, %s5031_s23  ;;  %1585 = vrot.lane.b32.xlu1 %v1421_v17, %s5032_s25 }
 0x112   : > { %1502 = vrot.lane.b32.xlu0 %v1417_v19, %s5031_s23  ;;  %1508 = vrot.lane.b32.xlu1 %v1429_v20, %s5031_s23 }
 0x116   : > { %1583 = vrot.lane.b32.xlu0 %v1417_v19, %s5032_s25  ;;  %1581 = vrot.lane.b32.xlu1 %v1413_v21, %s5032_s25 }
 0x11a   : > { %1500 = vrot.lane.b32.xlu0 %v1413_v21, %s5031_s23  ;;  %1591 = vrot.lane.b32.xlu1 %v1433_v22, %s5032_s25 }
 0x11e   : > { %1510 = vrot.lane.b32.xlu0 %v1433_v22, %s5031_s23  ;;  %1587 = vrot.lane.b32.xlu1 %v1425_v23, %s5032_s25 }
 0x122   : > { %1589 = vrot.lane.b32.xlu0 %v1429_v20, %s5032_s25  ;;  %1526 = vrot.lane.b32.xlu1 %v1465_v25, %s5031_s23 }
 0x126   : > { %1506 = vrot.lane.b32.xlu0 %v1425_v23, %s5031_s23  ;;  %1609 = vrot.lane.b32.xlu1 %v1469_v26, %s5032_s25 }
 0x12a   : > { %1528 = vrot.lane.b32.xlu0 %v1469_v26, %s5031_s23  ;;  %1532 = vrot.lane.b32.xlu1 %v1477_v29, %s5031_s23  ;;  %v919_v26 = vrot.slane %v5455_v51, %v5323_v11 }
 0x12e   : > { %1607 = vrot.lane.b32.xlu0 %v1465_v25, %s5032_s25  ;;  %1605 = vrot.lane.b32.xlu1 %v1461_v30, %s5032_s25 }
 0x132   : > { %1615 = vrot.lane.b32.xlu1 %v1481_v31, %s5032_s25  ;;  %1524 = vrot.lane.b32.xlu0 %v1461_v30, %s5031_s23 }
 0x136   : > { %1022 = vrot.lane.b32.xlu1 %v939_v33, %s5033_s27  ;;  %1534 = vrot.lane.b32.xlu0 %v1481_v31, %s5031_s23 }
 0x13a   : > { %1103 = vrot.lane.b32.xlu1 %v939_v33, %s5034_s28  ;;  %1613 = vrot.lane.b32.xlu0 %v1477_v29, %s5032_s25  ;;  %v955_v29 = vrot.slane %v5472_v57, %v5323_v11  ;;  %v5525_v33 = vld [vmem:[#allocation2 + $0xc] sm:$0x7] }
 0x13e   : > { %1611 = vrot.lane.b32.xlu1 %v1473_v34, %s5032_s25  ;;  %1020 = vrot.lane.b32.xlu0 %v935_v35, %s5033_s27 }
 0x142   : > { %1026 = vrot.lane.b32.xlu1 %v947_v37, %s5033_s27  ;;  %1101 = vrot.lane.b32.xlu0 %v935_v35, %s5034_s28 }
 0x146   : > { %1099 = vrot.lane.b32.xlu1 %v931_v38, %s5034_s28  ;;  %1530 = vrot.lane.b32.xlu0 %v1473_v34, %s5031_s23 }
 0x14a   : > { %1109 = vrot.lane.b32.xlu1 %v951_v40, %s5034_s28  ;;  %1018 = vrot.lane.b32.xlu0 %v931_v38, %s5033_s27  ;;  %v971_v38 = vrot.slane %v5525_v33, %v5303_v2 }
 0x14e   : > { %1028 = vrot.lane.b32.xlu0 %v951_v40, %s5033_s27  ;;  %1514 = vrot.lane.b32.xlu1 %v1441_v42, %s5031_s23  ;;  %v975_v40 = vrot.slane %v5525_v33, %v5308_v6 }
 0x152   : > { %1107 = vrot.lane.b32.xlu0 %v947_v37, %s5034_s28  ;;  %1597 = vrot.lane.b32.xlu1 %v1445_v43, %s5032_s25 }
 0x156   : > { %1516 = vrot.lane.b32.xlu0 %v1445_v43, %s5031_s23  ;;  %1512 = vrot.lane.b32.xlu1 %v1437_v44, %s5031_s23 }
 0x15a   : > { %1595 = vrot.lane.b32.xlu0 %v1441_v42, %s5032_s25  ;;  %1593 = vrot.lane.b32.xlu1 %v1437_v44, %s5032_s25  ;;  %v1738_v44 = vcombine.low %v5320_v10, %v5369_v24 }
 0x15e   : > { %1540 = vrot.lane.b32.xlu0 %v1493_v46, %s5031_s23  ;;  %1538 = vrot.lane.b32.xlu1 %v1489_v47, %s5031_s23 }
 0x162   : > { %1619 = vrot.lane.b32.xlu0 %v1489_v47, %s5032_s25  ;;  %1621 = vrot.lane.b32.xlu1 %v1493_v46, %s5032_s25 }
 0x166   : > { %1536 = vrot.lane.b32.xlu0 %v1485_v50, %s5031_s23  ;;  %1617 = vrot.lane.b32.xlu1 %v1485_v50, %s5032_s25 }
 0x168   : > { %v1497_v0 = vpop.permute.xlu0 %1496  ;;  %v1499_v53 = vpop.permute.xlu1 %1498 }
 0x169   : > { %v5479_v62 = vsel %vm8488_vm7, %v1497_v0, %v1499_v53 }
 0x16a   : > { %1014 = vrot.lane.b32.xlu0 %v923_v54, %s5033_s27  ;;  %1016 = vrot.lane.b32.xlu1 %v927_v55, %s5033_s27 }
 0x16c   : > { %v1580_v58 = vpop.permute.xlu0 %1579  ;;  %v1578_v59 = vpop.permute.xlu1 %1577 }
 0x16d   : > { %v5482_v63 = vsel %vm8489_vm8, %v1578_v59, %v1580_v58 }
 0x16e   : > { %v1657_v1 = vsel %vm5468_vm9, %v5479_v62, %v5482_v63  ;;  %1024 = vrot.lane.b32.xlu0 %v943_v60, %s5033_s27  ;;  %1032 = vrot.lane.b32.xlu1 %v959_v61, %s5033_s27 }
 0x170   : > { %v1495_v4 = vpop.permute.xlu0 %1494  ;;  %v1523_v8 = vpop.permute.xlu1 %1522 }
 0x171   : > { %v5504_v20 = vsel %vm8488_vm7, %v1495_v4, %v1497_v0  ;;  %v967_v4 = vrot.slane %v5525_v33, %v5323_v11 }
 0x172   : > { %1034 = vrot.lane.b32.xlu0 %v963_v9, %s5033_s27  ;;  %1095 = vrot.lane.b32.xlu1 %v923_v54, %s5034_s28 }
 0x174   : > { %v1521_v13 = vpop.permute.xlu0 %1520  ;;  %v1604_v14 = vpop.permute.xlu1 %1603 }
 0x175   : > { %v5520_v30 = vsel %vm8488_vm7, %v1521_v13, %v1523_v8 }
 0x176   : > { %1097 = vrot.lane.b32.xlu0 %v927_v55, %s5034_s28  ;;  %1105 = vrot.lane.b32.xlu1 %v943_v60, %s5034_s28 }
 0x178   : > { %v1576_v17 = vpop.permute.xlu0 %1575  ;;  %v1600_v19 = vpop.permute.xlu1 %1599 }
 0x179   : > { %v5507_v21 = vsel %vm8489_vm8, %v1576_v17, %v1578_v59  ;;  %v5563_v59 = vld [vmem:[#allocation2 + $0xf] sm:$0x7] }
 0x17a   : > { %v1656_v22 = vsel %vm5499_vm10, %v5504_v20, %v5507_v21  ;;  %1113 = vrot.lane.b32.xlu0 %v959_v61, %s5034_s28  ;;  %1115 = vrot.lane.b32.xlu1 %v963_v9, %s5034_s28  ;;  %v983_v8 = vrot.slane %v5563_v59, %v5303_v2 }
 0x17c   : > { %v1602_v23 = vpop.permute.xlu0 %1601  ;;  %v1505_v25 = vpop.permute.xlu1 %1504 }
 0x17d   : > { %v5523_v31 = vsel %vm8489_vm8, %v1602_v23, %v1604_v14  ;;  %v5538_v42 = vsel %vm8489_vm8, %v1600_v19, %v1602_v23 }
 0x17e   : > { %1012 = vrot.lane.b32.xlu0 %v919_v26, %s5033_s27  ;;  %1030 = vrot.lane.b32.xlu1 %v955_v29, %s5033_s27 }
 0x180   : > { %v1519_v35 = vpop.permute.xlu0 %1518  ;;  %v1586_v37 = vpop.permute.xlu1 %1585 }
 0x181   : > { %v5541_v43 = vsel %vm8488_vm7, %v1519_v35, %v1521_v13 }
 0x182   : > { %1038 = vrot.lane.b32.xlu0 %v971_v38, %s5033_s27  ;;  %1040 = vrot.lane.b32.xlu1 %v975_v40, %s5033_s27 }
 0x184   : > { %v1503_v46 = vpop.permute.xlu0 %1502  ;;  %v1509_v47 = vpop.permute.xlu1 %1508 }
 0x185   : > { %v5552_v53 = vsel %vm8488_vm7, %v1503_v46, %v1505_v25 }
 0x186   : > { %1093 = vrot.lane.b32.xlu0 %v919_v26, %s5034_s28  ;;  %1111 = vrot.lane.b32.xlu1 %v955_v29, %s5034_s28 }
 0x188   : > { %v1584_v50 = vpop.permute.xlu0 %1583  ;;  %v1582_v0 = vpop.permute.xlu1 %1581 }
 0x189   : > { %v5555_v54 = vsel %vm8489_vm8, %v1584_v50, %v1586_v37  ;;  %v5571_v13 = vsel %vm8489_vm8, %v1582_v0, %v1584_v50 }
 0x18a   : > { %v1659_v55 = vsel %vm5468_vm9, %v5552_v53, %v5555_v54  ;;  %1119 = vrot.lane.b32.xlu0 %v971_v38, %s5034_s28  ;;  %1121 = vrot.lane.b32.xlu1 %v975_v40, %s5034_s28  ;;  %v5593_v40 = vld [vmem:[#allocation2 + $0x12] sm:$0x7] }
 0x18b   : > { %v1718_v58 = vrot.slane %v1659_v55, 7  ;;  %v979_v55 = vrot.slane %v5563_v59, %v5323_v11  ;;  %v991_v10 = vrot.slane %v5593_v40, %v5323_v11 }
 0x18c   : > { %v1501_v60 = vpop.permute.xlu0 %1500  ;;  %v1592_v61 = vpop.permute.xlu1 %1591 }
 0x18d   : > { %v1719_v9 = vsel %vm8490_vm11, %v1718_v58, %v1657_v1  ;;  %v5574_v14 = vsel %vm8488_vm7, %v1501_v60, %v1503_v46  ;;  %v987_v1 = vrot.slane %v5563_v59, %v5308_v6  ;;  %v995_v58 = vrot.slane %v5593_v40, %v5303_v2 }
 0x18e   : > { %v1658_v17 = vsel %vm5499_vm10, %v5574_v14, %v5571_v13  ;;  %1036 = vrot.lane.b32.xlu0 %v967_v4, %s5033_s27  ;;  %1044 = vrot.lane.b32.xlu1 %v983_v8, %s5033_s27 }
 0x18f   : > { %v1704_v19 = vrot.slane %v1658_v17, 7 }
 0x190   : > { %v1511_v23 = vpop.permute.xlu0 %1510  ;;  %v1588_v25 = vpop.permute.xlu1 %1587 }
 0x191   : > { %v1705_v26 = vsel %vm8490_vm11, %v1704_v19, %v1656_v22  ;;  %v5588_v37 = vsel %vm8488_vm7, %v1509_v47, %v1511_v23 }
 0x192   : > { %1046 = vrot.lane.b32.xlu0 %v987_v1, %s5033_s27  ;;  %1117 = vrot.lane.b32.xlu1 %v967_v4, %s5034_s28 }
 0x194   : > { %v1590_v29 = vpop.permute.xlu0 %1589  ;;  %v1527_v35 = vpop.permute.xlu1 %1526 }
 0x195   : > { %v5591_v38 = vsel %vm8489_vm8, %v1590_v29, %v1592_v61  ;;  %v5606_v60 = vsel %vm8489_vm8, %v1588_v25, %v1590_v29 }
 0x196   : > { %v1661_v22 = vsel %vm5468_vm9, %v5588_v37, %v5591_v38  ;;  %1125 = vrot.lane.b32.xlu0 %v983_v8, %s5034_s28  ;;  %1127 = vrot.lane.b32.xlu1 %v987_v1, %s5034_s28 }
 0x197   : > { %v1720_v46 = vrot.slane %v1661_v22, 6 }
 0x198   : > { %v1507_v50 = vpop.permute.xlu0 %1506  ;;  %v1610_v0 = vpop.permute.xlu1 %1609 }
 0x199   : > { %v5609_v61 = vsel %vm8495_vm12, %v1720_v46, %v1719_v9  ;;  %v5612_v4 = vsel %vm8488_vm7, %v1507_v50, %v1509_v47  ;;  %v999_v9 = vrot.slane %v5593_v40, %v5308_v6  ;;  %v5635_v46 = vld [vmem:[#allocation2 + $0x3] sm:$0x7] }
 0x19a   : > { %v1660_v8 = vsel %vm5499_vm10, %v5612_v4, %v5606_v60  ;;  %1042 = vrot.lane.b32.xlu0 %v979_v55, %s5033_s27  ;;  %1050 = vrot.lane.b32.xlu1 %v995_v58, %s5033_s27  ;;  %8575 = vst [vmem:[#allocation22_spill] sm:$0xff] %v5635_v46 }
 0x19b   : > { %v1706_v17 = vrot.slane %v1660_v8, 6  ;;  %v446_v8 = vrot.slane %v5635_v46, %v5303_v2 }
 0x19c   : > { %v1529_v19 = vpop.permute.xlu0 %1528  ;;  %v5620_v23 = vpop.permute.xlu1 %1532 }
 0x19d   : > { %v5625_v25 = vsel %vm8495_vm12, %v1706_v17, %v1705_v26  ;;  %v5630_v29 = vsel %vm8488_vm7, %v1527_v35, %v1529_v19 }
 0x19e   : > { %1052 = vrot.lane.b32.xlu0 %v999_v9, %s5033_s27  ;;  %1123 = vrot.lane.b32.xlu1 %v979_v55, %s5034_s28 }
 0x1a0   : > { %v1608_v47 = vpop.permute.xlu0 %1607  ;;  %v1606_v1 = vpop.permute.xlu1 %1605 }
 0x1a1   : > { %v5633_v22 = vsel %vm8489_vm8, %v1608_v47, %v1610_v0  ;;  %v450_v0 = vrot.slane %v5635_v46, %v5308_v6  ;;  %v5648_v17 = vsel %vm8489_vm8, %v1606_v1, %v1608_v47  ;;  %v1739_v47 = vcombine.low %v5377_v28, %v5437_v45  ;;  %v5667_v1 = vld [vmem:[#allocation2 + $0x15] sm:$0x7] }
 0x1a2   : > { %1131 = vrot.lane.b32.xlu0 %v995_v58, %s5034_s28  ;;  %1133 = vrot.lane.b32.xlu1 %v999_v9, %s5034_s28  ;;  %v1007_v24 = vrot.slane %v5667_v1, %v5303_v2  ;;  %v1760_v28 = vrot.slane %v1738_v44, %v5200_v5 }
 0x1a3   : > { %v1767_v45 = vrot.slane %v1739_v47, %v5200_v5 }
 0x1a4   : > { %v1525_v50 = vpop.permute.xlu0 %1524  ;;  %v1616_v55 = vpop.permute.xlu1 %1615 }
 0x1a5   : > { %v5651_v19 = vsel %vm8488_vm7, %v1525_v50, %v1527_v35  ;;  %v1736_v35 = vcombine.low %v5310_v7, %v5339_v15  ;;  %v1737_v50 = vcombine.low %v5347_v18, %v5421_v41  ;;  %v1770_v47 = vcombine.low %v1760_v28, %v1767_v45 }
 0x1a6   : > { %531 = vrot.lane.b32.xlu0 %v446_v8, %s5035_s4  ;;  %533 = vrot.lane.b32.xlu1 %v450_v0, %s5035_s4 }
 0x1a7   : > { %v1746_v41 = vrot.slane %v1736_v35, %v5200_v5  ;;  %v5700_v27 = vrot.slane %v1770_v47, %v5200_v5 }
 0x1a8   : > { %v1535_v9 = vpop.permute.xlu0 %1534  ;;  %v1023_v26 = vpop.permute.xlu1 %1022 }
 0x1a9   : > { %v5679_v7 = vsel %vm8488_vm7, %v5620_v23, %v1535_v9  ;;  %v1753_v9 = vrot.slane %v1737_v50, %v5200_v5 }
 0x1aa   : > { %612 = vrot.lane.b32.xlu0 %v446_v8, %s5036_s5  ;;  %614 = vrot.lane.b32.xlu1 %v450_v0, %s5036_s5  ;;  %v1011_v0 = vrot.slane %v5667_v1, %v5308_v6 }
 0x1ab   : > { %v1769_v18 = vcombine.high %v1746_v41, %v1753_v9  ;;  %v1768_v12 = vcombine.low %v1746_v41, %v1753_v9 }
 0x1ac   : > { %v1614_v58 = vpop.permute.xlu0 %1613  ;;  %v1104_v34 = vpop.permute.xlu1 %1103 }
 0x1ad   : > { %v5682_v15 = vsel %vm8489_vm8, %v1614_v58, %v1616_v55  ;;  %v1771_v55 = vcombine.high %v1760_v28, %v1767_v45  ;;  %v1785_v45 = vrot.slane %v1769_v18, %v5200_v5  ;;  %v5716_v41 = vrot.slane %v1768_v12, %v5200_v5 }
 0x1ae   : > { %1048 = vrot.lane.b32.xlu0 %v991_v10, %s5033_s27  ;;  %1056 = vrot.lane.b32.xlu1 %v1007_v24, %s5033_s27 }
 0x1af   : > { %v1799_v35 = vrot.slane %v1771_v55, %v5200_v5 }
 0x1b0   : > { %v1021_v44 = vpop.permute.xlu0 %1020  ;;  %v1612_v8 = vpop.permute.xlu1 %1611 }
 0x1b1   : > { %v5703_v50 = vsel %vm8493_vm13, %v1021_v44, %v1023_v26  ;;  %v1802_v55 = vcombine.low %v1785_v45, %v1799_v35  ;;  %v5721_v47 = vsel %vm8489_vm8, %v1612_v8, %v1614_v58  ;;  %v442_v58 = vrot.slane %v5635_v46, %v5323_v11  ;;  %v5767_v45 = vld [vmem:[#allocation2] sm:$0x7] }
 0x1b2   : > { %1058 = vrot.lane.b32.xlu0 %v1011_v0, %s5033_s27  ;;  %1129 = vrot.lane.b32.xlu1 %v991_v10, %s5034_s28 }
 0x1b4   : > { %v1102_v52 = vpop.permute.xlu0 %1101  ;;  %v5696_v39 = vpop.permute.xlu1 %1026 }
 0x1b5   : > { %v5706_v28 = vsel %vm8484_vm14, %v1102_v52, %v1104_v34  ;;  %v1801_v34 = vcombine.high %v5716_v41, %v5700_v27 }
 0x1b6   : > { %1137 = vrot.lane.b32.xlu0 %v1007_v24, %s5034_s28  ;;  %1139 = vrot.lane.b32.xlu1 %v1011_v0, %s5034_s28  ;;  %v5727_v24 = vld [vmem:[#allocation2 + $0x6] sm:$0x7] }
 0x1b7   : > { %8576 = vst [vmem:[#allocation23_spill] sm:$0xff] %v5727_v24 }
 0x1b8   : > { %v1531_v9 = vpop.permute.xlu0 %1530  ;;  %v1100_v26 = vpop.permute.xlu1 %1099 }
 0x1b9   : > { %v5725_v10 = vsel %vm8488_vm7, %v1531_v9, %v5620_v23  ;;  %v458_v23 = vrot.slane %v5727_v24, %v5303_v2  ;;  %v5740_v8 = vsel %vm8484_vm14, %v1100_v26, %v1102_v52  ;;  %v8577_v52 = vand.u32 15, %v5451_v49 }
 0x1ba   : > { %1805 = vrot.lane.b32.xlu0 %v1802_v55, %s5037_s6  ;;  %1807 = vrot.lane.b32.xlu1 %v1801_v34, %s5037_s6  ;;  %v462_v34 = vrot.slane %v5727_v24, %v5308_v6  ;;  %v8580_v26 = vand.u32 15, %v5446_v48  ;;  %v5781_v48 = vrot.slane %v5727_v24, %v5323_v11 }
 0x1bb   : > { %vm5757_vm15 = vcmp.eq.s32.totalorder %v8577_v52, 15 }
 0x1bc   : > { %v1019_v18 = vpop.permute.xlu0 %1018  ;;  %v1110_v0 = vpop.permute.xlu1 %1109  ;;  %vm5763_vm1 = vcmp.eq.s32.totalorder %v8580_v26, 15  ;;  %v1675_v12 = vsel %vm5757_vm15, %v5555_v54, %v5552_v53  ;;  %v1677_v26 = vsel %vm5757_vm15, %v5591_v38, %v5588_v37  ;;  %v1003_v37 = vrot.slane %v5667_v1, %v5323_v11 }
 0x1bd   : > { %v5743_v35 = vsel %vm8493_vm13, %v1019_v18, %v1021_v44  ;;  %v1674_v49 = vsel %vm5763_vm1, %v5571_v13, %v5574_v14  ;;  %v1676_v53 = vsel %vm5763_vm1, %v5606_v60, %v5612_v4  ;;  %v5809_v38 = vrot.slane %v5767_v45, %v5303_v2  ;;  %v5811_v60 = vld [vmem:[#allocation2 + $0x9] sm:$0x7] }
 0x1be   : > { %529 = vrot.lane.b32.xlu0 %v442_v58, %s5035_s4  ;;  %537 = vrot.lane.b32.xlu1 %v458_v23, %s5035_s4  ;;  %v1846_v4 = vrot.slane %v1675_v12, 7  ;;  %v1848_v14 = vrot.slane %v1677_v26, 6  ;;  %v1834_v16 = vrot.slane %v1676_v53, 6  ;;  %v1800_v12 = vcombine.low %v5716_v41, %v5700_v27 }
 0x1bf   : > { %v1673_v5 = vsel %vm5757_vm15, %v5482_v63, %v5479_v62  ;;  %v1672_v26 = vsel %vm5763_vm1, %v5507_v21, %v5504_v20  ;;  %v8583_v27 = vsel %vm5468_vm9, %v5520_v30, %v5523_v31  ;;  %v8584_v62 = vsel %vm5499_vm10, %v5541_v43, %v5538_v42 }
 0x1c0   : > { %v1029_v9 = vpop.permute.xlu0 %1028  ;;  %v1515_v55 = vpop.permute.xlu1 %1514  ;;  %v1724_v41 = vrot.slane %v8583_v27, 4  ;;  %v1710_v63 = vrot.slane %v8584_v62, 4  ;;  %v1847_v20 = vsel %vm8490_vm11, %v1846_v4, %v1673_v5  ;;  %v1682_v62 = vsel %vm5763_vm1, %v5648_v17, %v5651_v19 }
 0x1c1   : > { %v5793_v54 = vsel %vm8493_vm13, %v5696_v39, %v1029_v9  ;;  %v5815_v9 = vrot.slane %v5767_v45, %v5308_v6 }
 0x1c2   : > { %539 = vrot.lane.b32.xlu0 %v462_v34, %s5035_s4  ;;  %610 = vrot.lane.b32.xlu1 %v442_v58, %s5036_s5 }
 0x1c4   : > { %v5777_v58 = vpop.permute.xlu0 %1107  ;;  %v1598_v52 = vpop.permute.xlu1 %1597 }
 0x1c5   : > { %v5797_v13 = vsel %vm8484_vm14, %v5777_v58, %v1110_v0  ;;  %v1832_v0 = vrot.slane %v1674_v49, 7  ;;  %v1680_v49 = vsel %vm5763_vm1, %v5538_v42, %v5541_v43  ;;  %vm8491_vm14 = vcmask 1046534  }
 0x1c6   : > { %618 = vrot.lane.b32.xlu0 %v458_v23, %s5036_s5  ;;  %620 = vrot.lane.b32.xlu1 %v462_v34, %s5036_s5  ;;  %v5819_v23 = vrot.slane %v5811_v60, %v5308_v6  ;;  %v1681_v34 = vsel %vm5757_vm15, %v5523_v31, %v5520_v30  ;;  %v1838_v36 = vrot.slane %v1680_v49, 4  ;;  %v1849_v30 = vsel %vm8495_vm12, %v1848_v14, %v1847_v20 }
 0x1c7   : > { %v1852_v53 = vrot.slane %v1681_v34, 4  ;;  %v1833_v21 = vsel %vm8490_vm11, %v1832_v0, %v1672_v26 }
 0x1c8   : > { %v1517_v24 = vpop.permute.xlu0 %1516  ;;  %v1513_v46 = vpop.permute.xlu1 %1512  ;;  %v1835_v31 = vsel %vm8495_vm12, %v1834_v16, %v1833_v21 }
 0x1c9   : > { %v1550_v57 = vsel %vm8488_vm7, %v1515_v55, %v1517_v24  ;;  %v1549_v42 = vsel %vm8488_vm7, %v1513_v46, %v1515_v55 }
 0x1ca   : > { %1054 = vrot.lane.b32.xlu0 %v1003_v37, %s5033_s27  ;;  %1135 = vrot.lane.b32.xlu1 %v1003_v37, %s5034_s28  ;;  %v1683_v37 = vsel %vm5757_vm15, %v5633_v22, %v5630_v29 }
 0x1cb   : > { %v1854_v26 = vrot.slane %v1683_v37, 3  ;;  %v8588_v37 = vsel %vm5499_vm10, %v5725_v10, %v5721_v47 }
 0x1cc   : > { %v1596_v34 = vpop.permute.xlu0 %1595  ;;  %v1594_v27 = vpop.permute.xlu1 %1593 }
 0x1cd   : > { %v1631_v5 = vsel %vm8489_vm8, %v1596_v34, %v1598_v52  ;;  %v1630_v43 = vsel %vm8489_vm8, %v1594_v27, %v1596_v34  ;;  %v1714_v27 = vrot.slane %v8588_v37, 2 }
 0x1ce   : > { %v1663_v14 = vsel %vm5468_vm9, %v1550_v57, %v1631_v5  ;;  %v1679_v16 = vsel %vm5757_vm15, %v1631_v5, %v1550_v57  ;;  %v1662_v4 = vsel %vm5499_vm10, %v1549_v42, %v1630_v43  ;;  %v1678_v0 = vsel %vm5763_vm1, %v1630_v43, %v1549_v42  ;;  %1803 = vrot.lane.b32.xlu0 %v1800_v12, %s5037_s6 }
 0x1cf   : > { %v1722_v24 = vrot.slane %v1663_v14, 5  ;;  %v1850_v46 = vrot.slane %v1679_v16, 5  ;;  %v1708_v55 = vrot.slane %v1662_v4, 5  ;;  %v1836_v52 = vrot.slane %v1678_v0, 5  ;;  %525 = vrot.lane.b32.xlu1 %v5809_v38, %s5035_s4 }
 0x1d0   : > { %v8585_v57 = vsel %vm5468_vm9, %v5630_v29, %v5633_v22  ;;  %v8586_v12 = vsel %vm5499_vm10, %v5651_v19, %v5648_v17  ;;  %v1541_v21 = vpop.permute.xlu0 %1540  ;;  %v1539_v34 = vpop.permute.xlu1 %1538  ;;  %v8587_v29 = vsel %vm5468_vm9, %v5679_v7, %v5682_v15  ;;  %v1685_v16 = vsel %vm5757_vm15, %v5682_v15, %v5679_v7 }
 0x1d1   : > { %v1726_v49 = vrot.slane %v8585_v57, 3  ;;  %v1712_v20 = vrot.slane %v8586_v12, 3  ;;  %v1728_v22 = vrot.slane %v8587_v29, 2  ;;  %v1723_v42 = vsel %vm8487_vm2, %v1722_v24, %v5609_v61 }
 0x1d2   : > { %v1709_v17 = vsel %vm8487_vm2, %v1708_v55, %v5625_v25  ;;  %v1837_v19 = vsel %vm8487_vm2, %v1836_v52, %v1835_v31  ;;  %527 = vrot.lane.b32.xlu0 %v5815_v9, %s5035_s4  ;;  %v1851_v5 = vsel %vm8487_vm2, %v1850_v46, %v1849_v30  ;;  %v1725_v43 = vsel %vm743_vm5, %v1724_v41, %v1723_v42 }
 0x1d3   : > { %v1711_v14 = vsel %vm743_vm5, %v1710_v63, %v1709_v17  ;;  %535 = vrot.lane.b32.xlu1 %v5781_v48, %s5035_s4  ;;  %v1853_v61 = vsel %vm743_vm5, %v1852_v53, %v1851_v5  ;;  %v1727_v25 = vsel %vm746_vm3, %v1726_v49, %v1725_v43  ;;  %v470_v41 = vrot.slane %v5811_v60, %v5303_v2 }
 0x1d4   : > { %v1713_v31 = vsel %vm746_vm3, %v1712_v20, %v1711_v14  ;;  %v1620_v4 = vpop.permute.xlu0 %1619  ;;  %v1622_v30 = vpop.permute.xlu1 %1621  ;;  %vm752_vm2 = vcmask 1047559   ;;  %v1729_v63 = vsel %vm8491_vm14, %v1728_v22, %v1727_v25  ;;  %v1558_v7 = vsel %vm8488_vm7, %v1539_v34, %v1541_v21  ;;  %v5964_v25 = vld [vmem:[#allocation2 + $0xc] sm:$0x7] }
 0x1d5   : > { %v1715_v0 = vsel %vm8491_vm14, %v1714_v27, %v1713_v31  ;;  %v1639_v15 = vsel %vm8489_vm8, %v1620_v4, %v1622_v30  ;;  %v1855_v53 = vsel %vm746_vm3, %v1854_v26, %v1853_v61  ;;  %v1839_v24 = vsel %vm743_vm5, %v1838_v36, %v1837_v19 }
 0x1d6   : > { %v1840_v46 = vrot.slane %v1682_v62, 3  ;;  %v1856_v55 = vrot.slane %v1685_v16, 2  ;;  %v1671_v52 = vsel %vm5468_vm9, %v1558_v7, %v1639_v15  ;;  %v1687_v57 = vsel %vm5757_vm15, %v1639_v15, %v1558_v7  ;;  %543 = vrot.lane.b32.xlu0 %v470_v41, %s5035_s4 }
 0x1d7   : > { %v1684_v49 = vsel %vm5763_vm1, %v5721_v47, %v5725_v10  ;;  %v1730_v12 = vrot.slane %v1671_v52, 1  ;;  %545 = vrot.lane.b32.xlu1 %v5819_v23, %s5035_s4  ;;  %v1858_v36 = vrot.slane %v1687_v57, 1  ;;  %v466_v30 = vrot.slane %v5811_v60, %v5323_v11 }
 0x1d8   : > { %v1537_v26 = vpop.permute.xlu0 %1536  ;;  %v1618_v62 = vpop.permute.xlu1 %1617  ;;  %v1857_v20 = vsel %vm8491_vm14, %v1856_v55, %v1855_v53  ;;  %v1841_v21 = vsel %vm746_vm3, %v1840_v46, %v1839_v24  ;;  %v1842_v10 = vrot.slane %v1684_v49, 2  ;;  %v486_v7 = vrot.slane %v5964_v25, %v5308_v6 }
 0x1d9   : > { %v1557_v29 = vsel %vm8488_vm7, %v1537_v26, %v1539_v34  ;;  %v1638_v22 = vsel %vm8489_vm8, %v1618_v62, %v1620_v4  ;;  %v1859_v37 = vsel %vm752_vm2, %v1858_v36, %v1857_v20  ;;  %v5942_v27 = vsel %vm752_vm2, %v1730_v12, %v1729_v63 }
 0x1da   : > { %v1670_v47 = vsel %vm5499_vm10, %v1557_v29, %v1638_v22  ;;  %v1686_v42 = vsel %vm5763_vm1, %v1638_v22, %v1557_v29  ;;  %1901 = vmatprep.subr.mxu0 %v1859_v37  ;;  %606 = vrot.lane.b32.xlu0 %v5809_v38, %s5036_s5  ;;  %v1843_v43 = vsel %vm8491_vm14, %v1842_v10, %v1841_v21  ;;  %vm8590_vm7 = vcmask 793600  }
 0x1db   : > { %v1716_v17 = vrot.slane %v1670_v47, 1  ;;  %v1844_v34 = vrot.slane %v1686_v42, 1  ;;  %608 = vrot.lane.b32.xlu1 %v5815_v9, %s5036_s5  ;;  %v430_v9 = vrot.slane %v5767_v45, %v5323_v11  ;;  %vm8591_vm8 = vmmov %vm8590_vm7  ;;  %v8592_v55 = vsel %vm5468_vm9, %v5793_v54, %v5797_v13  ;;  %v6028_v47 = vld [vmem:[#allocation2 + $0xf] sm:$0x7] }
 0x1dc   : > { %v1015_v19 = vpop.permute.xlu0 %1014  ;;  %v1017_v5 = vpop.permute.xlu1 %1016  ;;  %v1238_v52 = vrot.slane %v8592_v55, 6  ;;  %v478_v10 = vrot.slane %v5964_v25, %v5323_v11 }
 0x1dd   : > { %v1845_v14 = vsel %vm752_vm2, %v1844_v34, %v1843_v43  ;;  %v5955_v16 = vsel %vm752_vm2, %v1716_v17, %v1715_v0  ;;  %v5981_v15 = vsel %vm8493_vm13, %v1015_v19, %v1017_v5  ;;  %v494_v34 = vrot.slane %v6028_v47, %v5303_v2 }
 0x1de   : > { %1902 = vmatpush1.msra.mxu0 %v1845_v14  ;;  %616 = vrot.lane.b32.xlu0 %v5781_v48, %s5036_s5  ;;  %v482_v48 = vrot.slane %v5964_v25, %v5303_v2  ;;  %v498_v5 = vrot.slane %v6028_v47, %v5308_v6  ;;  %v8594_v43 = vsel %vm5499_vm10, %v5743_v35, %v5740_v8 }
 0x1df   : > { %624 = vrot.lane.b32.xlu1 %v470_v41, %s5036_s5  ;;  %v1222_v14 = vrot.slane %v8594_v43, 7 }
 0x1e0   : > { %v1025_v38 = vpop.permute.xlu0 %1024  ;;  %v1033_v61 = vpop.permute.xlu1 %1032 }
 0x1e1   : > { %v5985_v53 = vsel %vm8493_vm13, %v1025_v38, %v5696_v39 }
 0x1e2   : > { %626 = vrot.lane.b32.xlu0 %v5819_v23, %s5036_s5  ;;  %v8589_v23 = vsel %vm5468_vm9, %v5703_v50, %v5706_v28 }
 0x1e3   : > { %523 = vrot.lane.b32.xlu1 %v430_v9, %s5035_s4  ;;  %v1236_v41 = vrot.slane %v8589_v23, 7 }
 0x1e4   : > { %v1035_v31 = vpop.permute.xlu0 %1034  ;;  %v1096_v4 = vpop.permute.xlu1 %1095 }
 0x1e5   : > { %v6012_v26 = vsel %vm8493_vm13, %v1033_v61, %v1035_v31 }
 0x1e6   : > { %541 = vrot.lane.b32.xlu0 %v466_v30, %s5035_s4 }
 0x1e7   : > { %549 = vrot.lane.b32.xlu1 %v482_v48, %s5035_s4 }
 0x1e8   : > { %v1098_v63 = vpop.permute.xlu0 %1097  ;;  %v1106_v0 = vpop.permute.xlu1 %1105 }
 0x1e9   : > { %v5988_v24 = vsel %vm8590_vm7, %v1096_v4, %v1098_v63  ;;  %v5992_v46 = vsel %vm8591_vm8, %v1106_v0, %v5777_v58  ;;  %vm8593_vm8 = vcmask 1043459  }
 0x1ea   : > { %v1175_v57 = vsel %vm5468_vm9, %v5981_v15, %v5988_v24  ;;  %v1178_v39 = vsel %vm5499_vm10, %v5985_v53, %v5992_v46  ;;  %551 = vrot.lane.b32.xlu0 %v486_v7, %s5035_s4 }
 0x1eb   : > { %v1237_v58 = vsel %vm8490_vm11, %v1236_v41, %v1175_v57  ;;  %604 = vrot.lane.b32.xlu1 %v430_v9, %s5036_s5  ;;  %v1224_v41 = vrot.slane %v1178_v39, 6 }
 0x1ec   : > { %v1239_v49 = vsel %vm8495_vm12, %v1238_v52, %v1237_v58  ;;  %v1114_v12 = vpop.permute.xlu0 %1113  ;;  %v1116_v36 = vpop.permute.xlu1 %1115  ;;  %v490_v58 = vrot.slane %v6028_v47, %v5323_v11 }
 0x1ed   : > { %v6015_v62 = vsel %vm8590_vm7, %v1114_v12, %v1116_v36 }
 0x1ee   : > { %v1181_v20 = vsel %vm5468_vm9, %v6012_v26, %v6015_v62  ;;  %622 = vrot.lane.b32.xlu0 %v466_v30, %s5036_s5 }
 0x1ef   : > { %v1240_v21 = vrot.slane %v1181_v20, 5  ;;  %630 = vrot.lane.b32.xlu1 %v482_v48, %s5036_s5 }
 0x1f0   : > { %v1013_v29 = vpop.permute.xlu0 %1012  ;;  %v1031_v22 = vpop.permute.xlu1 %1030 }
 0x1f1   : > { %v1241_v37 = vsel %vm8593_vm8, %v1240_v21, %v1239_v49  ;;  %v6042_v31 = vsel %vm8493_vm13, %v1013_v29, %v1015_v19  ;;  %v6045_v30 = vsel %vm8493_vm13, %v1031_v22, %v1033_v61  ;;  %vm8595_vm8 = vmmov %vm8590_vm7  ;;  %v6074_v49 = vld [vmem:[#allocation2 + $0x12] sm:$0x7] }
 0x1f2   : > { %632 = vrot.lane.b32.xlu0 %v486_v7, %s5036_s5  ;;  %v506_v29 = vrot.slane %v6074_v49, %v5303_v2  ;;  %v510_v22 = vrot.slane %v6074_v49, %v5308_v6 }
 0x1f3   : > { %547 = vrot.lane.b32.xlu1 %v478_v10, %s5035_s4 }
 0x1f4   : > { %v1039_v42 = vpop.permute.xlu0 %1038  ;;  %v1041_v17 = vpop.permute.xlu1 %1040 }
 0x1f5   : > { %v6066_v52 = vsel %vm8493_vm13, %v1039_v42, %v1041_v17 }
 0x1f6   : > { %555 = vrot.lane.b32.xlu0 %v494_v34, %s5035_s4 }
 0x1f7   : > { %557 = vrot.lane.b32.xlu1 %v498_v5, %s5035_s4 }
 0x1f8   : > { %v1094_v38 = vpop.permute.xlu0 %1093  ;;  %v1112_v9 = vpop.permute.xlu1 %1111 }
 0x1f9   : > { %v6048_v48 = vsel %vm8590_vm7, %v1094_v38, %v1096_v4  ;;  %v6051_v23 = vsel %vm8595_vm8, %v1112_v9, %v1114_v12  ;;  %vm8596_vm7 = vcmask 1043459   ;;  %v1257_v38 = vcombine.low %v5593_v40, %v5667_v1  ;;  %v8599_v40 = vld [vmem:[#allocation20_spill] sm:$0xff] }
 0x1fa   : > { %v1174_v63 = vsel %vm5499_vm10, %v6042_v31, %v6048_v48  ;;  %v1180_v19 = vsel %vm5499_vm10, %v6045_v30, %v6051_v23  ;;  %628 = vrot.lane.b32.xlu0 %v478_v10, %s5036_s5 }
 0x1fb   : > { %v1223_v61 = vsel %vm8490_vm11, %v1222_v14, %v1174_v63  ;;  %v1226_v4 = vrot.slane %v1180_v19, 5  ;;  %636 = vrot.lane.b32.xlu1 %v494_v34, %s5036_s5  ;;  %v8598_v63 = vld [vmem:[#allocation21_spill] sm:$0xff]  ;;  %v8600_v19 = vld [vmem:[#allocation14_spill] sm:$0xff] }
 0x1fc   : > { %v1225_v0 = vsel %vm8495_vm12, %v1224_v41, %v1223_v61  ;;  %v1120_v7 = vpop.permute.xlu0 %1119  ;;  %v1122_v55 = vpop.permute.xlu1 %1121  ;;  %v502_v41 = vrot.slane %v6074_v49, %v5323_v11  ;;  %v1255_v1 = vcombine.low %v8599_v40, %v8598_v63 }
 0x1fd   : > { %v1227_v57 = vsel %vm8596_vm7, %v1226_v4, %v1225_v0  ;;  %v6070_v39 = vsel %vm8595_vm8, %v1120_v7, %v1122_v55  ;;  %vm8597_vm7 = vmmov %vm8595_vm8 }
 0x1fe   : > { %v1183_v12 = vsel %vm5468_vm9, %v6066_v52, %v6070_v39  ;;  %638 = vrot.lane.b32.xlu0 %v498_v5, %s5036_s5  ;;  %v1256_v5 = vcombine.low %v5525_v33, %v5563_v59  ;;  %v1254_v33 = vcombine.low %v5455_v51, %v5391_v32  ;;  %vm8601_vm8 = vmmov %vm8597_vm7 }
 0x1ff   : > { %v1242_v36 = vrot.slane %v1183_v12, 4  ;;  %553 = vrot.lane.b32.xlu1 %v490_v58, %s5035_s4 }
 0x200   : > { %v1037_v20 = vpop.permute.xlu0 %1036  ;;  %v1045_v21 = vpop.permute.xlu1 %1044  ;;  %v1278_v61 = vrot.slane %v1256_v5, %v8600_v19  ;;  %v1264_v12 = vrot.slane %v1254_v33, %v8600_v19  ;;  %v774_v33 = vcombine.low %v5964_v25, %v6028_v47 }
 0x201   : > { %v1243_v10 = vsel %vm743_vm5, %v1242_v36, %v1241_v37  ;;  %v6092_v43 = vsel %vm8493_vm13, %v1037_v20, %v1039_v42 }
 0x202   : > { %561 = vrot.lane.b32.xlu0 %v506_v29, %s5035_s4 }
 0x203   : > { %563 = vrot.lane.b32.xlu1 %v510_v22, %s5035_s4 }
 0x204   : > { %v1047_v17 = vpop.permute.xlu0 %1046  ;;  %v1118_v34 = vpop.permute.xlu1 %1117 }
 0x205   : > { %v6095_v14 = vsel %vm8597_vm7, %v1118_v34, %v1120_v7  ;;  %v6113_v4 = vsel %vm8493_vm13, %v1045_v21, %v1047_v17  ;;  %v1285_v7 = vrot.slane %v1257_v38, %v8600_v19  ;;  %v1271_v17 = vrot.slane %v1255_v1, %v8600_v19 }
 0x206   : > { %v1182_v37 = vsel %vm5499_vm10, %v6092_v43, %v6095_v14  ;;  %634 = vrot.lane.b32.xlu0 %v490_v58, %s5036_s5  ;;  %v418_v58 = vld [vmem:[#allocation2 + $0x15] sm:$0x7] }
 0x207   : > { %v1228_v9 = vrot.slane %v1182_v37, 4  ;;  %642 = vrot.lane.b32.xlu1 %v506_v29, %s5036_s5  ;;  %v518_v29 = vrot.slane %v418_v58, %v5303_v2  ;;  %v1289_v34 = vcombine.high %v1278_v61, %v1285_v7 }
 0x208   : > { %v1126_v59 = vpop.permute.xlu0 %1125  ;;  %v1128_v42 = vpop.permute.xlu1 %1127 }
 0x209   : > { %v6116_v0 = vsel %vm8601_vm8, %v1126_v59, %v1128_v42  ;;  %v1229_v32 = vsel %vm743_vm5, %v1228_v9, %v1227_v57  ;;  %v522_v57 = vrot.slane %v418_v58, %v5308_v6  ;;  %v1288_v9 = vcombine.low %v1278_v61, %v1285_v7  ;;  %v8602_v7 = vld [vmem:[#allocation22_spill] sm:$0xff]  ;;  %vm8604_vm8 = vmmov %vm8597_vm7 }
 0x20a   : > { %v1185_v51 = vsel %vm5468_vm9, %v6113_v4, %v6116_v0  ;;  %644 = vrot.lane.b32.xlu0 %v510_v22, %s5036_s5  ;;  %v1287_v22 = vcombine.high %v1264_v12, %v1271_v17  ;;  %v775_v42 = vcombine.low %v6074_v49, %v418_v58  ;;  %v1286_v61 = vcombine.low %v1264_v12, %v1271_v17 }
 0x20b   : > { %v1244_v55 = vrot.slane %v1185_v51, 3  ;;  %559 = vrot.lane.b32.xlu1 %v502_v41, %s5035_s4  ;;  %v772_v25 = vcombine.low %v5767_v45, %v8602_v7  ;;  %v1310_v51 = vrot.slane %v1288_v9, %v8600_v19 }
 0x20c   : > { %v1043_v36 = vpop.permute.xlu0 %1042  ;;  %v6127_v20 = vpop.permute.xlu1 %1050  ;;  %v1303_v49 = vrot.slane %v1287_v22, %v8600_v19 }
 0x20d   : > { %v1245_v5 = vsel %vm746_vm3, %v1244_v55, %v1243_v10  ;;  %v6139_v63 = vsel %vm8493_vm13, %v1043_v36, %v1045_v21  ;;  %v1317_v10 = vrot.slane %v1289_v34, %v8600_v19  ;;  %v8603_v55 = vld [vmem:[#allocation23_spill] sm:$0xff]  ;;  %v796_v34 = vrot.slane %v774_v33, %v8600_v19 }
 0x20e   : > { %567 = vrot.lane.b32.xlu0 %v518_v29, %s5035_s4  ;;  %v773_v36 = vcombine.low %v8603_v55, %v5811_v60  ;;  %v1296_v60 = vrot.slane %v1286_v61, %v8600_v19 }
 0x20f   : > { %569 = vrot.lane.b32.xlu1 %v522_v57, %s5035_s4 }
 0x210   : > { %v1053_v38 = vpop.permute.xlu0 %1052  ;;  %v1124_v37 = vpop.permute.xlu1 %1123  ;;  %v1318_v55 = vcombine.low %v1296_v60, %v1310_v51 }
 0x211   : > { %v6142_v40 = vsel %vm8597_vm7, %v1124_v37, %v1126_v59  ;;  %v6161_v12 = vsel %vm8493_vm13, %v6127_v20, %v1053_v38  ;;  %v782_v37 = vrot.slane %v772_v25, %v8600_v19 }
 0x212   : > { %v1184_v1 = vsel %vm5499_vm10, %v6139_v63, %v6142_v40  ;;  %640 = vrot.lane.b32.xlu0 %v502_v41, %s5036_s5  ;;  %v803_v41 = vrot.slane %v775_v42, %v8600_v19  ;;  %v789_v42 = vrot.slane %v773_v36, %v8600_v19 }
 0x213   : > { %v1230_v47 = vrot.slane %v1184_v1, 3  ;;  %648 = vrot.lane.b32.xlu1 %v518_v29, %s5036_s5  ;;  %v1320_v29 = vcombine.low %v1303_v49, %v1317_v10  ;;  %v514_v1 = vrot.slane %v418_v58, %v5323_v11 }
 0x214   : > { %v1132_v21 = vpop.permute.xlu0 %1131  ;;  %v1134_v59 = vpop.permute.xlu1 %1133  ;;  %v807_v10 = vcombine.high %v796_v34, %v803_v41  ;;  %v806_v7 = vcombine.low %v796_v34, %v803_v41  ;;  %v805_v61 = vcombine.high %v782_v37, %v789_v42  ;;  %v804_v25 = vcombine.low %v782_v37, %v789_v42 }
 0x215   : > { %v6164_v45 = vsel %vm8604_vm8, %v1132_v21, %v1134_v59  ;;  %v1231_v17 = vsel %vm746_vm3, %v1230_v47, %v1229_v32  ;;  %v1319_v32 = vcombine.high %v1296_v60, %v1310_v51  ;;  %vm8605_vm8 = vmmov %vm8597_vm7 }
 0x216   : > { %v1187_v22 = vsel %vm5468_vm9, %v6161_v12, %v6164_v45  ;;  %650 = vrot.lane.b32.xlu0 %v522_v57, %s5036_s5  ;;  %v835_v59 = vrot.slane %v807_v10, %v8600_v19  ;;  %v828_v36 = vrot.slane %v806_v7, %v8600_v19  ;;  %v821_v58 = vrot.slane %v805_v61, %v8600_v19 }
 0x217   : > { %v1246_v9 = vrot.slane %v1187_v22, 2  ;;  %1323 = vrot.lane.b32.xlu1 %v1320_v29, %s5038_s7  ;;  %v5039_v29 = vmov 0.0  }
 0x218   : > { %v6175_v38 = vpop.permute.xlu0 %531  ;;  %v6177_v33 = vpop.permute.xlu1 %533  ;;  %1951 = vmatprep.mubr.f32.mxu0 %v5039_v29  ;;  %4070 = vmatprep.mubr.f32.mxu1 %v5039_v29  ;;  %v838_v22 = vcombine.low %v821_v58, %v835_v59 }
 0x219   : > { %v1247_v57 = vsel %vm8491_vm14, %v1246_v9, %v1245_v5  ;;  %v814_v5 = vrot.slane %v804_v25, %v8600_v19 }
 0x21a   : > { %1325 = vrot.lane.b32.xlu0 %v1319_v32, %s5038_s7 }
 0x21b   : > { %565 = vrot.lane.b32.xlu1 %v514_v1, %s5035_s4  ;;  %v837_v37 = vcombine.high %v814_v5, %v828_v36  ;;  %v836_v9 = vcombine.low %v814_v5, %v828_v36 }
 0x21c   : > { %v6184_v47 = vpop.permute.xlu0 %612  ;;  %v6186_v49 = vpop.permute.xlu1 %614 }
 0x21e   : > { %646 = vrot.lane.b32.xlu0 %v514_v1, %s5036_s5 }
 0x21f   : > { %1321 = vrot.lane.b32.xlu1 %v1318_v55, %s5038_s7 }
 0x220   : > { %v1049_v34 = vpop.permute.xlu0 %1048  ;;  %v1057_v41 = vpop.permute.xlu1 %1056 }
 0x221   : > { %v6198_v32 = vsel %vm8493_vm13, %v1049_v34, %v6127_v20 }
 0x222   : > { %841 = vrot.lane.b32.xlu0 %v838_v22, %s5040_s11 }
 0x223   : > { %843 = vrot.lane.b32.xlu1 %v837_v37, %s5040_s11 }
 0x224   : > { %v1059_v51 = vpop.permute.xlu0 %1058  ;;  %v1130_v60 = vpop.permute.xlu1 %1129 }
 0x225   : > { %v6201_v42 = vsel %vm8597_vm7, %v1130_v60, %v1132_v21  ;;  %v1076_v25 = vsel %vm8493_vm13, %v1057_v41, %v1059_v51  ;;  %vm8492_vm7 = vcmask 654336   ;;  %v1190_v60 = vsel %vm5763_vm1, %v6048_v48, %v6042_v31 }
 0x226   : > { %v1186_v10 = vsel %vm5499_vm10, %v6198_v32, %v6201_v42  ;;  %839 = vrot.lane.b32.xlu0 %v836_v9, %s5040_s11  ;;  %v1197_v31 = vsel %vm5757_vm15, %v6015_v62, %v6012_v26 }
 0x227   : > { %v1232_v1 = vrot.slane %v1186_v10, 2  ;;  %v1368_v62 = vrot.slane %v1197_v31, 5 }
 0x228   : > { %v1138_v7 = vpop.permute.xlu0 %1137  ;;  %v1140_v61 = vpop.permute.xlu1 %1139 }
 0x229   : > { %v1157_v59 = vsel %vm8605_vm8, %v1138_v7, %v1140_v61  ;;  %v1233_v20 = vsel %vm8491_vm14, %v1232_v1, %v1231_v17  ;;  %v1192_v17 = vsel %vm5763_vm1, %v5740_v8, %v5743_v35  ;;  %v1195_v8 = vsel %vm5757_vm15, %v5797_v13, %v5793_v54 }
 0x22a   : > { %v1189_v21 = vsel %vm5468_vm9, %v1076_v25, %v1157_v59  ;;  %v1350_v9 = vrot.slane %v1192_v17, 7  ;;  %v1191_v35 = vsel %vm5757_vm15, %v5988_v24, %v5981_v15  ;;  %v1196_v54 = vsel %vm5763_vm1, %v6051_v23, %v6045_v30 }
 0x22b   : > { %v1248_v55 = vrot.slane %v1189_v21, 1  ;;  %v1366_v24 = vrot.slane %v1195_v8, 6  ;;  %v1354_v10 = vrot.slane %v1196_v54, 5  ;;  %v1198_v30 = vsel %vm5763_vm1, %v6095_v14, %v6092_v43 }
 0x22c   : > { %v1806_v36 = vpop.permute.xlu0 %1805  ;;  %v1808_v29 = vpop.permute.xlu1 %1807  ;;  %v1351_v15 = vsel %vm8490_vm11, %v1350_v9, %v1190_v60  ;;  %v1201_v23 = vsel %vm5757_vm15, %v6116_v0, %v6113_v4  ;;  %v1202_v14 = vsel %vm5763_vm1, %v6201_v42, %v6198_v32  ;;  %v1205_v4 = vsel %vm5757_vm15, %v1157_v59, %v1076_v25 }
 0x22d   : > { %v1811_v58 = vsel %vm8492_vm7, %v1806_v36, %v1808_v29  ;;  %v6215_v5 = vsel %vm752_vm2, %v1248_v55, %v1247_v57  ;;  %v1193_v57 = vsel %vm5757_vm15, %v5706_v28, %v5703_v50  ;;  %v1194_v50 = vsel %vm5763_vm1, %v5992_v46, %v5985_v53 }
 0x22e   : > { %1903 = vmatprep.subr.mxu0 %v1811_v58  ;;  %v1364_v28 = vrot.slane %v1193_v57, 7  ;;  %v1199_v53 = vsel %vm5757_vm15, %v6070_v39, %v6066_v52  ;;  %v1352_v26 = vrot.slane %v1194_v50, 6  ;;  %v1200_v52 = vsel %vm5763_vm1, %v6142_v40, %v6139_v63 }
 0x22f   : > { %v1370_v61 = vrot.slane %v1199_v53, 4  ;;  %v1203_v39 = vsel %vm5757_vm15, %v6164_v45, %v6161_v12  ;;  %v1356_v63 = vrot.slane %v1198_v30, 4  ;;  %v1372_v40 = vrot.slane %v1201_v23, 3 }
 0x230   : > { %v6217_v34 = vpop.permute.xlu0 %529  ;;  %v6219_v22 = vpop.permute.xlu1 %537  ;;  %v1365_v46 = vsel %vm8490_vm11, %v1364_v28, %v1191_v35  ;;  %v1353_v1 = vsel %vm8495_vm12, %v1352_v26, %v1351_v15  ;;  %v1358_v58 = vrot.slane %v1200_v52, 3  ;;  %v1374_v17 = vrot.slane %v1203_v39, 2 }
 0x231   : > { %v1367_v45 = vsel %vm8495_vm12, %v1366_v24, %v1365_v46  ;;  %vm8606_vm11 = vcmask 1043459   ;;  %v1376_v59 = vrot.slane %v1205_v4, 1 }
 0x232   : > { %v1369_v42 = vsel %vm8606_vm11, %v1368_v62, %v1367_v45  ;;  %vm8607_vm14 = vmmov %vm8606_vm11  ;;  %vm8608_vm11 = vcmask 1046534  }
 0x233   : > { %v1355_v25 = vsel %vm8607_vm14, %v1354_v10, %v1353_v1  ;;  %v1371_v8 = vsel %vm743_vm5, %v1370_v61, %v1369_v42  ;;  %vm8609_vm14 = vmmov %vm8608_vm11 }
 0x234   : > { %v6225_v37 = vpop.permute.xlu0 %539  ;;  %v6227_v51 = vpop.permute.xlu1 %610  ;;  %v1373_v50 = vsel %vm746_vm3, %v1372_v40, %v1371_v8  ;;  %v1357_v28 = vsel %vm743_vm5, %v1356_v63, %v1355_v25 }
 0x235   : > { %v1375_v31 = vsel %vm8608_vm11, %v1374_v17, %v1373_v50  ;;  %v1359_v54 = vsel %vm746_vm3, %v1358_v58, %v1357_v28  ;;  %vm571_vm11 = vcmask 908288  }
 0x238   : > { %v6257_v13 = vpop.permute.xlu0 %618  ;;  %v6259_v48 = vpop.permute.xlu1 %620 }
 0x23c   : > { %v1055_v21 = vpop.permute.xlu0 %1054  ;;  %v1136_v43 = vpop.permute.xlu1 %1135 }
 0x23d   : > { %v1075_v0 = vsel %vm8493_vm13, %v1055_v21, %v1057_v41  ;;  %v1156_v55 = vsel %vm8605_vm8, %v1136_v43, %v1138_v7  ;;  %v1360_v41 = vrot.slane %v1202_v14, 2  ;;  %vm652_vm8 = vcmask 924672  }
 0x23e   : > { %v1188_v29 = vsel %vm5499_vm10, %v1075_v0, %v1156_v55  ;;  %v1204_v12 = vsel %vm5763_vm1, %v1156_v55, %v1075_v0  ;;  %v656_v17 = vsel %vm652_vm8, %v6184_v47, %v6186_v49  ;;  %v658_v49 = vsel %vm652_vm8, %v6257_v13, %v6259_v48 }
 0x23f   : > { %v1234_v32 = vrot.slane %v1188_v29, 1  ;;  %v1362_v57 = vrot.slane %v1204_v12, 1  ;;  %v1361_v53 = vsel %vm8609_vm14, %v1360_v41, %v1359_v54  ;;  %vm8610_vm14 = vcmask 1041409  }
 0x240   : > { %v1804_v7 = vpop.permute.xlu0 %1803  ;;  %vm8494_vm13 = vcmask 785408  }
 0x241   : > { %v6299_v60 = vpop.permute.xlu1 %525  ;;  %v1810_v9 = vsel %vm8492_vm7, %v1804_v7, %v1806_v36  ;;  %v6304_v35 = vsel %vm752_vm2, %v1234_v32, %v1233_v20  ;;  %v1377_v36 = vsel %vm752_vm2, %v1376_v59, %v1375_v31  ;;  %v1363_v24 = vsel %vm752_vm2, %v1362_v57, %v1361_v53  ;;  %vm8611_vm7 = vmmov %vm8610_vm14 }
 0x242   : > { %1904 = vmatpush1.msra.mxu0 %v1810_v9  ;;  %v575_v32 = vsel %vm571_vm11, %v6175_v38, %v6177_v33  ;;  %v655_v59 = vsel %vm652_vm8, %v6227_v51, %v6184_v47  ;;  %v574_v9 = vsel %vm571_vm11, %v6217_v34, %v6175_v38  ;;  %v577_v47 = vsel %vm571_vm11, %v6219_v22, %v6225_v37 }
 0x243   : > { %1905 = vmatprep.subr.mxu0 %v5942_v27  ;;  %v688_v25 = vsel %vm5468_vm9, %v575_v32, %v656_v17  ;;  %v704_v7 = vsel %vm5757_vm15, %v656_v17, %v575_v32  ;;  %v703_v51 = vsel %vm5763_vm1, %v655_v59, %v574_v9  ;;  %v690_v38 = vsel %vm5468_vm9, %v577_v47, %v658_v49 }
 0x244   : > { %v528_v15 = vpop.permute.xlu0 %527  ;;  %1906 = vmatpush1.msra.mxu0 %v5955_v16  ;;  %v754_v57 = vrot.slane %v688_v25, 7  ;;  %v882_v31 = vrot.slane %v704_v7, 7  ;;  %v706_v54 = vsel %vm5757_vm15, %v658_v49, %v577_v47  ;;  %v756_v25 = vrot.slane %v690_v38, 6 }
 0x245   : > { %v536_v20 = vpop.permute.xlu1 %535  ;;  %1907 = vmatprep.subr.mxu0 %v1377_v36  ;;  %v573_v50 = vsel %vm571_vm11, %v6299_v60, %v528_v15 }
 0x246   : > { %1908 = vmatpush1.msra.mxu0 %v1363_v24  ;;  %v687_v24 = vsel %vm5499_vm10, %v574_v9, %v655_v59  ;;  %v884_v59 = vrot.slane %v706_v54, 6 }
 0x248   : > { %v6315_v46 = vpop.permute.xlu0 %543 }
 0x249   : > { %v546_v26 = vpop.permute.xlu1 %545 }
 0x24a   : > { %v579_v15 = vsel %vm571_vm11, %v6315_v46, %v546_v26  ;;  %v576_v26 = vsel %vm571_vm11, %v536_v20, %v6219_v22 }
 0x24c   : > { %v607_v27 = vpop.permute.xlu0 %606 }
 0x24d   : > { %v609_v62 = vpop.permute.xlu1 %608 }
 0x24e   : > { %v654_v33 = vsel %vm652_vm8, %v607_v27, %v609_v62  ;;  %v868_v62 = vrot.slane %v703_v51, 7 }
 0x24f   : > { %v686_v34 = vsel %vm5468_vm9, %v573_v50, %v654_v33  ;;  %v702_v37 = vsel %vm5757_vm15, %v654_v33, %v573_v50 }
 0x250   : > { %v617_v10 = vpop.permute.xlu0 %616 }
 0x251   : > { %v6317_v30 = vpop.permute.xlu1 %624  ;;  %v657_v36 = vsel %vm652_vm8, %v617_v10, %v6257_v13  ;;  %v755_v13 = vsel %vm8610_vm14, %v754_v57, %v686_v34  ;;  %vm8612_vm14 = vcmask 1043459  }
 0x252   : > { %v689_v7 = vsel %vm5499_vm10, %v576_v26, %v657_v36  ;;  %v705_v22 = vsel %vm5763_vm1, %v657_v36, %v576_v26 }
 0x253   : > { %v6422_v50 = vrot.slane %v689_v7, 6  ;;  %v870_v38 = vrot.slane %v705_v22, 6 }
 0x254   : > { %v627_v23 = vpop.permute.xlu0 %626 }
 0x255   : > { %v524_v1 = vpop.permute.xlu1 %523  ;;  %v660_v48 = vsel %vm652_vm8, %v6317_v30, %v627_v23 }
 0x256   : > { %v692_v23 = vsel %vm5468_vm9, %v579_v15, %v660_v48  ;;  %v708_v17 = vsel %vm5757_vm15, %v660_v48, %v579_v15  ;;  %v572_v10 = vsel %vm571_vm11, %v524_v1, %v6299_v60  ;;  %v733_v60 = vrot.slane %v687_v24, 7 }
 0x257   : > { %v758_v20 = vrot.slane %v692_v23, 5  ;;  %v886_v33 = vrot.slane %v708_v17, 5  ;;  %v757_v1 = vsel %vm8495_vm12, %v756_v25, %v755_v13 }
 0x258   : > { %v6319_v16 = vpop.permute.xlu0 %541 }
 0x259   : > { %v6321_v61 = vpop.permute.xlu1 %549  ;;  %v578_v48 = vsel %vm571_vm11, %v6319_v16, %v6315_v46  ;;  %v6441_v46 = vsel %vm8612_vm14, %v758_v20, %v757_v1 }
 0x25c   : > { %v6323_v52 = vpop.permute.xlu0 %551 }
 0x25d   : > { %v605_v39 = vpop.permute.xlu1 %604  ;;  %v581_v34 = vsel %vm571_vm11, %v6321_v61, %v6323_v52 }
 0x25e   : > { %v6393_v53 = vsel %vm652_vm8, %v605_v39, %v607_v27  ;;  %v883_v27 = vsel %vm8611_vm7, %v882_v31, %v702_v37 }
 0x25f   : > { %v701_v49 = vsel %vm5763_vm1, %v6393_v53, %v572_v10  ;;  %v885_v9 = vsel %vm8495_vm12, %v884_v59, %v883_v27 }
 0x260   : > { %v623_v21 = vpop.permute.xlu0 %622  ;;  %v869_v31 = vsel %vm8611_vm7, %v868_v62, %v701_v49  ;;  %vm8613_vm7 = vmmov %vm8612_vm14 }
 0x261   : > { %v6325_v43 = vpop.permute.xlu1 %630  ;;  %v659_v57 = vsel %vm652_vm8, %v623_v21, %v6317_v30  ;;  %v887_v16 = vsel %vm8613_vm7, %v886_v33, %v885_v9  ;;  %v871_v54 = vsel %vm8495_vm12, %v870_v38, %v869_v31  ;;  %vm8614_vm7 = vcmask 1041409  }
 0x264   : > { %v633_v14 = vpop.permute.xlu0 %632 }
 0x265   : > { %v6327_v4 = vpop.permute.xlu1 %547  ;;  %v662_v47 = vsel %vm652_vm8, %v6325_v43, %v633_v14  ;;  %v707_v14 = vsel %vm5763_vm1, %v659_v57, %v578_v48 }
 0x266   : > { %v710_v52 = vsel %vm5757_vm15, %v662_v47, %v581_v34 }
 0x267   : > { %v888_v23 = vrot.slane %v710_v52, 4 }
 0x268   : > { %v6329_v0 = vpop.permute.xlu0 %555 }
 0x269   : > { %v6331_v55 = vpop.permute.xlu1 %557 }
 0x26c   : > { %v629_v63 = vpop.permute.xlu0 %628 }
 0x26d   : > { %v6333_v40 = vpop.permute.xlu1 %636  ;;  %v661_v30 = vsel %vm652_vm8, %v629_v63, %v6325_v43  ;;  %v580_v43 = vsel %vm571_vm11, %v6327_v4, %v6321_v61  ;;  %v685_v63 = vsel %vm5499_vm10, %v572_v10, %v6393_v53  ;;  %v691_v61 = vsel %vm5499_vm10, %v578_v48, %v659_v57 }
 0x26e   : > { %v709_v15 = vsel %vm5763_vm1, %v661_v30, %v580_v43  ;;  %v872_v4 = vrot.slane %v707_v14, 5  ;;  %v693_v13 = vsel %vm5499_vm10, %v580_v43, %v661_v30  ;;  %v735_v22 = vsel %vm8614_vm7, %v733_v60, %v685_v63 }
 0x26f   : > { %v874_v27 = vrot.slane %v709_v15, 4  ;;  %v739_v20 = vrot.slane %v691_v61, 5  ;;  %v742_v57 = vrot.slane %v693_v13, 4 }
 0x270   : > { %v6335_v29 = vpop.permute.xlu0 %638  ;;  %v873_v33 = vsel %vm8612_vm14, %v872_v4, %v871_v54  ;;  %vm8615_vm14 = vcmask 1046534  }
 0x271   : > { %v6337_v12 = vpop.permute.xlu1 %553  ;;  %v6438_v37 = vsel %vm652_vm8, %v6333_v40, %v6335_v29  ;;  %v583_v29 = vsel %vm571_vm11, %v6329_v0, %v6331_v55  ;;  %v694_v55 = vsel %vm5468_vm9, %v581_v34, %v662_v47  ;;  %v875_v60 = vsel %vm743_vm5, %v874_v27, %v873_v33  ;;  %vm8616_vm7 = vmmov %vm8615_vm14 }
 0x272   : > { %v712_v24 = vsel %vm5757_vm15, %v6438_v37, %v583_v29  ;;  %v696_v9 = vsel %vm5468_vm9, %v583_v29, %v6438_v37 }
 0x273   : > { %v890_v10 = vrot.slane %v712_v24, 3  ;;  %v762_v29 = vrot.slane %v696_v9, 3 }
 0x274   : > { %v6339_v45 = vpop.permute.xlu0 %561 }
 0x275   : > { %v6341_v58 = vpop.permute.xlu1 %563 }
 0x276   : > { %v585_v25 = vsel %vm571_vm11, %v6339_v45, %v6341_v58 }
 0x278   : > { %v6349_v42 = vpop.permute.xlu0 %634 }
 0x279   : > { %v6353_v41 = vpop.permute.xlu1 %642  ;;  %v663_v53 = vsel %vm652_vm8, %v6349_v42, %v6333_v40  ;;  %v582_v40 = vsel %vm571_vm11, %v6337_v12, %v6329_v0 }
 0x27c   : > { %v6367_v8 = vpop.permute.xlu0 %644 }
 0x27d   : > { %v6378_v28 = vpop.permute.xlu1 %559  ;;  %v666_v17 = vsel %vm652_vm8, %v6353_v41, %v6367_v8  ;;  %v711_v8 = vsel %vm5763_vm1, %v663_v53, %v582_v40 }
 0x27e   : > { %v714_v7 = vsel %vm5757_vm15, %v666_v17, %v585_v25  ;;  %v876_v1 = vrot.slane %v711_v8, 3  ;;  %v698_v37 = vsel %vm5468_vm9, %v585_v25, %v666_v17  ;;  %v738_v17 = vsel %vm8495_vm12, %v6422_v50, %v735_v22 }
 0x27f   : > { %v892_v47 = vrot.slane %v714_v7, 2  ;;  %vm8620_vm12 = vcmask 1046534  }
 0x280   : > { %v6401_v32 = vpop.permute.xlu0 %567  ;;  %v877_v54 = vsel %vm746_vm3, %v876_v1, %v875_v60 }
 0x281   : > { %v570_v39 = vpop.permute.xlu1 %569 }
 0x282   : > { %v587_v0 = vsel %vm571_vm11, %v6401_v32, %v570_v39  ;;  %v889_v39 = vsel %vm743_vm5, %v888_v23, %v887_v16  ;;  %v695_v16 = vsel %vm5499_vm10, %v582_v40, %v663_v53  ;;  %v764_v53 = vrot.slane %v698_v37, 2 }
 0x283   : > { %v891_v14 = vsel %vm746_vm3, %v890_v10, %v889_v39  ;;  %v745_v24 = vrot.slane %v695_v16, 3 }
 0x284   : > { %v641_v51 = vpop.permute.xlu0 %640  ;;  %v893_v61 = vsel %vm8615_vm14, %v892_v47, %v891_v14  ;;  %vm8618_vm14 = vcmask 1043459  }
 0x285   : > { %v649_v21 = vpop.permute.xlu1 %648  ;;  %v665_v26 = vsel %vm652_vm8, %v641_v51, %v6353_v41  ;;  %v584_v41 = vsel %vm571_vm11, %v6378_v28, %v6339_v45  ;;  %v760_v28 = vrot.slane %v694_v55, 4  ;;  %v741_v27 = vsel %vm8618_vm14, %v739_v20, %v738_v17 }
 0x286   : > { %v713_v12 = vsel %vm5763_vm1, %v665_v26, %v584_v41  ;;  %v697_v63 = vsel %vm5499_vm10, %v584_v41, %v665_v26  ;;  %v744_v25 = vsel %vm743_vm5, %v742_v57, %v741_v27  ;;  %vm1883_vm14 = vcmask 588800  }
 0x287   : > { %v878_v51 = vrot.slane %v713_v12, 2  ;;  %v748_v26 = vrot.slane %v697_v63, 2  ;;  %v747_v41 = vsel %vm746_vm3, %v745_v24, %v744_v25 }
 0x288   : > { %v651_v36 = vpop.permute.xlu0 %650 }
 0x289   : > { %v1324_v62 = vpop.permute.xlu1 %1323  ;;  %v668_v42 = vsel %vm652_vm8, %v649_v21, %v651_v36  ;;  %v879_v4 = vsel %vm8616_vm7, %v878_v51, %v877_v54 }
 0x28a   : > { %v716_v45 = vsel %vm5757_vm15, %v668_v42, %v587_v0 }
 0x28b   : > { %v894_v31 = vrot.slane %v716_v45, 1 }
 0x28c   : > { %v1326_v59 = vpop.permute.xlu0 %1325 }
 0x28d   : > { %v566_v49 = vpop.permute.xlu1 %565  ;;  %v1329_v58 = vsel %vm8494_vm13, %v1324_v62, %v1326_v59  ;;  %v895_v55 = vsel %vm752_vm2, %v894_v31, %v893_v61 }
 0x28e   : > { %1909 = vmatprep.subr.mxu0 %v1329_v58  ;;  %v586_v30 = vsel %vm571_vm11, %v566_v49, %v6401_v32  ;;  %v700_v32 = vsel %vm5468_vm9, %v587_v0, %v668_v42  ;;  %v761_v42 = vsel %vm743_vm5, %v760_v28, %v6441_v46  ;;  %v1864_v0 = vld [vmem:[#allocation7] sm:$0xff] }
 0x28f   : > { %v766_v13 = vrot.slane %v700_v32, 1  ;;  %v763_v10 = vsel %vm746_vm3, %v762_v29, %v761_v42 }
 0x290   : > { %v647_v48 = vpop.permute.xlu0 %646  ;;  %v765_v8 = vsel %vm8620_vm12, %v764_v53, %v763_v10 }
 0x291   : > { %v1322_v38 = vpop.permute.xlu1 %1321  ;;  %v667_v34 = vsel %vm652_vm8, %v647_v48, %v649_v21  ;;  %v767_v59 = vsel %vm752_vm2, %v766_v13, %v765_v8 }
 0x292   : > { %v715_v43 = vsel %vm5763_vm1, %v667_v34, %v586_v30  ;;  %v1328_v52 = vsel %vm8494_vm13, %v1322_v38, %v1324_v62  ;;  %v699_v15 = vsel %vm5499_vm10, %v586_v30, %v667_v34  ;;  %vm8617_vm13 = vcmask 916480  }
 0x293   : > { %v880_v21 = vrot.slane %v715_v43, 1  ;;  %1910 = vmatpush1.msra.mxu0 %v1328_v52  ;;  %v751_v40 = vrot.slane %v699_v15, 1  ;;  %vm8619_vm7 = vmmov %vm8617_vm13 }
 0x294   : > { %1911 = vmatprep.subr.mxu0 %v6215_v5  ;;  %v842_v36 = vpop.permute.xlu0 %841 }
 0x295   : > { %v844_v62 = vpop.permute.xlu1 %843  ;;  %1912 = vmatpush1.msra.mxu0 %v6304_v35  ;;  %v881_v23 = vsel %vm752_vm2, %v880_v21, %v879_v4 }
 0x296   : > { %1913 = vmatprep.subr.mxu0 %v895_v55  ;;  %v847_v5 = vsel %vm8617_vm13, %v842_v36, %v844_v62  ;;  %vm8621_vm13 = vmmov %vm8620_vm12  ;;  %vm8523_vm12 = vcmask 1040384  }
 0x297   : > { %1914 = vmatpush1.msra.mxu0 %v881_v23  ;;  %v750_v7 = vsel %vm8621_vm13, %v748_v26, %v747_v41 }
 0x298   : > { %1915 = vmatprep.subr.mxu0 %v847_v5  ;;  %v840_v35 = vpop.permute.xlu0 %839  ;;  %v753_v46 = vsel %vm752_vm2, %v751_v40, %v750_v7 }
 0x299   : > { %v846_v50 = vsel %vm8619_vm7, %v840_v35, %v842_v36  ;;  %vm8623_vm7 = vcmask 261120  }
 0x29a   : > { %1916 = vmatpush1.msra.mxu0 %v846_v50 }
 0x29b   : > { %1917 = vmatprep.subr.mxu0 %v767_v59 }
 0x29c   : > { %1918 = vmatpush1.msra.mxu0 %v753_v46 }
 0x29d   : > { %4750 = vmatmul.mubr.msk.f32.vlgmr.msra.gmra.mxu0 %vm1883_vm14, %v1864_v0 }
 0x35d   : > { %v1953_v12 = vpop.f32.mrf.mxu0 }
 0x35f   : > { %v1955_v49 = vpop.f32.mrf.mxu0 }
 0x360   : > { %v1960_v58 = vcombine.low %v1953_v12, %v1955_v49  ;;  %v1961_v22 = vcombine.high %v1953_v12, %v1955_v49 }
 0x362   : > { %v1968_v20 = vrot.slane %v1960_v58, %v8600_v19  ;;  %v1975_v33 = vrot.slane %v1961_v22, %v8600_v19 }
 0x364   : > { %v1976_v45 = vcombine.high %v1968_v20, %v1968_v20  ;;  %v1977_v28 = vcombine.high %v1975_v33, %v1975_v33  ;;  %v6545_v57 = vrot.slane %v1968_v20, %v8600_v19  ;;  %v6548_v1 = vrot.slane %v1975_v33, %v8600_v19 }
 0x366   : > { %v6551_v39 = vrot.slane %v1976_v45, %v8600_v19  ;;  %v6554_v9 = vrot.slane %v1977_v28, %v8600_v19  ;;  %v2053_v47 = vrot.slane %v6548_v1, %v5323_v11  ;;  %v2057_v51 = vrot.slane %v6548_v1, %v5303_v2 }
 0x367   : > { %v2021_v48 = vrot.slane %v6545_v57, %v5323_v11  ;;  %v2025_v60 = vrot.slane %v6545_v57, %v5303_v2  ;;  %v6566_v31 = vcombine.high %v6545_v57, %v6545_v57  ;;  %v6570_v30 = vcombine.high %v6548_v1, %v6548_v1 }
 0x368   : > { %v2119_v38 = vsel %vm8523_vm12, %v2053_v47, 0.0  ;;  %v2120_v34 = vsel %vm8523_vm12, %v2057_v51, 0.0  ;;  %v2029_v14 = vrot.slane %v6551_v39, %v5323_v11  ;;  %v2033_v16 = vrot.slane %v6551_v39, %v5303_v2 }
 0x369   : > { %v2121_v37 = vadd.f32 %v2120_v34, %v2119_v38  ;;  %v2099_v43 = vsel %vm8523_vm12, %v2021_v48, 0.0  ;;  %v2100_v52 = vsel %vm8523_vm12, %v2025_v60, 0.0  ;;  %v2037_v63 = vrot.slane %v6566_v31, %v5323_v11 }
 0x36a   : > { %v2101_v32 = vadd.f32 %v2100_v52, %v2099_v43  ;;  %v2041_v21 = vrot.slane %v6566_v31, %v5303_v2  ;;  %v2104_v54 = vsel %vm8523_vm12, %v2029_v14, 0.0  ;;  %v2105_v29 = vsel %vm8523_vm12, %v2033_v16, 0.0 }
 0x36b   : > { %2122 = vadd.xlane.f32.xlu1 %v2121_v37  ;;  %v2109_v15 = vsel %vm8523_vm12, %v2037_v63, 0.0  ;;  %v2069_v36 = vrot.slane %v6570_v30, %v5323_v11  ;;  %v2073_v61 = vrot.slane %v6570_v30, %v5303_v2  ;;  %v2061_v24 = vrot.slane %v6554_v9, %v5323_v11 }
 0x36c   : > { %2102 = vadd.xlane.f32.xlu0 %v2101_v32  ;;  %v2110_v4 = vsel %vm8523_vm12, %v2041_v21, 0.0  ;;  %v2065_v53 = vrot.slane %v6554_v9, %v5303_v2  ;;  %v2139_v62 = vmul.f32 %v6545_v57, %v6545_v57  ;;  %v2106_v23 = vadd.f32 %v2105_v29, %v2104_v54 }
 0x36d   : > { %v2111_v55 = vadd.f32 %v2110_v4, %v2109_v15  ;;  %v6600_v17 = vcombine.high %v6551_v39, %v6551_v39  ;;  %v2129_v26 = vsel %vm8523_vm12, %v2069_v36, 0.0  ;;  %v2130_v13 = vsel %vm8523_vm12, %v2073_v61, 0.0 }
 0x36e   : > { %v2124_v5 = vsel %vm8523_vm12, %v2061_v24, 0.0  ;;  %v2125_v27 = vsel %vm8523_vm12, %v2065_v53, 0.0  ;;  %v2158_v40 = vrot.slane %v2139_v62, %v5323_v11  ;;  %v2162_v42 = vrot.slane %v2139_v62, %v5303_v2 }
 0x36f   : > { %2107 = vadd.xlane.f32.xlu1 %v2106_v23  ;;  %v2045_v35 = vrot.slane %v6600_v17, %v5323_v11  ;;  %v2049_v10 = vrot.slane %v6600_v17, %v5303_v2  ;;  %v2143_v25 = vmul.f32 %v6548_v1, %v6548_v1  ;;  %v6616_v50 = vcombine.high %v6554_v9, %v6554_v9 }
 0x370   : > { %2112 = vadd.xlane.f32.xlu0 %v2111_v55  ;;  %v2140_v8 = vmul.f32 %v6551_v39, %v6551_v39  ;;  %v2126_v41 = vadd.f32 %v2125_v27, %v2124_v5  ;;  %v2144_v0 = vmul.f32 %v6554_v9, %v6554_v9  ;;  %v2131_v46 = vadd.f32 %v2130_v13, %v2129_v26 }
 0x371   : > { %v2114_v59 = vsel %vm8523_vm12, %v2045_v35, 0.0  ;;  %v2115_v7 = vsel %vm8523_vm12, %v2049_v10, 0.0  ;;  %v2190_v12 = vrot.slane %v2143_v25, %v5323_v11  ;;  %v2194_v49 = vrot.slane %v2143_v25, %v5303_v2 }
 0x372   : > { %v2235_v58 = vsel %vm8523_vm12, %v2158_v40, 0.0  ;;  %v2236_v22 = vsel %vm8523_vm12, %v2162_v42, 0.0  ;;  %v2077_v20 = vrot.slane %v6616_v50, %v5323_v11  ;;  %v2081_v33 = vrot.slane %v6616_v50, %v5303_v2 }
 0x373   : > { %2127 = vadd.xlane.f32.xlu1 %v2126_v41  ;;  %v2116_v45 = vadd.f32 %v2115_v7, %v2114_v59  ;;  %v2166_v28 = vrot.slane %v2140_v8, %v5323_v11  ;;  %v2255_v47 = vsel %vm8523_vm12, %v2190_v12, 0.0  ;;  %v2256_v51 = vsel %vm8523_vm12, %v2194_v49, 0.0 }
 0x374   : > { %2132 = vadd.xlane.f32.xlu0 %v2131_v46  ;;  %v2170_v48 = vrot.slane %v2140_v8, %v5303_v2  ;;  %v2198_v60 = vrot.slane %v2144_v0, %v5323_v11  ;;  %v2237_v38 = vadd.f32 %v2236_v22, %v2235_v58  ;;  %v2134_v34 = vsel %vm8523_vm12, %v2077_v20, 0.0 }
 0x375   : > { %v2135_v14 = vsel %vm8523_vm12, %v2081_v33, 0.0  ;;  %v2202_v16 = vrot.slane %v2144_v0, %v5303_v2  ;;  %v2141_v37 = vmul.f32 %v6566_v31, %v6566_v31  ;;  %v2142_v43 = vmul.f32 %v6600_v17, %v6600_v17 }
 0x376   : > { %v2257_v52 = vadd.f32 %v2256_v51, %v2255_v47  ;;  %v2136_v63 = vadd.f32 %v2135_v14, %v2134_v34  ;;  %v2240_v32 = vsel %vm8523_vm12, %v2166_v28, 0.0  ;;  %v2241_v21 = vsel %vm8523_vm12, %v2170_v48, 0.0 }
 0x377   : > { %2117 = vadd.xlane.f32.xlu1 %v2116_v45  ;;  %v2260_v54 = vsel %vm8523_vm12, %v2198_v60, 0.0  ;;  %v2261_v29 = vsel %vm8523_vm12, %v2202_v16, 0.0  ;;  %v2182_v15 = vrot.slane %v2142_v43, %v5323_v11  ;;  %v2186_v36 = vrot.slane %v2142_v43, %v5303_v2 }
 0x378   : > { %2238 = vadd.xlane.f32.xlu0 %v2237_v38  ;;  %v2146_v61 = vmul.f32 %v6616_v50, %v6616_v50  ;;  %v2174_v4 = vrot.slane %v2141_v37, %v5323_v11  ;;  %v2178_v24 = vrot.slane %v2141_v37, %v5303_v2  ;;  %v2145_v53 = vmul.f32 %v6570_v30, %v6570_v30 }
 0x379   : > { %v2242_v62 = vadd.f32 %v2241_v21, %v2240_v32  ;;  %v2262_v55 = vadd.f32 %v2261_v29, %v2260_v54  ;;  %v2250_v23 = vsel %vm8523_vm12, %v2182_v15, 0.0  ;;  %v2251_v26 = vsel %vm8523_vm12, %v2186_v36, 0.0 }
 0x37a   : > { %v2214_v13 = vrot.slane %v2146_v61, %v5323_v11  ;;  %v2218_v5 = vrot.slane %v2146_v61, %v5303_v2  ;;  %v2245_v27 = vsel %vm8523_vm12, %v2174_v4, 0.0  ;;  %v2246_v40 = vsel %vm8523_vm12, %v2178_v24, 0.0 }
 0x37b   : > { %2137 = vadd.xlane.f32.xlu1 %v2136_v63  ;;  %v2206_v42 = vrot.slane %v2145_v53, %v5323_v11  ;;  %v2210_v35 = vrot.slane %v2145_v53, %v5303_v2  ;;  %v2252_v10 = vadd.f32 %v2251_v26, %v2250_v23  ;;  %v2247_v25 = vadd.f32 %v2246_v40, %v2245_v27 }
 0x37c   : > { %2258 = vadd.xlane.f32.xlu0 %v2257_v52  ;;  %v2270_v8 = vsel %vm8523_vm12, %v2214_v13, 0.0  ;;  %v2271_v41 = vsel %vm8523_vm12, %v2218_v5, 0.0 }
 0x37d   : > { %v2265_v59 = vsel %vm8523_vm12, %v2206_v42, 0.0  ;;  %v2266_v7 = vsel %vm8523_vm12, %v2210_v35, 0.0  ;;  %v2272_v0 = vadd.f32 %v2271_v41, %v2270_v8 }
 0x37e   : > { %v2267_v46 = vadd.f32 %v2266_v7, %v2265_v59 }
 0x37f   : > { %2263 = vadd.xlane.f32.xlu1 %v2262_v55 }
 0x380   : > { %2243 = vadd.xlane.f32.xlu0 %v2242_v62 }
 0x383   : > { %2253 = vadd.xlane.f32.xlu1 %v2252_v10 }
 0x384   : > { %2248 = vadd.xlane.f32.xlu0 %v2247_v25 }
 0x387   : > { %2273 = vadd.xlane.f32.xlu1 %v2272_v0 }
 0x388   : > { %2268 = vadd.xlane.f32.xlu0 %v2267_v46 }
 0x3f4   : > { %v2123_v12 = vpop.xlane.xlu1 %2122 }
 0x3f5   : > { %v2103_v49 = vpop.xlane.xlu0 %2102  ;;  %v6668_v51 = vmul.f32 0.00390625, %v2123_v12 }
 0x3f6   : > { %v2275_v45 = vmul.f32 0.00390625, %v2103_v49 }
 0x3f7   : > { %v2295_v37 = vmul.f32 %v6668_v51, %v6668_v51 }
 0x3f8   : > { %v2108_v58 = vpop.xlane.xlu1 %2107  ;;  %v2291_v48 = vmul.f32 %v2275_v45, %v2275_v45  ;;  %v2318_v49 = vrot.slane %v2275_v45, %v5323_v11 }
 0x3f9   : > { %v2113_v22 = vpop.xlane.xlu0 %2112  ;;  %v6674_v43 = vmul.f32 0.00390625, %v2108_v58 }
 0x3fa   : > { %v6680_v61 = vmul.f32 0.00390625, %v2113_v22 }
 0x3fb   : > { %v2292_v4 = vmul.f32 %v6674_v43, %v6674_v43 }
 0x3fc   : > { %v2128_v20 = vpop.xlane.xlu1 %2127  ;;  %v2293_v42 = vmul.f32 %v6680_v61, %v6680_v61 }
 0x3fd   : > { %v2133_v33 = vpop.xlane.xlu0 %2132  ;;  %v6670_v14 = vmul.f32 0.00390625, %v2128_v20 }
 0x3fe   : > { %v6690_v35 = vmul.f32 0.00390625, %v2133_v33 }
 0x3ff   : > { %v2296_v54 = vmul.f32 %v6670_v14, %v6670_v14 }
 0x400   : > { %v2118_v28 = vpop.xlane.xlu1 %2117  ;;  %v2297_v58 = vmul.f32 %v6690_v35, %v6690_v35 }
 0x401   : > { %v2239_v47 = vpop.xlane.xlu0 %2238  ;;  %v6678_v29 = vmul.f32 0.00390625, %v2118_v28 }
 0x402   : > { %v2283_v60 = vmul.f32 0.00390625, %v2239_v47 }
 0x403   : > { %v2294_v26 = vmul.f32 %v6678_v29, %v6678_v29 }
 0x404   : > { %v2299_v38 = vsub.f32 %v2283_v60, %v2291_v48  ;;  %v2138_v34 = vpop.xlane.xlu1 %2137  ;;  %v2334_v60 = vrot.slane %v6668_v51, %v5323_v11 }
 0x405   : > { %v2259_v16 = vpop.xlane.xlu0 %2258  ;;  %v6686_v13 = vmul.f32 0.00390625, %v2138_v34 }
 0x406   : > { %v2363_v52 = vadd.f32 1e-05, %v2299_v38  ;;  %v2287_v63 = vmul.f32 0.00390625, %v2259_v16  ;;  %v2355_v38 = vsub.f32 %v6545_v57, %v2318_v49 }
 0x407   : > { %v2298_v7 = vmul.f32 %v6686_v13, %v6686_v13 }
 0x408   : > { %4841 = vrsqrt.f32 %v2363_v52  ;;  %v2303_v32 = vsub.f32 %v2287_v63, %v2295_v37  ;;  %v2264_v21 = vpop.xlane.xlu1 %2263  ;;  %v2338_v52 = vrot.slane %v6670_v14, %v5323_v11  ;;  %v2359_v63 = vsub.f32 %v6548_v1, %v2334_v60 }
 0x409   : > { %v2244_v15 = vpop.xlane.xlu0 %2243  ;;  %v2288_v36 = vmul.f32 0.00390625, %v2264_v21  ;;  %v2330_v14 = vrot.slane %v6678_v29, %v5323_v11 }
 0x40a   : > { %v2367_v24 = vadd.f32 1e-05, %v2303_v32  ;;  %v2284_v53 = vmul.f32 0.00390625, %v2244_v15  ;;  %v2322_v32 = vrot.slane %v6674_v43, %v5323_v11  ;;  %v2326_v43 = vrot.slane %v6680_v61, %v5323_v11 }
 0x40b   : > { %v2304_v62 = vsub.f32 %v2288_v36, %v2296_v54  ;;  %v2346_v61 = vrot.slane %v6686_v13, %v5323_v11 }
 0x40c   : > { %4843 = vrsqrt.f32 %v2367_v24  ;;  %v2300_v55 = vsub.f32 %v2284_v53, %v2292_v4  ;;  %v2254_v23 = vpop.xlane.xlu1 %2253  ;;  %v2360_v4 = vsub.f32 %v6554_v9, %v2338_v52  ;;  %v2356_v24 = vsub.f32 %v6551_v39, %v2322_v32 }
 0x40d   : > { %v2368_v5 = vadd.f32 1e-05, %v2304_v62  ;;  %v2249_v27 = vpop.xlane.xlu0 %2248  ;;  %v2286_v40 = vmul.f32 0.00390625, %v2254_v23  ;;  %v2362_v13 = vsub.f32 %v6616_v50, %v2346_v61 }
 0x40e   : > { %v2364_v10 = vadd.f32 1e-05, %v2300_v55  ;;  %v2285_v25 = vmul.f32 0.00390625, %v2249_v27  ;;  %v2357_v27 = vsub.f32 %v6566_v31, %v2326_v43 }
 0x40f   : > { %4845 = vrsqrt.f32 %v2368_v5  ;;  %v2302_v8 = vsub.f32 %v2286_v40, %v2294_v26  ;;  %v2358_v26 = vsub.f32 %v6600_v17, %v2330_v14  ;;  %v2342_v40 = vrot.slane %v6690_v35, %v5323_v11 }
 0x410   : > { %4847 = vrsqrt.f32 %v2364_v10  ;;  %v2301_v41 = vsub.f32 %v2285_v25, %v2293_v42  ;;  %v2274_v59 = vpop.xlane.xlu1 %2273 }
 0x411   : > { %v2366_v0 = vadd.f32 1e-05, %v2302_v8  ;;  %v2269_v46 = vpop.xlane.xlu0 %2268  ;;  %v2290_v12 = vmul.f32 0.00390625, %v2274_v59  ;;  %v2361_v59 = vsub.f32 %v6570_v30, %v2342_v40 }
 0x412   : > { %v2365_v22 = vadd.f32 1e-05, %v2301_v41  ;;  %v2289_v20 = vmul.f32 0.00390625, %v2269_v46 }
 0x413   : > { %4849 = vrsqrt.f32 %v2366_v0  ;;  %v2306_v33 = vsub.f32 %v2290_v12, %v2298_v7 }
 0x414   : > { %4851 = vrsqrt.f32 %v2365_v22  ;;  %v2305_v28 = vsub.f32 %v2289_v20, %v2297_v58 }
 0x415   : > { %v4842_v47 = vpop.eup %4841  ;;  %v2370_v48 = vadd.f32 1e-05, %v2306_v33 }
 0x416   : > { %v2369_v34 = vadd.f32 1e-05, %v2305_v28  ;;  %v2390_v16 = vrot.slane %v4842_v47, %v5323_v11 }
 0x417   : > { %4853 = vrsqrt.f32 %v2370_v48 }
 0x418   : > { %4855 = vrsqrt.f32 %v2369_v34  ;;  %v2427_v45 = vmul.f32 %v2390_v16, %v2355_v38 }
 0x419   : > { %v4844_v37 = vpop.eup %4843 }
 0x41a   : > { %v2435_v21 = vmax.f32 %v2427_v45, 0.0  ;;  %v2406_v51 = vrot.slane %v4844_v37, %v5323_v11 }
 0x41c   : > { %v4846_v54 = vpop.eup %4845  ;;  %2443 = vst.msk [vmem:[#allocation2] sm:$0x1] %vm5209_vm0, %v2435_v21  ;;  %2459 = vrot.lane.b32.xlu1 %v2435_v21, %s5029_s18  ;;  %v2431_v15 = vmul.f32 %v2406_v51, %v2359_v63 }
 0x41d   : > { %v4848_v36 = vpop.eup %4847  ;;  %v2410_v1 = vrot.slane %v4846_v54, %v5323_v11 }
 0x41e   : > { %v2439_v53 = vmax.f32 %v2431_v15, 0.0  ;;  %v2394_v62 = vrot.slane %v4848_v36, %v5323_v11 }
 0x41f   : > { %v2432_v55 = vmul.f32 %v2410_v1, %v2360_v4 }
 0x420   : > { %v4850_v23 = vpop.eup %4849  ;;  %2447 = vst.msk [vmem:[#allocation2 + $0xc] sm:$0x1] %vm5209_vm0, %v2439_v53  ;;  %2467 = vrot.lane.b32.xlu0 %v2439_v53, %s5029_s18  ;;  %2507 = vrot.lane.b32.xlu1 %v2435_v21, %s5030_s20  ;;  %v2428_v9 = vmul.f32 %v2394_v62, %v2356_v24 }
 0x421   : > { %v4852_v29 = vpop.eup %4851  ;;  %v2440_v39 = vmax.f32 %v2432_v55, 0.0  ;;  %v2402_v5 = vrot.slane %v4850_v23, %v5323_v11 }
 0x422   : > { %v2436_v42 = vmax.f32 %v2428_v9, 0.0  ;;  %v2398_v10 = vrot.slane %v4852_v29, %v5323_v11 }
 0x423   : > { %2448 = vst.msk [vmem:[#allocation2 + $0xf] sm:$0x1] %vm5209_vm0, %v2440_v39  ;;  %v2430_v25 = vmul.f32 %v2402_v5, %v2358_v26 }
 0x424   : > { %v4854_v8 = vpop.eup %4853  ;;  %2461 = vrot.lane.b32.xlu0 %v2436_v42, %s5029_s18  ;;  %2444 = vst.msk [vmem:[#allocation2 + $0x3] sm:$0x1] %vm5209_vm0, %v2436_v42  ;;  %2515 = vrot.lane.b32.xlu1 %v2439_v53, %s5030_s20  ;;  %v2429_v17 = vmul.f32 %v2398_v10, %v2357_v27 }
 0x425   : > { %v4856_v31 = vpop.eup %4855  ;;  %v2438_v35 = vmax.f32 %v2430_v25, 0.0  ;;  %v2418_v41 = vrot.slane %v4854_v8, %v5323_v11 }
 0x426   : > { %v2437_v7 = vmax.f32 %v2429_v17, 0.0  ;;  %v2414_v0 = vrot.slane %v4856_v31, %v5323_v11 }
 0x427   : > { %2446 = vst.msk [vmem:[#allocation2 + $0x9] sm:$0x1] %vm5209_vm0, %v2438_v35  ;;  %v2434_v46 = vmul.f32 %v2418_v41, %v2362_v13 }
 0x428   : > { %2445 = vst.msk [vmem:[#allocation2 + $0x6] sm:$0x1] %vm5209_vm0, %v2437_v7  ;;  %2463 = vrot.lane.b32.xlu1 %v2437_v7, %s5029_s18  ;;  %2469 = vrot.lane.b32.xlu0 %v2440_v39, %s5029_s18  ;;  %v2433_v50 = vmul.f32 %v2414_v0, %v2361_v59 }
 0x429   : > { %v2442_v12 = vmax.f32 %v2434_v46, 0.0 }
 0x42a   : > { %v2441_v49 = vmax.f32 %v2433_v50, 0.0 }
 0x42b   : > { %2450 = vst.msk [vmem:[#allocation2 + $0x15] sm:$0x1] %vm5209_vm0, %v2442_v12 }
 0x42c   : > { %2509 = vrot.lane.b32.xlu1 %v2436_v42, %s5030_s20  ;;  %2517 = vrot.lane.b32.xlu0 %v2440_v39, %s5030_s20  ;;  %2449 = vst.msk [vmem:[#allocation2 + $0x12] sm:$0x1] %vm5209_vm0, %v2441_v49  ;;  %vm8625_vm0 = vmmov %vm8623_vm7 }
 0x42d   : > { %vm8627_vm13 = vmmov %vm8625_vm0 }
 0x430   : > { %2511 = vrot.lane.b32.xlu1 %v2437_v7, %s5030_s20  ;;  %2465 = vrot.lane.b32.xlu0 %v2438_v35, %s5029_s18 }
 0x434   : > { %2471 = vrot.lane.b32.xlu1 %v2441_v49, %s5029_s18  ;;  %2473 = vrot.lane.b32.xlu0 %v2442_v12, %s5029_s18 }
 0x438   : > { %2519 = vrot.lane.b32.xlu1 %v2441_v49, %s5030_s20  ;;  %2513 = vrot.lane.b32.xlu0 %v2438_v35, %s5030_s20 }
 0x43c   : > { %2521 = vrot.lane.b32.xlu0 %v2442_v12, %s5030_s20  ;;  %s8426_s20 = scalar_lea.hbm %s8466_s3, %s4758_s10 }
 0x48e   : > { %v2460_v30 = vpop.permute.xlu1 %2459 }
 0x48f   : > { %v2475_v58 = vrot.slane %v2460_v30, 7 }
 0x491   : > { %v2483_v22 = vsel %vm8623_vm7, %v2475_v58, %v2460_v30  ;;  %vm8628_vm7 = vmmov %vm8625_vm0 }
 0x492   : > { %2499 = vst.msk [vmem:[#allocation2] sm:$0x7] %vm5255_vm4, %v2483_v22  ;;  %v2468_v33 = vpop.permute.xlu0 %2467  ;;  %v2508_v28 = vpop.permute.xlu1 %2507 }
 0x493   : > { %v2479_v47 = vrot.slane %v2468_v33, 7  ;;  %v2523_v48 = vrot.slane %v2508_v28, 1 }
 0x495   : > { %v2487_v60 = vsel %vm8625_vm0, %v2479_v47, %v2468_v33  ;;  %2539 = vst.msk [vmem:[#allocation2 + $0x2] sm:$0x1] %vm5272_vm6, %v2523_v48 }
 0x496   : > { %2503 = vst.msk [vmem:[#allocation2 + $0xc] sm:$0x7] %vm5255_vm4, %v2487_v60  ;;  %v2462_v34 = vpop.permute.xlu0 %2461  ;;  %v2516_v16 = vpop.permute.xlu1 %2515 }
 0x497   : > { %v2476_v45 = vrot.slane %v2462_v34, 7  ;;  %v2527_v37 = vrot.slane %v2516_v16, 1 }
 0x499   : > { %v2484_v52 = vsel %vm8627_vm13, %v2476_v45, %v2462_v34  ;;  %2543 = vst.msk [vmem:[#allocation2 + $0xe] sm:$0x1] %vm5272_vm6, %v2527_v37  ;;  %vm8629_vm13 = vmmov %vm8625_vm0 }
 0x49a   : > { %2500 = vst.msk [vmem:[#allocation2 + $0x3] sm:$0x7] %vm5255_vm4, %v2484_v52  ;;  %v2470_v63 = vpop.permute.xlu0 %2469  ;;  %v2464_v32 = vpop.permute.xlu1 %2463 }
 0x49b   : > { %v2480_v21 = vrot.slane %v2470_v63, 7  ;;  %v2477_v51 = vrot.slane %v2464_v32, 7 }
 0x49c   : > { %v6772_v54 = vld [vmem:[#allocation2] sm:$0x7] }
 0x49d   : > { %v2488_v57 = vsel %vm8628_vm7, %v2480_v21, %v2470_v63  ;;  %v2485_v15 = vsel %vm8625_vm0, %v2477_v51, %v2464_v32  ;;  %v3532_v36 = vrot.slane %v6772_v54, %v5308_v6  ;;  %v3528_v4 = vrot.slane %v6772_v54, %v5303_v2  ;;  %vm8630_vm7 = vmmov %vm8625_vm0  ;;  %v3026_v41 = vld [vmem:[#allocation2] sm:$0x7] }
 0x49e   : > { %2504 = vst.msk [vmem:[#allocation2 + $0xf] sm:$0x7] %vm5255_vm4, %v2488_v57  ;;  %2501 = vst.msk [vmem:[#allocation2 + $0x6] sm:$0x7] %vm5255_vm4, %v2485_v15  ;;  %v2518_v14 = vpop.permute.xlu0 %2517  ;;  %v2510_v1 = vpop.permute.xlu1 %2509  ;;  %v3524_v26 = vrot.slane %v6772_v54, %v5323_v11  ;;  %v3053_v58 = vrot.slane %v3026_v41, %v5308_v6  ;;  %v6838_v20 = vld [vmem:[#allocation2] sm:$0x7]  ;;  %v3049_v16 = vrot.slane %v3026_v41, %v5303_v2 }
 0x49f   : > { %v2528_v43 = vrot.slane %v2518_v14, 1  ;;  %v2524_v24 = vrot.slane %v2510_v1, 1  ;;  %3621 = vrot.lane.b32.xlu0 %v3532_v36, %s5031_s23  ;;  %3619 = vrot.lane.b32.xlu1 %v3528_v4, %s5031_s23  ;;  %v6865_v32 = vrot.slane %v3026_v41, %v5323_v11 }
 0x4a0   : > { %v6790_v55 = vld [vmem:[#allocation2 + $0xc] sm:$0x7] }
 0x4a1   : > { %2544 = vst.msk [vmem:[#allocation2 + $0x11] sm:$0x1] %vm5272_vm6, %v2528_v43  ;;  %2540 = vst.msk [vmem:[#allocation2 + $0x5] sm:$0x1] %vm5272_vm6, %v2524_v24  ;;  %v3580_v61 = vrot.slane %v6790_v55, %v5308_v6  ;;  %v3576_v25 = vrot.slane %v6790_v55, %v5303_v2  ;;  %v3572_v35 = vrot.slane %v6790_v55, %v5323_v11  ;;  %v3030_v22 = vld [vmem:[#allocation2 + $0xc] sm:$0x7] }
 0x4a2   : > { %v2466_v53 = vpop.permute.xlu0 %2465  ;;  %v2512_v62 = vpop.permute.xlu1 %2511  ;;  %v6840_v33 = vld [vmem:[#allocation2 + $0xc] sm:$0x7]  ;;  %v3101_v45 = vrot.slane %v3030_v22, %v5308_v6  ;;  %v6868_v21 = vrot.slane %v3030_v22, %v5323_v11  ;;  %v6871_v51 = vrot.slane %v3030_v22, %v5303_v2 }
 0x4a3   : > { %v2478_v23 = vrot.slane %v2466_v53, 7  ;;  %v2525_v9 = vrot.slane %v2512_v62, 1  ;;  %3699 = vrot.lane.b32.xlu0 %v3528_v4, %s5032_s25  ;;  %3701 = vrot.lane.b32.xlu1 %v3532_v36, %s5032_s25 }
 0x4a5   : > { %v2486_v29 = vsel %vm8629_vm13, %v2478_v23, %v2466_v53  ;;  %2541 = vst.msk [vmem:[#allocation2 + $0x8] sm:$0x1] %vm5272_vm6, %v2525_v9 }
 0x4a6   : > { %2502 = vst.msk [vmem:[#allocation2 + $0x9] sm:$0x7] %vm5255_vm4, %v2486_v29  ;;  %v2474_v39 = vpop.permute.xlu0 %2473  ;;  %v2472_v5 = vpop.permute.xlu1 %2471 }
 0x4a7   : > { %v2482_v27 = vrot.slane %v2474_v39, 7  ;;  %v2481_v40 = vrot.slane %v2472_v5, 7  ;;  %3617 = vrot.lane.b32.xlu1 %v3524_v26, %s5031_s23  ;;  %3645 = vrot.lane.b32.xlu0 %v3580_v61, %s5031_s23 }
 0x4a8   : > { %v6821_v59 = vld [vmem:[#allocation2 + $0x3] sm:$0x7]  ;;  %v6823_v0 = vld [vmem:[#allocation2 + $0xf] sm:$0x7] }
 0x4a9   : > { %v2490_v42 = vsel %vm8630_vm7, %v2482_v27, %v2474_v39  ;;  %v2489_v10 = vsel %vm8625_vm0, %v2481_v40, %v2472_v5  ;;  %v6825_v46 = vld [vmem:[#allocation2 + $0x3] sm:$0x7]  ;;  %v6827_v50 = vld [vmem:[#allocation2 + $0xf] sm:$0x7]  ;;  %v3857_v28 = vcombine.low %v6772_v54, %v6821_v59  ;;  %v3859_v47 = vcombine.low %v6790_v55, %v6823_v0 }
 0x4aa   : > { %2506 = vst.msk [vmem:[#allocation2 + $0x15] sm:$0x7] %vm5255_vm4, %v2490_v42  ;;  %2505 = vst.msk [vmem:[#allocation2 + $0x12] sm:$0x7] %vm5255_vm4, %v2489_v10  ;;  %v2514_v8 = vpop.permute.xlu0 %2513  ;;  %v2520_v17 = vpop.permute.xlu1 %2519  ;;  %v6831_v49 = vld [vmem:[#allocation2 + $0x3] sm:$0x7]  ;;  %v3378_v48 = vcombine.low %v3026_v41, %v6825_v46  ;;  %v3380_v60 = vcombine.low %v3030_v22, %v6827_v50  ;;  %v6875_v54 = vrot.slane %v6838_v20, %v5303_v2 }
 0x4ab   : > { %v2526_v31 = vrot.slane %v2514_v8, 1  ;;  %v2529_v13 = vrot.slane %v2520_v17, 1  ;;  %3725 = vrot.lane.b32.xlu0 %v3580_v61, %s5032_s25  ;;  %3643 = vrot.lane.b32.xlu1 %v3576_v25, %s5031_s23  ;;  %v6833_v30 = vld [vmem:[#allocation2 + $0xf] sm:$0x7]  ;;  %v2899_v34 = vcombine.low %v6838_v20, %v6831_v49  ;;  %v3867_v43 = vrot.slane %v3857_v28, %v8600_v19 }
 0x4ac   : > { %v2901_v38 = vcombine.low %v6840_v33, %v6833_v30  ;;  %v6885_v4 = vld [vmem:[#allocation2 + $0x6] sm:$0x7]  ;;  %v3881_v24 = vrot.slane %v3859_v47, %v8600_v19  ;;  %v3388_v53 = vrot.slane %v3378_v48, %v8600_v19  ;;  %v3402_v61 = vrot.slane %v3380_v60, %v8600_v19 }
 0x4ad   : > { %2542 = vst.msk [vmem:[#allocation2 + $0xb] sm:$0x1] %vm5272_vm6, %v2526_v31  ;;  %2545 = vst.msk [vmem:[#allocation2 + $0x14] sm:$0x1] %vm5272_vm6, %v2529_v13  ;;  %v6889_v1 = vld [vmem:[#allocation2 + $0x6] sm:$0x7]  ;;  %v2909_v40 = vrot.slane %v2899_v34, %v8600_v19 }
 0x4ae   : > { %v2522_v7 = vpop.permute.xlu0 %2521  ;;  %v6896_v55 = vld [vmem:[#allocation2 + $0x6] sm:$0x7]  ;;  %v2923_v8 = vrot.slane %v2901_v38, %v8600_v19  ;;  %vm8672_vm4 = vcmask 793600  }
 0x4af   : > { %v2530_v12 = vrot.slane %v2522_v7, 1  ;;  %3697 = vrot.lane.b32.xlu1 %v3524_v26, %s5032_s25  ;;  %3721 = vrot.lane.b32.xlu0 %v3572_v35, %s5032_s25  ;;  %vm8677_vm7 = vmmov %vm8672_vm4 }
 0x4b0   : > { %vm8679_vm0 = vmmov %vm8672_vm4 }
 0x4b1   : > { %2546 = vst.msk [vmem:[#allocation2 + $0x17] sm:$0x1] %vm5272_vm6, %v2530_v12  ;;  %vm8674_vm6 = vcmask 777216  }
 0x4b2   : > { %vm8676_vm13 = vmmov %vm8674_vm6 }
 0x4b3   : > { %3723 = vrot.lane.b32.xlu1 %v3576_v25, %s5032_s25  ;;  %3142 = vrot.lane.b32.xlu0 %v3053_v58, %s5033_s27 }
 0x4b4   : > { %v6858_v37 = vld [vmem:[#allocation2 + $0x9] sm:$0x7]  ;;  %v6887_v14 = vld [vmem:[#allocation2 + $0x12] sm:$0x7] }
 0x4b5   : > { %v6862_v63 = vld [vmem:[#allocation2 + $0x9] sm:$0x7]  ;;  %v6894_v62 = vld [vmem:[#allocation2 + $0x12] sm:$0x7]  ;;  %v3858_v9 = vcombine.low %v6885_v4, %v6858_v37 }
 0x4b6   : > { %v6879_v15 = vld [vmem:[#allocation2 + $0x9] sm:$0x7]  ;;  %v6898_v23 = vld [vmem:[#allocation2 + $0x12] sm:$0x7]  ;;  %v3379_v26 = vcombine.low %v6889_v1, %v6862_v63 }
 0x4b7   : > { %3220 = vrot.lane.b32.xlu0 %v3049_v16, %s5034_s28  ;;  %3641 = vrot.lane.b32.xlu1 %v3572_v35, %s5031_s23  ;;  %v2900_v5 = vcombine.low %v6896_v55, %v6879_v15  ;;  %v3874_v42 = vrot.slane %v3858_v9, %v8600_v19 }
 0x4b8   : > { %v6860_v52 = vld [vmem:[#allocation2 + $0x15] sm:$0x7]  ;;  %v3395_v25 = vrot.slane %v3379_v26, %v8600_v19 }
 0x4b9   : > { %v6877_v57 = vld [vmem:[#allocation2 + $0x15] sm:$0x7]  ;;  %v3860_v29 = vcombine.low %v6887_v14, %v6860_v52  ;;  %v2916_v31 = vrot.slane %v2900_v5, %v8600_v19  ;;  %v3889_v35 = vcombine.low %v3867_v43, %v3874_v42  ;;  %v3890_v7 = vcombine.high %v3867_v43, %v3874_v42 }
 0x4ba   : > { %v6881_v36 = vld [vmem:[#allocation2 + $0x15] sm:$0x7]  ;;  %v3381_v39 = vcombine.low %v6894_v62, %v6877_v57  ;;  %v3411_v22 = vcombine.high %v3388_v53, %v3395_v25  ;;  %v3410_v47 = vcombine.low %v3388_v53, %v3395_v25  ;;  %v2582_v53 = vrot.slane %v6831_v49, %v5303_v2 }
 0x4bb   : > { %3140 = vrot.lane.b32.xlu1 %v3049_v16, %s5033_s27  ;;  %3166 = vrot.lane.b32.xlu0 %v3101_v45, %s5033_s27  ;;  %v2902_v27 = vcombine.low %v6898_v23, %v6881_v36  ;;  %v3888_v10 = vrot.slane %v3860_v29, %v8600_v19  ;;  %v6924_v60 = vrot.slane %v3889_v35, %v8600_v19 }
 0x4bc   : > { %v3409_v17 = vrot.slane %v3381_v39, %v8600_v19  ;;  %v6930_v34 = vrot.slane %v3890_v7, %v8600_v19  ;;  %v6940_v16 = vrot.slane %v3411_v22, %v8600_v19  ;;  %v6946_v43 = vrot.slane %v3410_v47, %v8600_v19 }
 0x4bd   : > { %v2930_v13 = vrot.slane %v2902_v27, %v8600_v19  ;;  %v3891_v41 = vcombine.low %v3881_v24, %v3888_v10  ;;  %v3892_v12 = vcombine.high %v3881_v24, %v3888_v10  ;;  %v2932_v5 = vcombine.high %v2909_v40, %v2916_v31 }
 0x4be   : > { %v3413_v28 = vcombine.high %v3402_v61, %v3409_v17  ;;  %v3412_v48 = vcombine.low %v3402_v61, %v3409_v17  ;;  %v2931_v61 = vcombine.low %v2909_v40, %v2916_v31  ;;  %v2566_v7 = vrot.slane %v6838_v20, %v5323_v11 }
 0x4bf   : > { %3222 = vrot.lane.b32.xlu1 %v3053_v58, %s5034_s28  ;;  %3246 = vrot.lane.b32.xlu0 %v3101_v45, %s5034_s28  ;;  %v6927_v58 = vrot.slane %v3891_v41, %v8600_v19  ;;  %v6933_v38 = vrot.slane %v3892_v12, %v8600_v19  ;;  %v2933_v39 = vcombine.low %v2923_v8, %v2930_v13 }
 0x4c0   : > { %v6943_v45 = vrot.slane %v3413_v28, %v8600_v19  ;;  %v6955_v29 = vrot.slane %v3412_v48, %v8600_v19  ;;  %v2934_v10 = vcombine.high %v2923_v8, %v2930_v13  ;;  %v6968_v25 = vrot.slane %v2931_v61, %v8600_v19 }
 0x4c1   : > { %v6971_v17 = vrot.slane %v2933_v39, %v8600_v19  ;;  %v6974_v40 = vrot.slane %v2932_v5, %v8600_v19  ;;  %v2574_v8 = vrot.slane %v6838_v20, %v5308_v6  ;;  %v2618_v12 = vrot.slane %v6840_v33, %v5303_v2 }
 0x4c2   : > { %v6977_v31 = vrot.slane %v2934_v10, %v8600_v19  ;;  %v2622_v20 = vrot.slane %v6840_v33, %v5308_v6  ;;  %v3556_v22 = vrot.slane %v6885_v4, %v5308_v6  ;;  %v3548_v28 = vrot.slane %v6885_v4, %v5323_v11 }
 0x4c3   : > { %3138 = vrot.lane.b32.xlu1 %v6865_v32, %s5033_s27  ;;  %3242 = vrot.lane.b32.xlu0 %v6868_v21, %s5034_s28  ;;  %v3592_v47 = vrot.slane %v6823_v0, %v5308_v6  ;;  %v3584_v48 = vrot.slane %v6823_v0, %v5323_v11  ;;  %v3604_v61 = vrot.slane %v6887_v14, %v5308_v6 }
 0x4c4   : > { %v3065_v39 = vrot.slane %v6825_v46, %v5308_v6  ;;  %v3105_v41 = vrot.slane %v6827_v50, %v5323_v11 }
 0x4c7   : > { %3164 = vrot.lane.b32.xlu1 %v6871_v51, %s5033_s27  ;;  %2661 = vrot.lane.b32.xlu0 %v6875_v54, %s5035_s4 }
 0x4cb   : > { %3218 = vrot.lane.b32.xlu1 %v6865_v32, %s5034_s28  ;;  %2743 = vrot.lane.b32.xlu0 %v2574_v8, %s5036_s5  ;;  %v2614_v32 = vrot.slane %v6840_v33, %v5323_v11  ;;  %v3552_v33 = vrot.slane %v6885_v4, %v5303_v2  ;;  %v3600_v4 = vrot.slane %v6887_v14, %v5303_v2 }
 0x4cf   : > { %3244 = vrot.lane.b32.xlu1 %v6871_v51, %s5034_s28  ;;  %2659 = vrot.lane.b32.xlu0 %v2566_v7, %s5035_s4  ;;  %v3540_v51 = vrot.slane %v6821_v59, %v5303_v2 }
 0x4d3   : > { %3162 = vrot.lane.b32.xlu1 %v6868_v21, %s5033_s27  ;;  %2685 = vrot.lane.b32.xlu0 %v2618_v12, %s5035_s4  ;;  %v3544_v21 = vrot.slane %v6821_v59, %v5308_v6 }
 0x4d7   : > { %2663 = vrot.lane.b32.xlu1 %v2574_v8, %s5035_s4  ;;  %2739 = vrot.lane.b32.xlu0 %v2566_v7, %s5036_s5  ;;  %v3061_v7 = vrot.slane %v6825_v46, %v5303_v2 }
 0x4db   : > { %2741 = vrot.lane.b32.xlu1 %v6875_v54, %s5036_s5  ;;  %2765 = vrot.lane.b32.xlu0 %v2618_v12, %s5036_s5  ;;  %v3536_v54 = vrot.slane %v6821_v59, %v5323_v11  ;;  %v3588_v59 = vrot.slane %v6823_v0, %v5303_v2  ;;  %v3596_v12 = vrot.slane %v6887_v14, %v5323_v11 }
 0x4dc   : > { %v3057_v14 = vrot.slane %v6825_v46, %v5323_v11  ;;  %v3069_v46 = vrot.slane %v6889_v1, %v5323_v11 }
 0x4df   : > { %2687 = vrot.lane.b32.xlu1 %v2622_v20, %s5035_s4  ;;  %2683 = vrot.lane.b32.xlu0 %v2614_v32, %s5035_s4 }
 0x4e3   : > { %2767 = vrot.lane.b32.xlu1 %v2622_v20, %s5036_s5  ;;  %3627 = vrot.lane.b32.xlu0 %v3544_v21, %s5031_s23 }
 0x4e7   : > { %2763 = vrot.lane.b32.xlu1 %v2614_v32, %s5036_s5  ;;  %3707 = vrot.lane.b32.xlu0 %v3544_v21, %s5032_s25  ;;  %v3073_v21 = vrot.slane %v6889_v1, %v5303_v2 }
 0x4eb   : > { %3625 = vrot.lane.b32.xlu1 %v3540_v51, %s5031_s23  ;;  %3631 = vrot.lane.b32.xlu0 %v3552_v33, %s5031_s23 }
 0x4ef   : > { %3705 = vrot.lane.b32.xlu1 %v3540_v51, %s5032_s25  ;;  %3703 = vrot.lane.b32.xlu0 %v3536_v54, %s5032_s25 }
 0x4f3   : > { %3623 = vrot.lane.b32.xlu1 %v3536_v54, %s5031_s23  ;;  %3713 = vrot.lane.b32.xlu0 %v3556_v22, %s5032_s25 }
 0x4f7   : > { %3633 = vrot.lane.b32.xlu1 %v3556_v22, %s5031_s23  ;;  %3709 = vrot.lane.b32.xlu0 %v3548_v28, %s5032_s25 }
 0x4fb   : > { %3711 = vrot.lane.b32.xlu1 %v3552_v33, %s5032_s25  ;;  %3649 = vrot.lane.b32.xlu0 %v3588_v59, %s5031_s23 }
 0x4ff   : > { %3731 = vrot.lane.b32.xlu0 %v3592_v47, %s5032_s25  ;;  %3629 = vrot.lane.b32.xlu1 %v3548_v28, %s5031_s23  ;;  %v3077_v28 = vrot.slane %v6889_v1, %v5308_v6  ;;  %v3113_v1 = vrot.slane %v6827_v50, %v5308_v6 }
 0x503   : > { %3651 = vrot.lane.b32.xlu1 %v3592_v47, %s5031_s23  ;;  %3655 = vrot.lane.b32.xlu0 %v3600_v4, %s5031_s23 }
 0x507   : > { %3729 = vrot.lane.b32.xlu1 %v3588_v59, %s5032_s25  ;;  %3727 = vrot.lane.b32.xlu0 %v3584_v48, %s5032_s25 }
 0x50b   : > { %3647 = vrot.lane.b32.xlu1 %v3584_v48, %s5031_s23  ;;  %3737 = vrot.lane.b32.xlu0 %v3604_v61, %s5032_s25 }
 0x50f   : > { %3657 = vrot.lane.b32.xlu1 %v3604_v61, %s5031_s23  ;;  %3148 = vrot.lane.b32.xlu0 %v3065_v39, %s5033_s27  ;;  %v3109_v61 = vrot.slane %v6827_v50, %v5303_v2  ;;  %v2586_v50 = vrot.slane %v6831_v49, %v5308_v6 }
 0x511   : > { %v7059_v5 = vpop.permute.xlu0 %3621  ;;  %v7061_v0 = vpop.permute.xlu1 %3619 }
 0x513   : > { %3735 = vrot.lane.b32.xlu1 %v3600_v4, %s5032_s25  ;;  %3228 = vrot.lane.b32.xlu0 %v3065_v39, %s5034_s28 }
 0x515   : > { %v7065_v10 = vpop.permute.xlu0 %3699  ;;  %v7067_v8 = vpop.permute.xlu1 %3701 }
 0x517   : > { %3146 = vrot.lane.b32.xlu1 %v3061_v7, %s5033_s27  ;;  %3733 = vrot.lane.b32.xlu0 %v3596_v12, %s5032_s25 }
 0x519   : > { %v7075_v20 = vpop.permute.xlu0 %3645  ;;  %v7077_v32 = vpop.permute.xlu1 %3617 }
 0x51b   : > { %3226 = vrot.lane.b32.xlu1 %v3061_v7, %s5034_s28  ;;  %3152 = vrot.lane.b32.xlu0 %v3073_v21, %s5033_s27 }
 0x51d   : > { %v7083_v51 = vpop.permute.xlu0 %3725  ;;  %v7085_v33 = vpop.permute.xlu1 %3643 }
 0x51f   : > { %3224 = vrot.lane.b32.xlu0 %v3057_v14, %s5034_s28  ;;  %3653 = vrot.lane.b32.xlu1 %v3596_v12, %s5031_s23 }
 0x521   : > { %v7091_v54 = vpop.permute.xlu0 %3721  ;;  %v7093_v22 = vpop.permute.xlu1 %3697 }
 0x522   : > { %8631 = vst [vmem:[#allocation21_spill] sm:$0xff] %v7091_v54  ;;  %v3560_v54 = vrot.slane %v6858_v37, %v5323_v11 }
 0x523   : > { %3234 = vrot.lane.b32.xlu0 %v3077_v28, %s5034_s28  ;;  %3144 = vrot.lane.b32.xlu1 %v3057_v14, %s5033_s27 }
 0x525   : > { %v7099_v59 = vpop.permute.xlu0 %3142  ;;  %v7101_v47 = vpop.permute.xlu1 %3723 }
 0x526   : > { %8632 = vst [vmem:[#allocation20_spill] sm:$0xff] %v7099_v59 }
 0x527   : > { %3230 = vrot.lane.b32.xlu0 %v3069_v46, %s5034_s28  ;;  %3154 = vrot.lane.b32.xlu1 %v3077_v28, %s5033_s27  ;;  %v3121_v28 = vrot.slane %v6894_v62, %v5303_v2 }
 0x529   : > { %v7107_v4 = vpop.permute.xlu0 %3220  ;;  %v7109_v48 = vpop.permute.xlu1 %3641 }
 0x52a   : > { %8633 = vst [vmem:[#allocation22_spill] sm:$0xff] %v7107_v4  ;;  %8634 = vst [vmem:[#allocation23_spill] sm:$0xff] %v7109_v48  ;;  %v3564_v4 = vrot.slane %v6858_v37, %v5303_v2  ;;  %v2606_v48 = vrot.slane %v6879_v15, %v5303_v2 }
 0x52b   : > { %3170 = vrot.lane.b32.xlu0 %v3109_v61, %s5033_s27  ;;  %3232 = vrot.lane.b32.xlu1 %v3073_v21, %s5034_s28 }
 0x52d   : > { %v7115_v39 = vpop.permute.xlu0 %3166  ;;  %v7117_v7 = vpop.permute.xlu1 %3140 }
 0x52e   : > { %8635 = vst [vmem:[#allocation15_spill] sm:$0xff] %v7115_v39  ;;  %8636 = vst [vmem:[#allocation16_spill] sm:$0xff] %v7117_v7  ;;  %v2646_v39 = vrot.slane %v6898_v23, %v5308_v6  ;;  %v2638_v7 = vrot.slane %v6898_v23, %v5323_v11 }
 0x52f   : > { %3252 = vrot.lane.b32.xlu0 %v3113_v1, %s5034_s28  ;;  %3150 = vrot.lane.b32.xlu1 %v3069_v46, %s5033_s27 }
 0x531   : > { %v7123_v12 = vpop.permute.xlu0 %3246  ;;  %v7125_v14 = vpop.permute.xlu1 %3222 }
 0x532   : > { %8637 = vst [vmem:[#allocation17_spill] sm:$0xff] %v7123_v12  ;;  %8638 = vst [vmem:[#allocation24_spill] sm:$0xff] %v7125_v14 }
 0x533   : > { %3172 = vrot.lane.b32.xlu1 %v3113_v1, %s5033_s27  ;;  %3176 = vrot.lane.b32.xlu0 %v3121_v28, %s5033_s27  ;;  %v3125_v1 = vrot.slane %v6894_v62, %v5308_v6 }
 0x535   : > { %v7131_v21 = vpop.permute.xlu0 %3242  ;;  %v7133_v35 = vpop.permute.xlu1 %3138 }
 0x536   : > { %8639 = vst [vmem:[#allocation25_spill] sm:$0xff] %v7131_v21  ;;  %8640 = vst [vmem:[#allocation26_spill] sm:$0xff] %v7133_v35  ;;  %v2626_v35 = vrot.slane %v6833_v30, %v5323_v11 }
 0x537   : > { %3250 = vrot.lane.b32.xlu1 %v3109_v61, %s5034_s28  ;;  %3248 = vrot.lane.b32.xlu0 %v3105_v41, %s5034_s28 }
 0x539   : > { %v7139_v46 = vpop.permute.xlu0 %2661  ;;  %v7141_v13 = vpop.permute.xlu1 %3164 }
 0x53a   : > { %8641 = vst [vmem:[#allocation27_spill] sm:$0xff] %v7141_v13 }
 0x53b   : > { %3168 = vrot.lane.b32.xlu1 %v3105_v41, %s5033_s27  ;;  %3258 = vrot.lane.b32.xlu0 %v3125_v1, %s5034_s28 }
 0x53d   : > { %v7147_v42 = vpop.permute.xlu0 %2743  ;;  %v7149_v27 = vpop.permute.xlu1 %3218 }
 0x53e   : > { %8642 = vst [vmem:[#allocation28_spill] sm:$0xff] %v7149_v27 }
 0x53f   : > { %3178 = vrot.lane.b32.xlu1 %v3125_v1, %s5033_s27  ;;  %2669 = vrot.lane.b32.xlu0 %v2586_v50, %s5035_s4  ;;  %v3117_v1 = vrot.slane %v6894_v62, %v5323_v11  ;;  %v2578_v62 = vrot.slane %v6831_v49, %v5323_v11  ;;  %v2590_v49 = vrot.slane %v6896_v55, %v5323_v11 }
 0x541   : > { %v7155_v61 = vpop.permute.xlu0 %2659  ;;  %v7157_v9 = vpop.permute.xlu1 %3244 }
 0x542   : > { %8643 = vst [vmem:[#allocation29_spill] sm:$0xff] %v7157_v9 }
 0x543   : > { %3256 = vrot.lane.b32.xlu1 %v3121_v28, %s5034_s28  ;;  %2749 = vrot.lane.b32.xlu0 %v2586_v50, %s5036_s5  ;;  %v2594_v28 = vrot.slane %v6896_v55, %v5303_v2 }
 0x545   : > { %v7161_v41 = vpop.permute.xlu0 %2685  ;;  %v7163_v26 = vpop.permute.xlu1 %3162 }
 0x546   : > { %8644 = vst [vmem:[#allocation30_spill] sm:$0xff] %v7161_v41  ;;  %8645 = vst [vmem:[#allocation31_spill] sm:$0xff] %v7163_v26 }
 0x547   : > { %2667 = vrot.lane.b32.xlu1 %v2582_v53, %s5035_s4  ;;  %3254 = vrot.lane.b32.xlu0 %v3117_v1, %s5034_s28 }
 0x549   : > { %v7171_v24 = vpop.permute.xlu0 %2739  ;;  %v7173_v19 = vpop.permute.xlu1 %2663 }
 0x54b   : > { %2747 = vrot.lane.b32.xlu1 %v2582_v53, %s5036_s5  ;;  %2673 = vrot.lane.b32.xlu0 %v2594_v28, %s5035_s4  ;;  %v2598_v53 = vrot.slane %v6896_v55, %v5308_v6  ;;  %v2630_v55 = vrot.slane %v6833_v30, %v5303_v2 }
 0x54d   : > { %v7179_v50 = vpop.permute.xlu0 %2765  ;;  %v7181_v41 = vpop.permute.xlu1 %2741 }
 0x54e   : > { %8646 = vst [vmem:[#allocation32_spill] sm:$0xff] %v7179_v50 }
 0x54f   : > { %2745 = vrot.lane.b32.xlu0 %v2578_v62, %s5036_s5  ;;  %3174 = vrot.lane.b32.xlu1 %v3117_v1, %s5033_s27 }
 0x551   : > { %v7187_v26 = vpop.permute.xlu0 %2683  ;;  %v7189_v21 = vpop.permute.xlu1 %2687 }
 0x552   : > { %8647 = vst [vmem:[#allocation33_spill] sm:$0xff] %v7187_v26  ;;  %8648 = vst [vmem:[#allocation34_spill] sm:$0xff] %v7189_v21  ;;  %v2634_v26 = vrot.slane %v6833_v30, %v5308_v6  ;;  %v2642_v30 = vrot.slane %v6898_v23, %v5303_v2  ;;  %v3568_v23 = vrot.slane %v6858_v37, %v5308_v6 }
 0x553   : > { %2755 = vrot.lane.b32.xlu0 %v2598_v53, %s5036_s5  ;;  %2665 = vrot.lane.b32.xlu1 %v2578_v62, %s5035_s4  ;;  %v3616_v37 = vrot.slane %v6860_v52, %v5308_v6 }
 0x555   : > { %v7195_v50 = vpop.permute.xlu0 %3627  ;;  %v7197_v27 = vpop.permute.xlu1 %2767 }
 0x556   : > { %8649 = vst [vmem:[#allocation35_spill] sm:$0xff] %v7197_v27 }
 0x557   : > { %2671 = vrot.lane.b32.xlu0 %v2590_v49, %s5035_s4  ;;  %2675 = vrot.lane.b32.xlu1 %v2598_v53, %s5035_s4 }
 0x559   : > { %v7203_v1 = vpop.permute.xlu0 %3707  ;;  %v7205_v21 = vpop.permute.xlu1 %2763 }
 0x55a   : > { %8650 = vst [vmem:[#allocation36_spill] sm:$0xff] %v7205_v21 }
 0x55b   : > { %2693 = vrot.lane.b32.xlu0 %v2634_v26, %s5035_s4  ;;  %2753 = vrot.lane.b32.xlu1 %v2594_v28, %s5036_s5 }
 0x55d   : > { %v7211_v62 = vpop.permute.xlu0 %3631  ;;  %v7213_v27 = vpop.permute.xlu1 %3625 }
 0x55f   : > { %2771 = vrot.lane.b32.xlu0 %v2630_v55, %s5036_s5  ;;  %2751 = vrot.lane.b32.xlu1 %v2590_v49, %s5036_s5 }
 0x561   : > { %v7219_v53 = vpop.permute.xlu0 %3703  ;;  %v7221_v21 = vpop.permute.xlu1 %3705 }
 0x563   : > { %2689 = vrot.lane.b32.xlu0 %v2626_v35, %s5035_s4  ;;  %2691 = vrot.lane.b32.xlu1 %v2630_v55, %s5035_s4 }
 0x565   : > { %v7227_v28 = vpop.permute.xlu0 %3713  ;;  %v7229_v13 = vpop.permute.xlu1 %3623 }
 0x567   : > { %2699 = vrot.lane.b32.xlu0 %v2646_v39, %s5035_s4  ;;  %2773 = vrot.lane.b32.xlu1 %v2634_v26, %s5036_s5 }
 0x569   : > { %v7235_v49 = vpop.permute.xlu0 %3709  ;;  %v7237_v9 = vpop.permute.xlu1 %3633 }
 0x56b   : > { %2777 = vrot.lane.b32.xlu0 %v2642_v30, %s5036_s5  ;;  %2697 = vrot.lane.b32.xlu1 %v2642_v30, %s5035_s4 }
 0x56d   : > { %v7243_v55 = vpop.permute.xlu0 %3649  ;;  %v7245_v12 = vpop.permute.xlu1 %3711 }
 0x56e   : > { %8651 = vst [vmem:[#allocation37_spill] sm:$0xff] %v7243_v55 }
 0x56f   : > { %2695 = vrot.lane.b32.xlu0 %v2638_v7, %s5035_s4  ;;  %2769 = vrot.lane.b32.xlu1 %v2626_v35, %s5036_s5 }
 0x571   : > { %v7251_v26 = vpop.permute.xlu0 %3731  ;;  %v7253_v59 = vpop.permute.xlu1 %3629 }
 0x573   : > { %3637 = vrot.lane.b32.xlu0 %v3564_v4, %s5031_s23  ;;  %2779 = vrot.lane.b32.xlu1 %v2646_v39, %s5036_s5 }
 0x575   : > { %v7259_v30 = vpop.permute.xlu0 %3655  ;;  %v7261_v14 = vpop.permute.xlu1 %3651 }
 0x576   : > { %8652 = vst [vmem:[#allocation38_spill] sm:$0xff] %v7259_v30  ;;  %8653 = vst [vmem:[#allocation39_spill] sm:$0xff] %v7261_v14  ;;  %v3612_v14 = vrot.slane %v6860_v52, %v5303_v2 }
 0x577   : > { %3719 = vrot.lane.b32.xlu0 %v3568_v23, %s5032_s25  ;;  %2775 = vrot.lane.b32.xlu1 %v2638_v7, %s5036_s5 }
 0x579   : > { %v7267_v35 = vpop.permute.xlu0 %3727  ;;  %v7269_v55 = vpop.permute.xlu1 %3729 }
 0x57a   : > { %8654 = vst [vmem:[#allocation40_spill] sm:$0xff] %v7267_v35  ;;  %8655 = vst [vmem:[#allocation41_spill] sm:$0xff] %v7269_v55 }
 0x57b   : > { %3635 = vrot.lane.b32.xlu0 %v3560_v54, %s5031_s23  ;;  %3639 = vrot.lane.b32.xlu1 %v3568_v23, %s5031_s23 }
 0x57d   : > { %v7275_v39 = vpop.permute.xlu0 %3737  ;;  %v7277_v30 = vpop.permute.xlu1 %3647 }
 0x57e   : > { %8656 = vst [vmem:[#allocation42_spill] sm:$0xff] %v7275_v39  ;;  %8657 = vst [vmem:[#allocation43_spill] sm:$0xff] %v7277_v30 }
 0x57f   : > { %3715 = vrot.lane.b32.xlu0 %v3560_v54, %s5032_s25  ;;  %3717 = vrot.lane.b32.xlu1 %v3564_v4, %s5032_s25 }
 0x581   : > { %v7281_v7 = vpop.permute.xlu0 %3148  ;;  %v7283_v35 = vpop.permute.xlu1 %3657 }
 0x582   : > { %8658 = vst [vmem:[#allocation44_spill] sm:$0xff] %v7281_v7  ;;  %8659 = vst [vmem:[#allocation45_spill] sm:$0xff] %v7283_v35  ;;  %v3608_v7 = vrot.slane %v6860_v52, %v5323_v11 }
 0x583   : > { %3661 = vrot.lane.b32.xlu0 %v3612_v14, %s5031_s23  ;;  %3663 = vrot.lane.b32.xlu1 %v3616_v37, %s5031_s23 }
 0x585   : > { %v7291_v23 = vpop.permute.xlu0 %3228  ;;  %v7293_v30 = vpop.permute.xlu1 %3735 }
 0x586   : > { %8660 = vst [vmem:[#allocation46_spill] sm:$0xff] %v7291_v23  ;;  %8661 = vst [vmem:[#allocation47_spill] sm:$0xff] %v7293_v30  ;;  %v3137_v30 = vrot.slane %v6877_v57, %v5308_v6 }
 0x587   : > { %3743 = vrot.lane.b32.xlu0 %v3616_v37, %s5032_s25  ;;  %3741 = vrot.lane.b32.xlu1 %v3612_v14, %s5032_s25  ;;  %v3085_v37 = vrot.slane %v6862_v63, %v5303_v2  ;;  %v3089_v14 = vrot.slane %v6862_v63, %v5308_v6 }
 0x589   : > { %v7297_v54 = vpop.permute.xlu0 %3733  ;;  %v7299_v4 = vpop.permute.xlu1 %3146 }
 0x58a   : > { %8662 = vst [vmem:[#allocation48_spill] sm:$0xff] %v7297_v54  ;;  %8663 = vst [vmem:[#allocation49_spill] sm:$0xff] %v7299_v4  ;;  %v3081_v54 = vrot.slane %v6862_v63, %v5323_v11  ;;  %v3129_v63 = vrot.slane %v6877_v57, %v5323_v11 }
 0x58b   : > { %3739 = vrot.lane.b32.xlu0 %v3608_v7, %s5032_s25  ;;  %3659 = vrot.lane.b32.xlu1 %v3608_v7, %s5031_s23  ;;  %s4634_s23 = scalar_lea.sflag [#allocation6], %s5180_s22  ;;  %s4959_s25 = sshll.u32 %s5041_s24, 4  ;;  %s4960_s25 = int_to_ptr.vmem [resolvable:$false] %s4959_s25 }
 0x58c   : > { %p4962_p4 = scmp.lt.s32.totalorder %s4649_s21, %s4960_s25 }
 0x58d   : > { %v7305_v35 = vpop.permute.xlu0 %3152  ;;  %v7307_v23 = vpop.permute.xlu1 %3226 }
 0x58e   : > { %8664 = vst [vmem:[#allocation50_spill] sm:$0xff] %v7305_v35  ;;  %8665 = vst [vmem:[#allocation51_spill] sm:$0xff] %v7307_v23 }
 0x58f   : > { %3158 = vrot.lane.b32.xlu0 %v3085_v37, %s5033_s27  ;;  %3160 = vrot.lane.b32.xlu1 %v3089_v14, %s5033_s27 }
 0x591   : > { %v7315_v4 = vpop.permute.xlu0 %3224  ;;  %v7317_v52 = vpop.permute.xlu1 %3653 }
 0x592   : > { %8666 = vst [vmem:[#allocation52_spill] sm:$0xff] %v7315_v4  ;;  %8667 = vst [vmem:[#allocation53_spill] sm:$0xff] %v7317_v52 }
 0x593   : > { %3240 = vrot.lane.b32.xlu0 %v3089_v14, %s5034_s28  ;;  %3238 = vrot.lane.b32.xlu1 %v3085_v37, %s5034_s28  ;;  %v3133_v37 = vrot.slane %v6877_v57, %v5303_v2 }
 0x595   : > { %v7321_v7 = vpop.permute.xlu0 %3234  ;;  %v7323_v23 = vpop.permute.xlu1 %3144 }
 0x596   : > { %8668 = vst [vmem:[#allocation54_spill] sm:$0xff] %v7321_v7  ;;  %8669 = vst [vmem:[#allocation55_spill] sm:$0xff] %v7323_v23 }
 0x597   : > { %3156 = vrot.lane.b32.xlu0 %v3081_v54, %s5033_s27  ;;  %3184 = vrot.lane.b32.xlu1 %v3137_v30, %s5033_s27 }
 0x599   : > { %v3231_v4 = vpop.permute.xlu0 %3230  ;;  %v7331_v52 = vpop.permute.xlu1 %3154 }
 0x59a   : > { %8670 = vst [vmem:[#allocation56_spill] sm:$0xff] %v7331_v52 }
 0x59b   : > { %3236 = vrot.lane.b32.xlu0 %v3081_v54, %s5034_s28  ;;  %3262 = vrot.lane.b32.xlu1 %v3133_v37, %s5034_s28 }
 0x59d   : > { %v3171_v14 = vpop.permute.xlu0 %3170  ;;  %v7337_v23 = vpop.permute.xlu1 %3232 }
 0x59e   : > { %8671 = vst [vmem:[#allocation57_spill] sm:$0xff] %v7337_v23  ;;  %v7345_v52 = vsel %vm8672_vm4, %v3231_v4, %v7337_v23  ;;  %vm8680_vm4 = vmmov %vm8674_vm6 }
 0x59f   : > { %3182 = vrot.lane.b32.xlu0 %v3133_v37, %s5033_s27  ;;  %3180 = vrot.lane.b32.xlu1 %v3129_v63, %s5033_s27  ;;  %8673 = vst [vmem:[#allocation58_spill] sm:$0xff] %v7345_v52  ;;  %v2602_v52 = vrot.slane %v6879_v15, %v5323_v11  ;;  %s4961_s27 = scalar_lea.vmem %s4960_s25, 512 }
 0x5a0   : > { %p4963_p6 = scmp.lt.s32.totalorder %s4961_s27, %s4955_s16 }
 0x5a1   : > { %v3253_v7 = vpop.permute.xlu0 %3252  ;;  %v3151_v39 = vpop.permute.xlu1 %3150 }
 0x5a2   : > { %v7349_v54 = vsel %vm8674_vm6, %v3151_v39, %v7305_v35  ;;  %v2610_v35 = vrot.slane %v6879_v15, %v5308_v6  ;;  %vm8682_vm6 = vmmov %vm8680_vm4  ;;  %v2654_v15 = vrot.slane %v6881_v36, %v5303_v2  ;;  %p4964_p8 = por %p4963_p6, %p4962_p4 }
 0x5a3   : > { %8675 = vst [vmem:[#allocation59_spill] sm:$0xff] %v7349_v54  ;;  %3264 = vrot.lane.b32.xlu0 %v3137_v30, %s5034_s28  ;;  %2679 = vrot.lane.b32.xlu1 %v2606_v48, %s5035_s4 }
 0x5a4   : > { %p4965_p12 = pnand %p4964_p8, %p4958_p2 }
 0x5a5   : > { %v3177_v4 = vpop.permute.xlu0 %3176  ;;  %v3173_v39 = vpop.permute.xlu1 %3172 }
 0x5a6   : > { %v7368_v55 = vsel %vm8676_vm13, %v3171_v14, %v3173_v39  ;;  %vm8683_vm13 = vmmov %vm8679_vm0 }
 0x5a7   : > { %3260 = vrot.lane.b32.xlu0 %v3129_v63, %s5034_s28  ;;  %2761 = vrot.lane.b32.xlu1 %v2610_v35, %s5036_s5 }
 0x5a9   : > { %v3249_v23 = vpop.permute.xlu0 %3248  ;;  %v3251_v57 = vpop.permute.xlu1 %3250 }
 0x5aa   : > { %v7371_v37 = vsel %vm8677_vm7, %v3249_v23, %v3251_v57  ;;  %v7374_v30 = vsel %vm8679_vm0, %v3251_v57, %v3253_v7  ;;  %vm8685_vm7 = vmmov %vm8679_vm0 }
 0x5ab   : > { %8678 = vst [vmem:[#allocation60_spill] sm:$0xff] %v7371_v37  ;;  %2681 = vrot.lane.b32.xlu0 %v2610_v35, %s5035_s4  ;;  %2677 = vrot.lane.b32.xlu1 %v2602_v52, %s5035_s4  ;;  %vm8688_vm0 = vmmov %vm8680_vm4 }
 0x5ad   : > { %v3259_v23 = vpop.permute.xlu0 %3258  ;;  %v3169_v7 = vpop.permute.xlu1 %3168 }
 0x5ae   : > { %v7389_v57 = vsel %vm8680_vm4, %v3169_v7, %v3171_v14  ;;  %v2658_v14 = vrot.slane %v6881_v36, %v5308_v6  ;;  %vm8696_vm4 = vcmask 1041409  }
 0x5af   : > { %8681 = vst [vmem:[#allocation61_spill] sm:$0xff] %v7389_v57  ;;  %2759 = vrot.lane.b32.xlu0 %v2606_v48, %s5036_s5  ;;  %2757 = vrot.lane.b32.xlu1 %v2602_v52, %s5036_s5 }
 0x5b1   : > { %v2670_v35 = vpop.permute.xlu0 %2669  ;;  %v3179_v39 = vpop.permute.xlu1 %3178 }
 0x5b2   : > { %v7404_v7 = vsel %vm8682_vm6, %v3177_v4, %v3179_v39  ;;  %vm8697_vm6 = vmmov %vm8696_vm4 }
 0x5b3   : > { %2705 = vrot.lane.b32.xlu0 %v2658_v14, %s5035_s4  ;;  %2703 = vrot.lane.b32.xlu1 %v2654_v15, %s5035_s4 }
 0x5b5   : > { %v2750_v63 = vpop.permute.xlu0 %2749  ;;  %v3257_v37 = vpop.permute.xlu1 %3256 }
 0x5b6   : > { %v7411_v48 = vsel %vm8683_vm13, %v3257_v37, %v3259_v23  ;;  %v2650_v23 = vrot.slane %v6881_v36, %v5323_v11  ;;  %v8686_v36 = vcombine.high %v6924_v60, %v6927_v58  ;;  %vm8698_vm13 = vcmask 1042434   ;;  %v8738_v11 = vld [vmem:[#allocation42_spill] sm:$0xff] }
 0x5b7   : > { %8684 = vst [vmem:[#allocation62_spill] sm:$0xff] %v7411_v48  ;;  %2783 = vrot.lane.b32.xlu0 %v2654_v15, %s5036_s5  ;;  %2785 = vrot.lane.b32.xlu1 %v2658_v14, %s5036_s5 }
 0x5b9   : > { %v3255_v39 = vpop.permute.xlu0 %3254  ;;  %v2668_v2 = vpop.permute.xlu1 %2667 }
 0x5ba   : > { %v7426_v57 = vsel %vm8685_vm7, %v3255_v39, %v3257_v37  ;;  %v2710_v54 = vsel %vm571_vm11, %v2668_v2, %v2670_v35  ;;  %v8687_v37 = vcombine.low %v6930_v34, %v6933_v38  ;;  %v8690_v38 = vcombine.low %v6924_v60, %v6927_v58  ;;  %vm8699_vm7 = vmmov %vm8698_vm13 }
 0x5bb   : > { %2701 = vrot.lane.b32.xlu0 %v2650_v23, %s5035_s4  ;;  %2781 = vrot.lane.b32.xlu1 %v2650_v23, %s5036_s5  ;;  %v8692_v60 = vcombine.high %v6946_v43, %v6955_v29 }
 0x5bd   : > { %v2674_v6 = vpop.permute.xlu0 %2673  ;;  %v2748_v52 = vpop.permute.xlu1 %2747 }
 0x5be   : > { %v2790_v15 = vsel %vm652_vm8, %v2748_v52, %v2750_v63 }
 0x5bf   : > { %v2822_v14 = vsel %vm5468_vm9, %v2710_v54, %v2790_v15  ;;  %v2838_v48 = vsel %vm5757_vm15, %v2790_v15, %v2710_v54  ;;  %3928 = vrot.lane.b32.xlu0 %v8686_v36, %s5037_s6  ;;  %3926 = vrot.lane.b32.xlu1 %v8687_v37, %s5037_s6  ;;  %v8689_v54 = vcombine.low %v6940_v16, %v6943_v45 }
 0x5c0   : > { %v8691_v45 = vcombine.low %v6946_v43, %v6955_v29  ;;  %v2788_v43 = vsel %vm652_vm8, %v7181_v41, %v7147_v42  ;;  %v2881_v29 = vrot.slane %v2822_v14, 7  ;;  %v8695_v42 = vcombine.low %v6968_v25, %v6971_v17 }
 0x5c1   : > { %v2746_v35 = vpop.permute.xlu0 %2745  ;;  %v3175_v63 = vpop.permute.xlu1 %3174 }
 0x5c2   : > { %v2789_v39 = vsel %vm652_vm8, %v2746_v35, %v2748_v52  ;;  %v7446_v23 = vsel %vm8688_vm0, %v3175_v63, %v3177_v4  ;;  %vm8700_vm0 = vmmov %vm8696_vm4 }
 0x5c3   : > { %3447 = vrot.lane.b32.xlu0 %v8689_v54, %s5038_s7  ;;  %3924 = vrot.lane.b32.xlu1 %v8690_v38, %s5037_s6  ;;  %v8693_v54 = vcombine.high %v6968_v25, %v6971_v17 }
 0x5c5   : > { %v2756_v4 = vpop.permute.xlu0 %2755  ;;  %v2666_v52 = vpop.permute.xlu1 %2665 }
 0x5c6   : > { %v2709_v16 = vsel %vm571_vm11, %v2666_v52, %v2668_v2  ;;  %v3008_v52 = vrot.slane %v2838_v48, 7 }
 0x5c7   : > { %3445 = vrot.lane.b32.xlu0 %v8691_v45, %s5038_s7  ;;  %v2821_v36 = vsel %vm5499_vm10, %v2709_v16, %v2789_v39  ;;  %v2837_v37 = vsel %vm5763_vm1, %v2789_v39, %v2709_v16  ;;  %3449 = vrot.lane.b32.xlu1 %v8692_v60, %s5038_s7  ;;  %v8694_v39 = vcombine.low %v6974_v40, %v6977_v31 }
 0x5c8   : > { %v2708_v45 = vsel %vm571_vm11, %v7139_v46, %v7173_v19  ;;  %v2787_v60 = vsel %vm652_vm8, %v7171_v24, %v7181_v41 }
 0x5c9   : > { %v2672_v58 = vpop.permute.xlu0 %2671  ;;  %v2676_v2 = vpop.permute.xlu1 %2675  ;;  %v2820_v48 = vsel %vm5468_vm9, %v2708_v45, %v2788_v43  ;;  %v2836_v19 = vsel %vm5757_vm15, %v2788_v43, %v2708_v45  ;;  %v2707_v43 = vsel %vm571_vm11, %v7155_v61, %v7139_v46 }
 0x5ca   : > { %v2711_v35 = vsel %vm571_vm11, %v2672_v58, %v2674_v6  ;;  %v2712_v63 = vsel %vm571_vm11, %v2674_v6, %v2676_v2  ;;  %v2882_v41 = vsel %vm8696_vm4, %v2881_v29, %v2820_v48  ;;  %v3009_v58 = vsel %vm8697_vm6, %v3008_v52, %v2836_v19  ;;  %vm8701_vm4 = vmmov %vm8700_vm0 }
 0x5cb   : > { %2970 = vrot.lane.b32.xlu0 %v8693_v54, %s5040_s11  ;;  %2968 = vrot.lane.b32.xlu1 %v8694_v39, %s5040_s11  ;;  %v2867_v2 = vrot.slane %v2821_v36, 7  ;;  %v2835_v52 = vsel %vm5763_vm1, %v2787_v60, %v2707_v43  ;;  %vm8702_vm6 = vmmov %vm8699_vm7 }
 0x5cd   : > { %v2694_v38 = vpop.permute.xlu0 %2693  ;;  %v2754_v16 = vpop.permute.xlu1 %2753 }
 0x5ce   : > { %v2792_v6 = vsel %vm652_vm8, %v2754_v16, %v2756_v4 }
 0x5cf   : > { %v2824_v40 = vsel %vm5468_vm9, %v2712_v63, %v2792_v6  ;;  %v2840_v31 = vsel %vm5757_vm15, %v2792_v6, %v2712_v63  ;;  %2966 = vrot.lane.b32.xlu1 %v8695_v42, %s5040_s11  ;;  %v2994_v63 = vrot.slane %v2837_v37, 7  ;;  %v2819_v37 = vsel %vm5499_vm10, %v2707_v43, %v2787_v60 }
 0x5d0   : > { %v2883_v14 = vrot.slane %v2824_v40, 6  ;;  %v3010_v4 = vrot.slane %v2840_v31, 6 }
 0x5d1   : > { %v2772_v24 = vpop.permute.xlu0 %2771  ;;  %v2752_v54 = vpop.permute.xlu1 %2751  ;;  %v2995_v31 = vsel %vm8701_vm4, %v2994_v63, %v2835_v52 }
 0x5d2   : > { %v7512_v39 = vsel %vm8698_vm13, %v2883_v14, %v2882_v41  ;;  %v7515_v25 = vsel %vm8699_vm7, %v3010_v4, %v3009_v58  ;;  %v2791_v17 = vsel %vm652_vm8, %v2752_v54, %v2754_v16  ;;  %v2868_v16 = vsel %vm8700_vm0, %v2867_v2, %v2819_v37  ;;  %vm8704_vm13 = vmmov %vm8702_vm6 }
 0x5d3   : > { %v2823_v29 = vsel %vm5499_vm10, %v2711_v35, %v2791_v17  ;;  %v2839_v36 = vsel %vm5763_vm1, %v2791_v17, %v2711_v35  ;;  %vm8706_vm7 = vcmask 662528   ;;  %vm8707_vm0 = vcmask 646144  }
 0x5d4   : > { %v2869_v6 = vrot.slane %v2823_v29, 6  ;;  %v2996_v45 = vrot.slane %v2839_v36, 6  ;;  %vm8708_vm4 = vmmov %vm8706_vm7 }
 0x5d5   : > { %v2690_v40 = vpop.permute.xlu0 %2689  ;;  %v2692_v46 = vpop.permute.xlu1 %2691  ;;  %vm8728_vm12 = vmmov %vm8707_vm0 }
 0x5d6   : > { %v7532_v61 = vsel %vm8702_vm6, %v2869_v6, %v2868_v16  ;;  %v7535_v42 = vsel %vm8704_vm13, %v2996_v45, %v2995_v31  ;;  %v7538_v35 = vsel %vm571_vm11, %v2690_v40, %v2692_v46  ;;  %v7541_v48 = vsel %vm571_vm11, %v2692_v46, %v2694_v38  ;;  %vm8709_vm6 = vmmov %vm8708_vm4 }
 0x5d7   : > { %8703 = vst [vmem:[#allocation63_spill] sm:$0xff] %v7532_v61  ;;  %8705 = vst [vmem:[#allocation64_spill] sm:$0xff] %v7535_v42  ;;  %v7585_v31 = vsel %vm8706_vm7, %v7221_v21, %v7203_v1  ;;  %v8721_v1 = vld [vmem:[#allocation41_spill] sm:$0xff] }
 0x5d8   : > { %vm8710_vm13 = vmmov %vm8708_vm4 }
 0x5d9   : > { %v2700_v60 = vpop.permute.xlu0 %2699  ;;  %v2774_v19 = vpop.permute.xlu1 %2773  ;;  %vm8712_vm7 = vmmov %vm8708_vm4 }
 0x5da   : > { %v7544_v14 = vsel %vm652_vm8, %v2772_v24, %v2774_v19  ;;  %v7598_v19 = vsel %vm8708_vm4, %v7245_v12, %v7227_v28  ;;  %v7616_v28 = vsel %vm8710_vm13, %v7093_v22, %v7065_v10  ;;  %vm8715_vm13 = vmmov %vm8707_vm0 }
 0x5db   : > { %8711 = vst [vmem:[#allocation65_spill] sm:$0xff] %v7616_v28 }
 0x5dd   : > { %v2778_v58 = vpop.permute.xlu0 %2777  ;;  %v2698_v2 = vpop.permute.xlu1 %2697 }
 0x5de   : > { %v7555_v38 = vsel %vm571_vm11, %v2698_v2, %v2700_v60  ;;  %v7593_v60 = vsel %vm8707_vm0, %v7229_v13, %v7213_v27  ;;  %v7611_v13 = vsel %vm8709_vm6, %v7065_v10, %v7067_v8  ;;  %v7631_v8 = vsel %vm8708_vm4, %v7219_v53, %v7221_v21  ;;  %vm8714_vm6 = vmmov %vm8707_vm0 }
 0x5df   : > { %v7636_v10 = vsel %vm8714_vm6, %v7211_v62, %v7237_v9  ;;  %v3795_v21 = vsel %vm5763_vm1, %v7631_v8, %v7593_v60  ;;  %vm8718_vm4 = vmmov %vm8707_vm0  ;;  %vm8720_vm6 = vcmask 662528  }
 0x5e0   : > { %v3798_v9 = vsel %vm5757_vm15, %v7598_v19, %v7636_v10  ;;  %v7673_v53 = vsel %vm8720_vm6, %v7235_v49, %v7245_v12 }
 0x5e1   : > { %v2696_v63 = vpop.permute.xlu0 %2695  ;;  %v2770_v17 = vpop.permute.xlu1 %2769 }
 0x5e2   : > { %v7558_v54 = vsel %vm571_vm11, %v2696_v63, %v2698_v2  ;;  %v7561_v43 = vsel %vm652_vm8, %v2770_v17, %v2772_v24  ;;  %v7626_v17 = vsel %vm8707_vm0, %v7213_v27, %v7195_v50  ;;  %v7663_v50 = vsel %vm8707_vm0, %v7077_v32, %v7061_v0 }
 0x5e3   : > { %v3796_v27 = vsel %vm5757_vm15, %v7585_v31, %v7626_v17  ;;  %8717 = vst [vmem:[#allocation67_spill] sm:$0xff] %v7663_v50 }
 0x5e4   : > { %v3966_v49 = vrot.slane %v3796_v27, 7  ;;  %v8727_v27 = vld [vmem:[#allocation23_spill] sm:$0xff] }
 0x5e5   : > { %v3638_v37 = vpop.permute.xlu0 %3637  ;;  %v2780_v52 = vpop.permute.xlu1 %2779 }
 0x5e6   : > { %v7572_v6 = vsel %vm652_vm8, %v2778_v58, %v2780_v52  ;;  %v3952_v52 = vrot.slane %v3795_v21, 7  ;;  %v7711_v21 = vsel %vm8728_vm12, %v8727_v27, %v7085_v33  ;;  %vm8735_vm12 = vmmov %vm8707_vm0 }
 0x5e7   : > { %8729 = vst [vmem:[#allocation23_spill] sm:$0xff] %v7711_v21 }
 0x5e9   : > { %v3720_v40 = vpop.permute.xlu0 %3719  ;;  %v2776_v16 = vpop.permute.xlu1 %2775 }
 0x5ea   : > { %v7588_v46 = vsel %vm652_vm8, %v2776_v16, %v2778_v58  ;;  %v7621_v58 = vsel %vm8712_vm7, %v7101_v47, %v7083_v51  ;;  %v7641_v51 = vsel %vm8715_vm13, %v7253_v59, %v7211_v62  ;;  %vm8716_vm7 = vmmov %vm8707_vm0  ;;  %v7668_v62 = vsel %vm8718_vm4, %v7085_v33, %v7075_v20 }
 0x5eb   : > { %8713 = vst [vmem:[#allocation66_spill] sm:$0xff] %v7621_v58  ;;  %v7658_v59 = vsel %vm8716_vm7, %v7061_v0, %v7059_v5  ;;  %8719 = vst [vmem:[#allocation68_spill] sm:$0xff] %v7668_v62  ;;  %v3793_v0 = vsel %vm5763_vm1, %v7616_v28, %v7663_v50  ;;  %v3802_v20 = vsel %vm5757_vm15, %v7621_v58, %v7668_v62  ;;  %v3968_v16 = vrot.slane %v3798_v9, 6  ;;  %v8734_v9 = vld [vmem:[#allocation37_spill] sm:$0xff]  ;;  %v8739_v50 = vld [vmem:[#allocation47_spill] sm:$0xff] }
 0x5ec   : > { %v3794_v5 = vsel %vm5757_vm15, %v7611_v13, %v7658_v59  ;;  %v3797_v32 = vsel %vm5763_vm1, %v7673_v53, %v7641_v51  ;;  %vm8722_vm13 = vmmov %vm8720_vm6  ;;  %v3972_v4 = vrot.slane %v3802_v20, 4  ;;  %v8752_v28 = vld [vmem:[#allocation38_spill] sm:$0xff]  ;;  %v8785_v62 = vld [vmem:[#allocation27_spill] sm:$0xff] }
 0x5ed   : > { %v3636_v63 = vpop.permute.xlu0 %3635  ;;  %v3640_v22 = vpop.permute.xlu1 %3639  ;;  %v7694_v2 = vsel %vm8722_vm13, %v8721_v1, %v7251_v26  ;;  %vm8724_vm7 = vmmov %vm8707_vm0  ;;  %v3954_v26 = vrot.slane %v3797_v32, 6  ;;  %v8787_v58 = vld [vmem:[#allocation57_spill] sm:$0xff] }
 0x5ee   : > { %8723 = vst [vmem:[#allocation41_spill] sm:$0xff] %v7694_v2  ;;  %v7697_v24 = vsel %vm8724_vm7, %v3636_v63, %v3638_v37  ;;  %v7700_v36 = vsel %vm8707_vm0, %v3638_v37, %v3640_v22  ;;  %vm8725_vm4 = vmmov %vm8720_vm6  ;;  %v8730_v22 = vld [vmem:[#allocation21_spill] sm:$0xff]  ;;  %vm8737_vm7 = vcmask 1041409  }
 0x5ef   : > { %vm8726_vm6 = vmmov %vm8725_vm4  ;;  %v3967_v34 = vsel %vm8737_vm7, %v3966_v49, %v3794_v5  ;;  %v8744_v49 = vld [vmem:[#allocation43_spill] sm:$0xff] }
 0x5f0   : > { %vm8731_vm13 = vmmov %vm8725_vm4 }
 0x5f1   : > { %v3716_v12 = vpop.permute.xlu0 %3715  ;;  %v3718_v45 = vpop.permute.xlu1 %3717  ;;  %vm8740_vm0 = vmmov %vm8725_vm4 }
 0x5f2   : > { %v7703_v29 = vsel %vm8725_vm4, %v3716_v12, %v3718_v45  ;;  %v7706_v41 = vsel %vm8726_vm6, %v3718_v45, %v3720_v40  ;;  %v7724_v45 = vsel %vm8731_vm13, %v8730_v22, %v7101_v47  ;;  %v8733_v40 = vld [vmem:[#allocation39_spill] sm:$0xff]  ;;  %v7739_v47 = vsel %vm8740_vm0, %v8739_v50, %v8738_v11  ;;  %vm8742_vm4 = vmmov %vm8737_vm7  ;;  %v8748_v11 = vld [vmem:[#allocation40_spill] sm:$0xff] }
 0x5f3   : > { %v3799_v63 = vsel %vm5763_vm1, %v7703_v29, %v7697_v24  ;;  %v3800_v37 = vsel %vm5757_vm15, %v7706_v41, %v7700_v36  ;;  %8732 = vst [vmem:[#allocation21_spill] sm:$0xff] %v7724_v45  ;;  %v7729_v33 = vsel %vm8735_vm12, %v8734_v9, %v8733_v40  ;;  %8741 = vst [vmem:[#allocation37_spill] sm:$0xff] %v7739_v47  ;;  %vm8743_vm6 = vcmask 1042434  }
 0x5f4   : > { %8736 = vst [vmem:[#allocation39_spill] sm:$0xff] %v7729_v33  ;;  %v3956_v32 = vrot.slane %v3799_v63, 5  ;;  %v3970_v12 = vrot.slane %v3800_v37, 5  ;;  %v3804_v15 = vsel %vm5757_vm15, %v7694_v2, %v7729_v33  ;;  %v3801_v63 = vsel %vm5763_vm1, %v7724_v45, %v7711_v21  ;;  %vm8745_vm13 = vmmov %vm8735_vm12  ;;  %v8751_v2 = vld [vmem:[#allocation45_spill] sm:$0xff]  ;;  %v8784_v45 = vld [vmem:[#allocation15_spill] sm:$0xff] }
 0x5f5   : > { %v3662_v27 = vpop.permute.xlu0 %3661  ;;  %v3664_v22 = vpop.permute.xlu1 %3663  ;;  %v3953_v20 = vsel %vm8742_vm4, %v3952_v52, %v3793_v0  ;;  %v3969_v5 = vsel %vm8743_vm6, %v3968_v16, %v3967_v34  ;;  %v7750_v37 = vsel %vm8745_vm13, %v8744_v49, %v8734_v9  ;;  %vm8747_vm12 = vmmov %vm8743_vm6  ;;  %vm8755_vm4 = vcmask 1043459   ;;  %v8761_v49 = vld [vmem:[#allocation22_spill] sm:$0xff] }
 0x5f6   : > { %8746 = vst [vmem:[#allocation42_spill] sm:$0xff] %v7750_v37  ;;  %v3955_v40 = vsel %vm8747_vm12, %v3954_v26, %v3953_v20  ;;  %vm8749_vm7 = vmmov %vm8740_vm0  ;;  %v3971_v0 = vsel %vm8755_vm4, %v3970_v12, %v3969_v5  ;;  %v3974_v34 = vrot.slane %v3804_v15, 3  ;;  %v8757_v20 = vld [vmem:[#allocation53_spill] sm:$0xff]  ;;  %v8760_v5 = vld [vmem:[#allocation24_spill] sm:$0xff]  ;;  %vm8762_vm12 = vcmask 793600  }
 0x5f7   : > { %v7756_v33 = vsel %vm8749_vm7, %v8748_v11, %v8721_v1  ;;  %vm8753_vm0 = vmmov %vm8745_vm13  ;;  %v3973_v9 = vsel %vm743_vm5, %v3972_v4, %v3971_v0  ;;  %v3958_v1 = vrot.slane %v3801_v63, 4  ;;  %v7782_v11 = vsel %vm8762_vm12, %v8761_v49, %v8760_v5  ;;  %v8767_v0 = vld [vmem:[#allocation48_spill] sm:$0xff] }
 0x5f8   : > { %8750 = vst [vmem:[#allocation47_spill] sm:$0xff] %v7756_v33  ;;  %v7761_v21 = vsel %vm8753_vm0, %v8752_v28, %v8751_v2  ;;  %vm8756_vm6 = vmmov %vm8755_vm4  ;;  %v3803_v2 = vsel %vm5763_vm1, %v7756_v33, %v7750_v37  ;;  %v3975_v63 = vsel %vm746_vm3, %v3974_v34, %v3973_v9  ;;  %v8780_v37 = vld [vmem:[#allocation51_spill] sm:$0xff] }
 0x5f9   : > { %8754 = vst [vmem:[#allocation43_spill] sm:$0xff] %v7761_v21  ;;  %v3806_v52 = vsel %vm5757_vm15, %v7739_v47, %v7761_v21  ;;  %v3957_v16 = vsel %vm8756_vm6, %v3956_v32, %v3955_v40  ;;  %v3744_v26 = vpop.permute.xlu0 %3743  ;;  %vm8758_vm13 = vmmov %vm8753_vm0  ;;  %v3742_v12 = vpop.permute.xlu1 %3741  ;;  %v8771_v21 = vld [vmem:[#allocation16_spill] sm:$0xff]  ;;  %vm8772_vm6 = vcmask 777216   ;;  %v3960_v47 = vrot.slane %v3803_v2, 3 }
 0x5fa   : > { %v7777_v15 = vsel %vm8758_vm13, %v8757_v20, %v8752_v28  ;;  %vm8763_vm7 = vmmov %vm8753_vm0  ;;  %vm8765_vm0 = vcmask 662528   ;;  %v3976_v40 = vrot.slane %v3806_v52, 2  ;;  %v3959_v5 = vsel %vm743_vm5, %v3958_v1, %v3957_v16 }
 0x5fb   : > { %8759 = vst [vmem:[#allocation40_spill] sm:$0xff] %v7777_v15  ;;  %v7785_v32 = vsel %vm8763_vm7, %v3662_v27, %v3664_v22  ;;  %v7788_v4 = vsel %vm8765_vm0, %v3742_v12, %v3744_v26  ;;  %vm8768_vm4 = vmmov %vm8765_vm0  ;;  %v8770_v22 = vld [vmem:[#allocation20_spill] sm:$0xff]  ;;  %vm8778_vm7 = vcmask 1046534   ;;  %v3961_v33 = vsel %vm746_vm3, %v3960_v47, %v3959_v5 }
 0x5fc   : > { %8764 = vst [vmem:[#allocation45_spill] sm:$0xff] %v7785_v32  ;;  %8766 = vst [vmem:[#allocation38_spill] sm:$0xff] %v7788_v4  ;;  %v7794_v28 = vsel %vm8768_vm4, %v8767_v0, %v8739_v50  ;;  %v3808_v20 = vsel %vm5757_vm15, %v7788_v4, %v7785_v32  ;;  %v3187_v26 = vsel %vm8772_vm6, %v8771_v21, %v8770_v22  ;;  %v8773_v0 = vld [vmem:[#allocation17_spill] sm:$0xff]  ;;  %v8779_v4 = vld [vmem:[#allocation46_spill] sm:$0xff]  ;;  %vm8782_vm4 = vcmask 646144  }
 0x5fd   : > { %8769 = vst [vmem:[#allocation53_spill] sm:$0xff] %v7794_v28  ;;  %v3805_v34 = vsel %vm5763_vm1, %v7794_v28, %v7777_v15  ;;  %v3740_v52 = vpop.permute.xlu0 %3739  ;;  %v3978_v50 = vrot.slane %v3808_v20, 1  ;;  %v3299_v9 = vsel %vm5468_vm9, %v3187_v26, %v7782_v11  ;;  %v8774_v32 = vld [vmem:[#allocation29_spill] sm:$0xff]  ;;  %vm8775_vm13 = vmmov %vm8762_vm12  ;;  %v3660_v22 = vpop.permute.xlu1 %3659  ;;  %v3977_v2 = vsel %vm8778_vm7, %v3976_v40, %v3975_v63  ;;  %v8789_v40 = vld [vmem:[#allocation44_spill] sm:$0xff] }
 0x5fe   : > { %v3275_v16 = vsel %vm8775_vm13, %v8774_v32, %v8773_v0  ;;  %vm8776_vm12 = vmmov %vm8765_vm0  ;;  %v7822_v20 = vsel %vm8782_vm4, %v3660_v22, %v3662_v27  ;;  %v3195_v0 = vsel %vm8772_vm6, %v8785_v62, %v8784_v45  ;;  %v3315_v27 = vsel %vm5757_vm15, %v7782_v11, %v3187_v26  ;;  %v8790_v45 = vld [vmem:[#allocation49_spill] sm:$0xff] }
 0x5ff   : > { %v7815_v1 = vsel %vm8776_vm12, %v3740_v52, %v3742_v12  ;;  %vm8781_vm0 = vmmov %vm8775_vm13  ;;  %8783 = vst [vmem:[#allocation22_spill] sm:$0xff] %v7822_v20  ;;  %v3979_v28 = vsel %vm752_vm2, %v3978_v50, %v3977_v2  ;;  %v3962_v12 = vrot.slane %v3805_v34, 2  ;;  %v8786_v52 = vld [vmem:[#allocation54_spill] sm:$0xff]  ;;  %v3307_v47 = vsel %vm5468_vm9, %v3195_v0, %v3275_v16 }
 0x600   : > { %8777 = vst [vmem:[#allocation24_spill] sm:$0xff] %v7815_v1  ;;  %v3269_v15 = vsel %vm8781_vm0, %v8780_v37, %v8779_v4  ;;  %vm8788_vm13 = vmmov %vm8781_vm0  ;;  %v3807_v4 = vsel %vm5763_vm1, %v7815_v1, %v7822_v20  ;;  %4020 = vmatprep.subr.mxu1 %v3979_v28  ;;  %v8792_v28 = vld [vmem:[#allocation56_spill] sm:$0xff]  ;;  %v8793_v2 = vld [vmem:[#allocation50_spill] sm:$0xff]  ;;  %vm8795_vm0 = vcmask 1046534   ;;  %v3323_v20 = vsel %vm5757_vm15, %v3275_v16, %v3195_v0 }
 0x601   : > { %v3271_v63 = vsel %vm8788_vm13, %v8787_v58, %v8786_v52  ;;  %vm8791_vm12 = vmmov %vm8772_vm6  ;;  %v3964_v34 = vrot.slane %v3807_v4, 1  ;;  %v3159_v50 = vpop.permute.xlu0 %3158  ;;  %v3161_v11 = vpop.permute.xlu1 %3160  ;;  %v3963_v26 = vsel %vm8795_vm0, %v3962_v12, %v3961_v33  ;;  %v8800_v33 = vld [vmem:[#allocation25_spill] sm:$0xff]  ;;  %v8802_v0 = vld [vmem:[#allocation55_spill] sm:$0xff]  ;;  %v3493_v42 = vrot.slane %v3323_v20, 4 }
 0x602   : > { %v3189_v5 = vsel %vm8791_vm12, %v8790_v45, %v8789_v40  ;;  %vm8794_vm7 = vmmov %vm8772_vm6 }
 0x603   : > { %v3301_v58 = vsel %vm5468_vm9, %v3189_v5, %v3269_v15  ;;  %v3317_v22 = vsel %vm5757_vm15, %v3269_v15, %v3189_v5  ;;  %v3191_v52 = vsel %vm8794_vm7, %v8793_v2, %v8792_v28  ;;  %v3965_v1 = vsel %vm752_vm2, %v3964_v34, %v3963_v26  ;;  %v8796_v15 = vld [vmem:[#allocation26_spill] sm:$0xff]  ;;  %vm8797_vm4 = vmmov %vm8772_vm6  ;;  %v8798_v28 = vld [vmem:[#allocation28_spill] sm:$0xff] }
 0x604   : > { %v3303_v4 = vsel %vm5468_vm9, %v3191_v52, %v3271_v63  ;;  %v3319_v40 = vsel %vm5757_vm15, %v3271_v63, %v3191_v52  ;;  %v3186_v5 = vsel %vm8797_vm4, %v8796_v15, %v8771_v21  ;;  %vm8799_vm6 = vmmov %vm8788_vm13  ;;  %4021 = vmatpush1.msra.mxu1 %v3965_v1  ;;  %v3366_v63 = vrot.slane %v3307_v47, 4  ;;  %v8804_v34 = vld [vmem:[#allocation31_spill] sm:$0xff] }
 0x605   : > { %v3266_v2 = vsel %vm8799_vm6, %v8798_v28, %v8761_v49  ;;  %vm8801_vm13 = vmmov %vm8799_vm6  ;;  %v3360_v26 = vrot.slane %v3301_v58, 7  ;;  %v3487_v21 = vrot.slane %v3317_v22, 7  ;;  %v3241_v15 = vpop.permute.xlu0 %3240  ;;  %v8806_v49 = vld [vmem:[#allocation52_spill] sm:$0xff]  ;;  %v3362_v61 = vrot.slane %v3303_v4, 6 }
 0x606   : > { %v3274_v16 = vsel %vm8801_vm13, %v8800_v33, %v8774_v32  ;;  %vm8803_vm12 = vmmov %vm8797_vm4  ;;  %v3489_v32 = vrot.slane %v3319_v40, 6  ;;  %v3239_v33 = vpop.permute.xlu1 %3238  ;;  %v3193_v47 = vsel %vm8797_vm4, %v3159_v50, %v3161_v11  ;;  %vm8809_vm13 = vcmask 1041409  }
 0x607   : > { %v3188_v12 = vsel %vm8803_vm12, %v8802_v0, %v8790_v45  ;;  %vm8805_vm7 = vmmov %vm8797_vm4  ;;  %v3361_v4 = vsel %vm8809_vm13, %v3360_v26, %v3299_v9  ;;  %v8814_v9 = vsel %vm5757_vm15, %v7374_v30, %v7368_v55  ;;  %vm8815_vm4 = vcmask 1043459  }
 0x608   : > { %v3194_v52 = vsel %vm8805_vm7, %v8804_v34, %v8785_v62  ;;  %vm8807_vm0 = vmmov %vm8799_vm6  ;;  %vm8811_vm7 = vcmask 1042434  }
 0x609   : > { %v3268_v28 = vsel %vm8807_vm0, %v8806_v49, %v8780_v37  ;;  %vm8808_vm6 = vmmov %vm8807_vm0  ;;  %v3306_v20 = vsel %vm5499_vm10, %v3194_v52, %v3274_v16  ;;  %v3322_v58 = vsel %vm5763_vm1, %v3274_v16, %v3194_v52  ;;  %v3363_v49 = vsel %vm8811_vm7, %v3362_v61, %v3361_v4 }
 0x60a   : > { %v3300_v45 = vsel %vm5499_vm10, %v3188_v12, %v3268_v28  ;;  %v3316_v1 = vsel %vm5763_vm1, %v3268_v28, %v3188_v12  ;;  %v3273_v62 = vsel %vm8808_vm6, %v3239_v33, %v3241_v15  ;;  %vm8810_vm12 = vmmov %vm8809_vm13  ;;  %v3157_v12 = vpop.permute.xlu0 %3156  ;;  %v7895_v16 = vpop.permute.xlu1 %3184  ;;  %v8813_v52 = vsel %vm5468_vm9, %v7368_v55, %v7374_v30  ;;  %v8820_v30 = vld [vmem:[#allocation59_spill] sm:$0xff] }
 0x60b   : > { %v3305_v37 = vsel %vm5468_vm9, %v3193_v47, %v3273_v62  ;;  %v3321_v22 = vsel %vm5757_vm15, %v3273_v62, %v3193_v47  ;;  %v3488_v40 = vsel %vm8810_vm12, %v3487_v21, %v3315_v27  ;;  %v3346_v34 = vrot.slane %v3300_v45, 7  ;;  %vm8812_vm0 = vmmov %vm8811_vm7  ;;  %v8817_v21 = vld [vmem:[#allocation62_spill] sm:$0xff] }
 0x60c   : > { %v3364_v0 = vrot.slane %v3305_v37, 5  ;;  %v3491_v11 = vrot.slane %v3321_v22, 5  ;;  %v3473_v15 = vrot.slane %v3316_v1, 7  ;;  %v3490_v28 = vsel %vm8812_vm0, %v3489_v32, %v3488_v40  ;;  %vm8816_vm6 = vmmov %vm8815_vm4  ;;  %v8821_v22 = vld [vmem:[#allocation58_spill] sm:$0xff] }
 0x60d   : > { %v3368_v47 = vrot.slane %v8813_v52, 3  ;;  %v3495_v27 = vrot.slane %v8814_v9, 3  ;;  %v8818_v32 = vsel %vm5468_vm9, %v7404_v7, %v8817_v21  ;;  %v8819_v1 = vsel %vm5757_vm15, %v8817_v21, %v7404_v7 }
 0x60e   : > { %v3365_v26 = vsel %vm8815_vm4, %v3364_v0, %v3363_v49  ;;  %v3492_v61 = vsel %vm8816_vm6, %v3491_v11, %v3490_v28  ;;  %v3370_v45 = vrot.slane %v8818_v32, 2  ;;  %v3497_v62 = vrot.slane %v8819_v1, 2  ;;  %v3237_v49 = vpop.permute.xlu0 %3236  ;;  %v7935_v52 = vpop.permute.xlu1 %3262 }
 0x60f   : > { %v3494_v37 = vsel %vm743_vm5, %v3493_v42, %v3492_v61  ;;  %v3367_v55 = vsel %vm743_vm5, %v3366_v63, %v3365_v26  ;;  %v8822_v4 = vsel %vm5499_vm10, %v8820_v30, %v8821_v22  ;;  %v8823_v0 = vsel %vm5763_vm1, %v8821_v22, %v8820_v30 }
 0x610   : > { %v3348_v40 = vrot.slane %v8822_v4, 6  ;;  %v3475_v11 = vrot.slane %v8823_v0, 6  ;;  %v3496_v7 = vsel %vm746_vm3, %v3495_v27, %v3494_v37  ;;  %v3369_v28 = vsel %vm746_vm3, %v3368_v47, %v3367_v55 }
 0x611   : > { %vm8824_vm13 = vcmask 777216   ;;  %vm8825_vm12 = vcmask 793600   ;;  %vm8826_vm7 = vcmask 1046534   ;;  %v3298_v61 = vsel %vm5499_vm10, %v3186_v5, %v3266_v2 }
 0x612   : > { %v3192_v42 = vsel %vm8824_vm13, %v3157_v12, %v3159_v50  ;;  %v3272_v63 = vsel %vm8825_vm12, %v3237_v49, %v3239_v33  ;;  %v7938_v9 = vsel %vm8826_vm7, %v3497_v62, %v3496_v7  ;;  %vm8827_vm0 = vmmov %vm8826_vm7  ;;  %v3314_v27 = vsel %vm5763_vm1, %v3266_v2, %v3186_v5  ;;  %v7955_v55 = vpop.permute.xlu0 %3182  ;;  %v8832_v5 = vld [vmem:[#allocation61_spill] sm:$0xff]  ;;  %v8833_v2 = vld [vmem:[#allocation60_spill] sm:$0xff]  ;;  %v7969_v4 = vpop.permute.xlu1 %3180 }
 0x613   : > { %v7941_v26 = vsel %vm8827_vm0, %v3370_v45, %v3369_v28  ;;  %v3304_v47 = vsel %vm5499_vm10, %v3192_v42, %v3272_v63  ;;  %v3320_v50 = vsel %vm5763_vm1, %v3272_v63, %v3192_v42  ;;  %vm8828_vm4 = vcmask 1041409  }
 0x614   : > { %v3347_v33 = vsel %vm8828_vm4, %v3346_v34, %v3298_v61  ;;  %vm8829_vm6 = vmmov %vm8828_vm4  ;;  %v3350_v21 = vrot.slane %v3304_v47, 5  ;;  %v3477_v32 = vrot.slane %v3320_v50, 5  ;;  %v3352_v45 = vrot.slane %v3306_v20, 4 }
 0x615   : > { %v3474_v12 = vsel %vm8829_vm6, %v3473_v15, %v3314_v27  ;;  %v3479_v1 = vrot.slane %v3322_v58, 4  ;;  %vm8830_vm13 = vcmask 1042434   ;;  %v8834_v30 = vsel %vm5499_vm10, %v8832_v5, %v8833_v2 }
 0x616   : > { %v3349_v62 = vsel %vm8830_vm13, %v3348_v40, %v3347_v33  ;;  %vm8831_vm12 = vmmov %vm8830_vm13  ;;  %v3354_v22 = vrot.slane %v8834_v30, 3  ;;  %v8835_v34 = vsel %vm5763_vm1, %v8833_v2, %v8832_v5  ;;  %vm8836_vm7 = vcmask 1043459   ;;  %v7985_v61 = vpop.permute.xlu0 %3264  ;;  %v2680_v50 = vpop.permute.xlu1 %2679  ;;  %v8842_v33 = vld [vmem:[#allocation35_spill] sm:$0xff]  ;;  %v8847_v5 = vld [vmem:[#allocation34_spill] sm:$0xff] }
 0x617   : > { %v3476_v37 = vsel %vm8831_vm12, %v3475_v11, %v3474_v12  ;;  %v3481_v15 = vrot.slane %v8835_v34, 3  ;;  %v3351_v20 = vsel %vm8836_vm7, %v3350_v21, %v3349_v62  ;;  %vm8837_vm0 = vmmov %vm8836_vm7  ;;  %v8838_v40 = vsel %vm5499_vm10, %v7446_v23, %v7426_v57  ;;  %v8844_v12 = vld [vmem:[#allocation36_spill] sm:$0xff]  ;;  %v8846_v62 = vld [vmem:[#allocation33_spill] sm:$0xff] }
 0x618   : > { %v3478_v58 = vsel %vm8837_vm0, %v3477_v32, %v3476_v37  ;;  %v3356_v0 = vrot.slane %v8838_v40, 2  ;;  %v8839_v11 = vsel %vm5763_vm1, %v7426_v57, %v7446_v23  ;;  %v3353_v28 = vsel %vm743_vm5, %v3352_v45, %v3351_v20  ;;  %v8843_v57 = vld [vmem:[#allocation32_spill] sm:$0xff]  ;;  %vm8856_vm13 = vmmov %vm8837_vm0 }
 0x619   : > { %v3483_v49 = vrot.slane %v8839_v11, 2  ;;  %v3480_v7 = vsel %vm743_vm5, %v3479_v1, %v3478_v58  ;;  %v3355_v63 = vsel %vm746_vm3, %v3354_v22, %v3353_v28  ;;  %vm8840_vm4 = vcmask 1046534   ;;  %v8845_v1 = vld [vmem:[#allocation30_spill] sm:$0xff]  ;;  %vm8857_vm12 = vmmov %vm8837_vm0 }
 0x61a   : > { %v3482_v42 = vsel %vm746_vm3, %v3481_v15, %v3480_v7  ;;  %vm8841_vm6 = vmmov %vm8840_vm4  ;;  %v2796_v23 = vsel %vm652_vm8, %v8843_v57, %v8842_v33  ;;  %v2795_v21 = vsel %vm652_vm8, %v8844_v12, %v8843_v57  ;;  %v7999_v32 = vpop.permute.xlu0 %3260  ;;  %v2762_v45 = vpop.permute.xlu1 %2761  ;;  %v2715_v37 = vsel %vm571_vm11, %v8846_v62, %v8845_v1 }
 0x61b   : > { %v7988_v27 = vsel %vm8840_vm4, %v3483_v49, %v3482_v42  ;;  %v7991_v47 = vsel %vm8841_vm6, %v3356_v0, %v3355_v63  ;;  %v2716_v2 = vsel %vm571_vm11, %v8845_v1, %v8847_v5  ;;  %v2827_v34 = vsel %vm5499_vm10, %v2715_v37, %v2795_v21  ;;  %vm8859_vm7 = vmmov %vm8837_vm0 }
 0x61c   : > { %v2828_v30 = vsel %vm5468_vm9, %v2716_v2, %v2796_v23  ;;  %v2844_v22 = vsel %vm5757_vm15, %v2796_v23, %v2716_v2  ;;  %v2843_v15 = vsel %vm5763_vm1, %v2795_v21, %v2715_v37  ;;  %v3780_v20 = vsel %vm5468_vm9, %v7626_v17, %v7585_v31  ;;  %vm8861_vm6 = vmmov %vm8840_vm4 }
 0x61d   : > { %v3779_v58 = vsel %vm5499_vm10, %v7593_v60, %v7631_v8  ;;  %v3782_v40 = vsel %vm5468_vm9, %v7636_v10, %v7598_v19  ;;  %v3778_v11 = vsel %vm5468_vm9, %v7658_v59, %v7611_v13  ;;  %v2887_v7 = vrot.slane %v2828_v30, 4 }
 0x61e   : > { %v2682_v0 = vpop.permute.xlu0 %2681  ;;  %v2678_v49 = vpop.permute.xlu1 %2677  ;;  %v3014_v28 = vrot.slane %v2844_v22, 4  ;;  %v2873_v31 = vrot.slane %v2827_v34, 4  ;;  %v3000_v17 = vrot.slane %v2843_v15, 4  ;;  %v3839_v42 = vrot.slane %v3780_v20, 7 }
 0x61f   : > { %v3825_v63 = vrot.slane %v3779_v58, 7  ;;  %v3841_v33 = vrot.slane %v3782_v40, 6  ;;  %v3781_v60 = vsel %vm5499_vm10, %v7641_v51, %v7673_v53  ;;  %v8848_v19 = vsel %vm5468_vm9, %v7541_v48, %v7544_v14 }
 0x620   : > { %v2889_v8 = vrot.slane %v8848_v19, 3  ;;  %v8849_v13 = vsel %vm5757_vm15, %v7544_v14, %v7541_v48  ;;  %v8850_v59 = vsel %vm5499_vm10, %v7538_v35, %v7561_v43  ;;  %v8851_v51 = vsel %vm5763_vm1, %v7561_v43, %v7538_v35 }
 0x621   : > { %v3016_v10 = vrot.slane %v8849_v13, 3  ;;  %v2875_v57 = vrot.slane %v8850_v59, 3  ;;  %v3002_v53 = vrot.slane %v8851_v51, 3  ;;  %v8852_v12 = vsel %vm5468_vm9, %v7555_v38, %v7572_v6  ;;  %v8858_v59 = vld [vmem:[#allocation63_spill] sm:$0xff] }
 0x622   : > { %v2760_v23 = vpop.permute.xlu0 %2759  ;;  %v2891_v48 = vrot.slane %v8852_v12, 2  ;;  %v3784_v14 = vsel %vm5468_vm9, %v7700_v36, %v7706_v41  ;;  %v2714_v21 = vsel %vm571_vm11, %v2680_v50, %v2682_v0  ;;  %v2758_v62 = vpop.permute.xlu1 %2757  ;;  %v2713_v35 = vsel %vm571_vm11, %v2678_v49, %v2680_v50 }
 0x623   : > { %v2794_v1 = vsel %vm652_vm8, %v2760_v23, %v2762_v45  ;;  %v2793_v5 = vsel %vm652_vm8, %v2758_v62, %v2760_v23  ;;  %v8853_v50 = vsel %vm5757_vm15, %v7572_v6, %v7555_v38  ;;  %v8854_v22 = vsel %vm5499_vm10, %v7558_v54, %v7588_v46  ;;  %v8860_v23 = vld [vmem:[#allocation64_spill] sm:$0xff] }
 0x624   : > { %v2826_v43 = vsel %vm5468_vm9, %v2714_v21, %v2794_v1  ;;  %v2842_v37 = vsel %vm5757_vm15, %v2794_v1, %v2714_v21  ;;  %v2825_v41 = vsel %vm5499_vm10, %v2713_v35, %v2793_v5  ;;  %v2841_v36 = vsel %vm5763_vm1, %v2793_v5, %v2713_v35 }
 0x625   : > { %v2885_v2 = vrot.slane %v2826_v43, 5  ;;  %v3012_v30 = vrot.slane %v2842_v37, 5  ;;  %v3018_v45 = vrot.slane %v8853_v50, 2  ;;  %v2877_v34 = vrot.slane %v8854_v22, 2  ;;  %v8865_v43 = vld [vmem:[#allocation68_spill] sm:$0xff]  ;;  %v8873_v50 = vld [vmem:[#allocation41_spill] sm:$0xff] }
 0x626   : > { %v2871_v15 = vrot.slane %v2825_v41, 5  ;;  %v2998_v20 = vrot.slane %v2841_v36, 5  ;;  %v8086_v58 = vpop.permute.xlu0 %2705  ;;  %v8855_v40 = vsel %vm5763_vm1, %v7588_v46, %v7558_v54  ;;  %v3783_v38 = vsel %vm5499_vm10, %v7697_v24, %v7703_v29  ;;  %v8101_v19 = vpop.permute.xlu1 %2703 }
 0x627   : > { %v3004_v0 = vrot.slane %v8855_v40, 2  ;;  %v2886_v6 = vsel %vm8856_vm13, %v2885_v2, %v7512_v39  ;;  %v3013_v49 = vsel %vm8857_vm12, %v3012_v30, %v7515_v25  ;;  %v3843_v13 = vrot.slane %v3784_v14, 5  ;;  %vm8862_vm13 = vmmov %vm8840_vm4  ;;  %v8871_v30 = vld [vmem:[#allocation23_spill] sm:$0xff] }
 0x628   : > { %v2872_v51 = vsel %vm8859_vm7, %v2871_v15, %v8858_v59  ;;  %v2999_v54 = vsel %vm8837_vm0, %v2998_v20, %v8860_v23  ;;  %v3015_v46 = vsel %vm743_vm5, %v3014_v28, %v3013_v49  ;;  %v2888_v39 = vsel %vm743_vm5, %v2887_v7, %v2886_v6  ;;  %vm8863_vm12 = vmmov %vm8840_vm4  ;;  %v8877_v20 = vld [vmem:[#allocation47_spill] sm:$0xff] }
 0x629   : > { %v3017_v12 = vsel %vm746_vm3, %v3016_v10, %v3015_v46  ;;  %v3001_v29 = vsel %vm743_vm5, %v3000_v17, %v2999_v54  ;;  %v2874_v24 = vsel %vm743_vm5, %v2873_v31, %v2872_v51  ;;  %v2890_v1 = vsel %vm746_vm3, %v2889_v8, %v2888_v39  ;;  %v8864_v31 = vld [vmem:[#allocation66_spill] sm:$0xff]  ;;  %v8881_v51 = vld [vmem:[#allocation37_spill] sm:$0xff]  ;;  %v8882_v23 = vld [vmem:[#allocation43_spill] sm:$0xff] }
 0x62a   : > { %v2784_v25 = vpop.permute.xlu0 %2783  ;;  %v8113_v21 = vsel %vm8840_vm4, %v3018_v45, %v3017_v12  ;;  %v3003_v14 = vsel %vm746_vm3, %v3002_v53, %v3001_v29  ;;  %v2876_v62 = vsel %vm746_vm3, %v2875_v57, %v2874_v24  ;;  %v3827_v35 = vrot.slane %v3781_v60, 6  ;;  %v2786_v28 = vpop.permute.xlu1 %2785  ;;  %v8867_v57 = vld [vmem:[#allocation65_spill] sm:$0xff]  ;;  %v8868_v60 = vld [vmem:[#allocation67_spill] sm:$0xff]  ;;  %v8883_v46 = vld [vmem:[#allocation38_spill] sm:$0xff] }
 0x62b   : > { %v8119_v10 = vsel %vm8861_vm6, %v3004_v0, %v3003_v14  ;;  %v8122_v17 = vsel %vm8862_vm13, %v2891_v48, %v2890_v1  ;;  %v8125_v7 = vsel %vm8863_vm12, %v2877_v34, %v2876_v62  ;;  %v3786_v53 = vsel %vm5468_vm9, %v8865_v43, %v8864_v31  ;;  %v8870_v48 = vld [vmem:[#allocation21_spill] sm:$0xff]  ;;  %v8874_v45 = vld [vmem:[#allocation39_spill] sm:$0xff]  ;;  %v8888_v62 = vld [vmem:[#allocation24_spill] sm:$0xff] }
 0x62c   : > { %vm8866_vm7 = vcmask 1041409   ;;  %v3829_v37 = vrot.slane %v3783_v38, 5  ;;  %v3777_v5 = vsel %vm5499_vm10, %v8868_v60, %v8867_v57  ;;  %vm8869_vm0 = vcmask 1042434   ;;  %v8884_v12 = vld [vmem:[#allocation45_spill] sm:$0xff] }
 0x62d   : > { %v3840_v8 = vsel %vm8866_vm7, %v3839_v42, %v3778_v11  ;;  %v3785_v41 = vsel %vm5499_vm10, %v8871_v30, %v8870_v48  ;;  %vm8872_vm4 = vmmov %vm8866_vm7  ;;  %v3788_v11 = vsel %vm5468_vm9, %v8874_v45, %v8873_v50  ;;  %vm8875_vm6 = vcmask 1043459   ;;  %v8886_v14 = vld [vmem:[#allocation53_spill] sm:$0xff] }
 0x62e   : > { %v3842_v2 = vsel %vm8869_vm0, %v3841_v33, %v3840_v8  ;;  %v3826_v36 = vsel %vm8872_vm4, %v3825_v63, %v3777_v5  ;;  %v2702_v22 = vpop.permute.xlu0 %2701  ;;  %v3845_v34 = vrot.slane %v3786_v53, 4  ;;  %vm8876_vm13 = vmmov %vm8869_vm0  ;;  %v8878_v33 = vld [vmem:[#allocation42_spill] sm:$0xff]  ;;  %v2782_v0 = vpop.permute.xlu1 %2781  ;;  %v3831_v63 = vrot.slane %v3785_v41, 4 }
 0x62f   : > { %v3844_v42 = vsel %vm8875_vm6, %v3843_v13, %v3842_v2  ;;  %v3828_v15 = vsel %vm8876_vm13, %v3827_v35, %v3826_v36  ;;  %v3787_v40 = vsel %vm5499_vm10, %v8878_v33, %v8877_v20  ;;  %vm8879_vm12 = vmmov %vm8875_vm6  ;;  %v3847_v6 = vrot.slane %v3788_v11, 3  ;;  %v8889_v35 = vld [vmem:[#allocation22_spill] sm:$0xff] }
 0x630   : > { %v3830_v38 = vsel %vm8879_vm12, %v3829_v37, %v3828_v15  ;;  %vm8880_vm7 = vcmask 793600   ;;  %v3846_v13 = vsel %vm743_vm5, %v3845_v34, %v3844_v42  ;;  %v3833_v59 = vrot.slane %v3787_v40, 3 }
 0x631   : > { %v3281_v49 = vsel %vm8880_vm7, %v7935_v52, %v7985_v61  ;;  %v3790_v54 = vsel %vm5468_vm9, %v8882_v23, %v8881_v51  ;;  %v3792_v29 = vsel %vm5468_vm9, %v8884_v12, %v8883_v46  ;;  %vm8885_vm0 = vmmov %vm8880_vm7  ;;  %v8887_v61 = vld [vmem:[#allocation40_spill] sm:$0xff]  ;;  %v3791_v31 = vsel %vm5499_vm10, %v8889_v35, %v8888_v62  ;;  %v8900_v35 = vld [vmem:[#allocation14_spill] sm:$0xff] }
 0x632   : > { %v3280_v39 = vsel %vm8885_vm0, %v7999_v32, %v7935_v52  ;;  %v3929_v24 = vpop.permute.xlu0 %3928  ;;  %v3789_v1 = vsel %vm5499_vm10, %v8887_v61, %v8886_v14  ;;  %vm8890_vm4 = vcmask 777216   ;;  %v3927_v53 = vpop.permute.xlu1 %3926  ;;  %v3832_v8 = vsel %vm743_vm5, %v3831_v63, %v3830_v38  ;;  %v3984_v14 = vld [vmem:[#allocation9] sm:$0xff] }
 0x633   : > { %v3201_v43 = vsel %vm8890_vm4, %v7955_v55, %v7895_v16  ;;  %vm8891_vm6 = vmmov %vm8890_vm4  ;;  %vm8892_vm13 = vcmask 654336   ;;  %v3848_v57 = vsel %vm746_vm3, %v3847_v6, %v3846_v13  ;;  %v3849_v60 = vrot.slane %v3790_v54, 2 }
 0x634   : > { %v3200_v52 = vsel %vm8891_vm6, %v7969_v4, %v7955_v55  ;;  %v3329_v32 = vsel %vm5757_vm15, %v3281_v49, %v3201_v43  ;;  %v3931_v37 = vsel %vm8892_vm13, %v3927_v53, %v3929_v24  ;;  %v3851_v5 = vrot.slane %v3792_v29, 1  ;;  %vm8894_vm12 = vmmov %vm8892_vm13 }
 0x635   : > { %v3328_v2 = vsel %vm5763_vm1, %v3280_v39, %v3200_v52  ;;  %4022 = vmatprep.subr.mxu1 %v3931_v37  ;;  %v3835_v16 = vrot.slane %v3789_v1, 2  ;;  %v3837_v48 = vrot.slane %v3791_v31, 1  ;;  %v3834_v41 = vsel %vm746_vm3, %v3833_v59, %v3832_v8  ;;  %v8901_v37 = vld [vmem:[#allocation19_spill] sm:$0xff] }
 0x636   : > { %v3448_v30 = vpop.permute.xlu0 %3447  ;;  %v3313_v55 = vsel %vm5468_vm9, %v3201_v43, %v3281_v49  ;;  %v3499_v4 = vrot.slane %v3329_v32, 1  ;;  %v2802_v36 = vsel %vm652_vm8, %v2784_v25, %v2786_v28  ;;  %v3925_v50 = vpop.permute.xlu1 %3924  ;;  %vm8893_vm5 = vcmask 1046534  }
 0x637   : > { %v3850_v45 = vsel %vm8893_vm5, %v3849_v60, %v3848_v57  ;;  %v3485_v11 = vrot.slane %v3328_v2, 1  ;;  %v2721_v42 = vsel %vm571_vm11, %v2702_v22, %v8101_v19  ;;  %v2801_v34 = vsel %vm652_vm8, %v2782_v0, %v2784_v25  ;;  %vm8895_vm3 = vmmov %vm8893_vm5  ;;  %v8902_v60 = vld [vmem:[#allocation18_spill] sm:$0xff] }
 0x638   : > { %v3930_v15 = vsel %vm8894_vm12, %v3925_v50, %v3927_v53  ;;  %v3312_v20 = vsel %vm5499_vm10, %v3200_v52, %v3280_v39  ;;  %v2722_v33 = vsel %vm571_vm11, %v8101_v19, %v8086_v58  ;;  %v3852_v28 = vsel %vm752_vm2, %v3851_v5, %v3850_v45 }
 0x639   : > { %4023 = vmatpush1.msra.mxu1 %v3930_v15  ;;  %v3836_v40 = vsel %vm8895_vm3, %v3835_v16, %v3834_v41  ;;  %v2850_v38 = vsel %vm5757_vm15, %v2802_v36, %v2722_v33  ;;  %v3372_v0 = vrot.slane %v3313_v55, 1  ;;  %v2849_v63 = vsel %vm5763_vm1, %v2801_v34, %v2721_v42 }
 0x63a   : > { %4024 = vmatprep.subr.mxu1 %v3852_v28  ;;  %v3446_v22 = vpop.permute.xlu0 %3445  ;;  %v3838_v25 = vsel %vm752_vm2, %v3837_v48, %v3836_v40  ;;  %v3450_v6 = vpop.permute.xlu1 %3449  ;;  %v3500_v58 = vsel %vm752_vm2, %v3499_v4, %v7938_v9  ;;  %v3358_v19 = vrot.slane %v3312_v20, 1  ;;  %v3486_v49 = vsel %vm752_vm2, %v3485_v11, %v7988_v27 }
 0x63b   : > { %4025 = vmatpush1.msra.mxu1 %v3838_v25  ;;  %vm8896_vm8 = vcmask 785408   ;;  %v3020_v13 = vrot.slane %v2850_v38, 1  ;;  %v2834_v59 = vsel %vm5468_vm9, %v2722_v33, %v2802_v36  ;;  %v3006_v51 = vrot.slane %v2849_v63, 1 }
 0x63c   : > { %4026 = vmatprep.subr.mxu1 %v3500_v58  ;;  %v3452_v44 = vsel %vm8896_vm8, %v3448_v30, %v3450_v6  ;;  %vm8897_vm15 = vmmov %vm8896_vm8  ;;  %v2833_v23 = vsel %vm5499_vm10, %v2721_v42, %v2801_v34  ;;  %v3373_v54 = vsel %vm752_vm2, %v3372_v0, %v7941_v26  ;;  %v3359_v46 = vsel %vm752_vm2, %v3358_v19, %v7991_v47 }
 0x63d   : > { %4027 = vmatpush1.msra.mxu1 %v3486_v49  ;;  %v3451_v18 = vsel %vm8897_vm15, %v3446_v22, %v3448_v30  ;;  %v2893_v12 = vrot.slane %v2834_v59, 1  ;;  %v3021_v56 = vsel %vm752_vm2, %v3020_v13, %v8113_v21  ;;  %v2879_v29 = vrot.slane %v2833_v23, 1 }
 0x63e   : > { %4028 = vmatprep.subr.mxu1 %v3452_v44  ;;  %v2969_v9 = vpop.permute.xlu1 %2968  ;;  %v2971_v27 = vpop.permute.xlu0 %2970  ;;  %v3007_v3 = vsel %vm752_vm2, %v3006_v51, %v8119_v10  ;;  %vm8898_vm9 = vcmask 916480   ;;  %vm8903_vm1 = vcmask 1040384  }
 0x63f   : > { %4029 = vmatpush1.msra.mxu1 %v3451_v18  ;;  %v2973_v24 = vsel %vm8898_vm9, %v2969_v9, %v2971_v27  ;;  %vm8899_vm10 = vmmov %vm8898_vm9  ;;  %v2894_v47 = vsel %vm752_vm2, %v2893_v12, %v8122_v17  ;;  %v2880_v21 = vsel %vm752_vm2, %v2879_v29, %v8125_v7 }
 0x640   : > { %4030 = vmatprep.subr.mxu1 %v3373_v54  ;;  %vm8904_vm2 = vmmov %vm8903_vm1 }
 0x641   : > { %4031 = vmatpush1.msra.mxu1 %v3359_v46  ;;  %vm8905_vm11 = vmmov %vm8903_vm1 }
 0x642   : > { %4032 = vmatprep.subr.mxu1 %v3021_v56  ;;  %v2967_v39 = vpop.permute.xlu1 %2966  ;;  %vm8907_vm7 = vmmov %vm8903_vm1 }
 0x643   : > { %4033 = vmatpush1.msra.mxu1 %v3007_v3  ;;  %v2972_v26 = vsel %vm8899_vm10, %v2967_v39, %v2969_v9  ;;  %vm8908_vm0 = vmmov %vm8903_vm1 }
 0x644   : > { %4034 = vmatprep.subr.mxu1 %v2973_v24  ;;  %vm8909_vm4 = vmmov %vm8908_vm0 }
 0x645   : > { %4035 = vmatpush1.msra.mxu1 %v2972_v26  ;;  %vm8910_vm6 = vmmov %vm8908_vm0 }
 0x646   : > { %4036 = vmatprep.subr.mxu1 %v2894_v47  ;;  %vm8911_vm13 = vmmov %vm8908_vm0 }
 0x647   : > { %4037 = vmatpush1.msra.mxu1 %v2880_v21  ;;  %vm8912_vm5 = vmmov %vm8908_vm0 }
 0x648   : > { %4751 = vmatmul.mubr.msk.f32.vlgmr.msra.gmra.mxu1 %vm1883_vm14, %v3984_v14  ;;  %vm8906_vm14 = vmmov %vm8903_vm1 }
 0x649   : > { %vm8913_vm12 = vmmov %vm8908_vm0 }
 0x64a   : > { %vm8914_vm3 = vmmov %vm8908_vm0 }
 0x64b   : > { %vm8915_vm8 = vmmov %vm8908_vm0 }
 0x64c   : > { %vm8916_vm15 = vmmov %vm8908_vm0 }
 0x64d   : > { %vm8917_vm9 = vmmov %vm8908_vm0 }
 0x64e   : > { %vm8918_vm10 = vmmov %vm8908_vm0 }
 0x708   : > { %v4072_v10 = vpop.f32.mrf.mxu1 }
 0x70a   : > { %v4074_v61 = vpop.f32.mrf.mxu1 }
 0x70b   : > { %v4079_v1 = vcombine.low %v4072_v10, %v4074_v61  ;;  %v4080_v62 = vcombine.high %v4072_v10, %v4074_v61 }
 0x70d   : > { %v4087_v31 = vrot.slane %v4079_v1, %v8900_v35  ;;  %v4094_v43 = vrot.slane %v4080_v62, %v8900_v35 }
 0x70f   : > { %v4095_v53 = vcombine.high %v4087_v31, %v4087_v31  ;;  %v4096_v8 = vcombine.high %v4094_v43, %v4094_v43  ;;  %v8238_v17 = vrot.slane %v4087_v31, %v8900_v35  ;;  %v8241_v52 = vrot.slane %v4094_v43, %v8900_v35 }
 0x711   : > { %v8244_v7 = vrot.slane %v4095_v53, %v8900_v35  ;;  %v8247_v32 = vrot.slane %v4096_v8, %v8900_v35  ;;  %v4172_v57 = vrot.slane %v8241_v52, %v8901_v37  ;;  %v4176_v5 = vrot.slane %v8241_v52, %v8902_v60 }
 0x712   : > { %v4140_v2 = vrot.slane %v8238_v17, %v8901_v37  ;;  %v4144_v16 = vrot.slane %v8238_v17, %v8902_v60  ;;  %v8259_v48 = vcombine.high %v8238_v17, %v8238_v17  ;;  %v8263_v30 = vcombine.high %v8241_v52, %v8241_v52 }
 0x713   : > { %v4237_v41 = vsel %vm8903_vm1, %v4172_v57, 0.0  ;;  %v4238_v55 = vsel %vm8904_vm2, %v4176_v5, 0.0  ;;  %v4148_v4 = vrot.slane %v8244_v7, %v8901_v37  ;;  %v4152_v36 = vrot.slane %v8244_v7, %v8902_v60  ;;  %vm8919_vm1 = vmmov %vm8908_vm0 }
 0x714   : > { %v4239_v50 = vadd.f32 %v4238_v55, %v4237_v41  ;;  %v4217_v45 = vsel %vm8905_vm11, %v4140_v2, 0.0  ;;  %v4218_v11 = vsel %vm8906_vm14, %v4144_v16, 0.0  ;;  %v4156_v42 = vrot.slane %v8259_v48, %v8901_v37  ;;  %vm8920_vm2 = vmmov %vm8908_vm0 }
 0x715   : > { %v4219_v34 = vadd.f32 %v4218_v11, %v4217_v45  ;;  %v4160_v15 = vrot.slane %v8259_v48, %v8902_v60  ;;  %v4222_v20 = vsel %vm8907_vm7, %v4148_v4, 0.0  ;;  %v4223_v33 = vsel %vm8908_vm0, %v4152_v36, 0.0  ;;  %vm8921_vm11 = vmmov %vm8908_vm0 }
 0x716   : > { %4240 = vadd.xlane.f32.xlu1 %v4239_v50  ;;  %v4227_v28 = vsel %vm8909_vm4, %v4156_v42, 0.0  ;;  %v4180_v40 = vrot.slane %v8247_v32, %v8901_v37  ;;  %v4184_v38 = vrot.slane %v8247_v32, %v8902_v60  ;;  %v4188_v25 = vrot.slane %v8263_v30, %v8901_v37  ;;  %vm8922_vm14 = vmmov %vm8908_vm0 }
 0x717   : > { %4220 = vadd.xlane.f32.xlu0 %v4219_v34  ;;  %v4228_v22 = vsel %vm8910_vm6, %v4160_v15, 0.0  ;;  %v4192_v0 = vrot.slane %v8263_v30, %v8902_v60  ;;  %v4257_v63 = vmul.f32 %v8238_v17, %v8238_v17  ;;  %v4224_v6 = vadd.f32 %v4223_v33, %v4222_v20  ;;  %vm8923_vm7 = vmmov %vm8908_vm0 }
 0x718   : > { %v4242_v58 = vsel %vm8911_vm13, %v4180_v40, 0.0  ;;  %v4243_v19 = vsel %vm8912_vm5, %v4184_v38, 0.0  ;;  %v8295_v49 = vcombine.high %v8244_v7, %v8244_v7  ;;  %v4229_v44 = vadd.f32 %v4228_v22, %v4227_v28  ;;  %vm8924_vm4 = vmmov %vm8908_vm0 }
 0x719   : > { %v4247_v13 = vsel %vm8913_vm12, %v4188_v25, 0.0  ;;  %v4248_v59 = vsel %vm8914_vm3, %v4192_v0, 0.0  ;;  %v4276_v51 = vrot.slane %v4257_v63, %v8901_v37  ;;  %v4280_v18 = vrot.slane %v4257_v63, %v8902_v60  ;;  %vm8925_vm6 = vmmov %vm8908_vm0 }
 0x71a   : > { %4225 = vadd.xlane.f32.xlu1 %v4224_v6  ;;  %v4164_v23 = vrot.slane %v8295_v49, %v8901_v37  ;;  %v4168_v9 = vrot.slane %v8295_v49, %v8902_v60  ;;  %v4244_v54 = vadd.f32 %v4243_v19, %v4242_v58  ;;  %v4249_v27 = vadd.f32 %v4248_v59, %v4247_v13  ;;  %vm8926_vm13 = vmmov %vm8908_vm0 }
 0x71b   : > { %4230 = vadd.xlane.f32.xlu0 %v4229_v44  ;;  %v4261_v46 = vmul.f32 %v8241_v52, %v8241_v52  ;;  %v8309_v12 = vcombine.high %v8247_v32, %v8247_v32  ;;  %v4353_v56 = vsel %vm8915_vm8, %v4276_v51, 0.0  ;;  %v4354_v29 = vsel %vm8916_vm15, %v4280_v18, 0.0  ;;  %vm8927_vm5 = vmmov %vm8908_vm0 }
 0x71c   : > { %v4232_v3 = vsel %vm8917_vm9, %v4164_v23, 0.0  ;;  %v4259_v39 = vmul.f32 %v8259_v48, %v8259_v48  ;;  %v4233_v24 = vsel %vm8918_vm10, %v4168_v9, 0.0  ;;  %v4258_v14 = vmul.f32 %v8244_v7, %v8244_v7  ;;  %vm8928_vm12 = vmmov %vm8908_vm0 }
 0x71d   : > { %v4308_v26 = vrot.slane %v4261_v46, %v8901_v37  ;;  %v4312_v47 = vrot.slane %v4261_v46, %v8902_v60  ;;  %v4196_v21 = vrot.slane %v8309_v12, %v8901_v37  ;;  %v4200_v10 = vrot.slane %v8309_v12, %v8902_v60  ;;  %vm8929_vm3 = vmmov %vm8908_vm0 }
 0x71e   : > { %4250 = vadd.xlane.f32.xlu1 %v4249_v27  ;;  %v4355_v61 = vadd.f32 %v4354_v29, %v4353_v56  ;;  %v4234_v1 = vadd.f32 %v4233_v24, %v4232_v3  ;;  %v4292_v31 = vrot.slane %v4259_v39, %v8901_v37  ;;  %v4296_v43 = vrot.slane %v4259_v39, %v8902_v60  ;;  %vm8930_vm8 = vmmov %vm8908_vm0 }
 0x71f   : > { %4245 = vadd.xlane.f32.xlu0 %v4244_v54  ;;  %v4373_v62 = vsel %vm8919_vm1, %v4308_v26, 0.0  ;;  %v4374_v53 = vsel %vm8920_vm2, %v4312_v47, 0.0  ;;  %v4252_v8 = vsel %vm8921_vm11, %v4196_v21, 0.0  ;;  %v4253_v57 = vsel %vm8922_vm14, %v4200_v10, 0.0  ;;  %vm8931_vm15 = vmmov %vm8908_vm0 }
 0x720   : > { %v4284_v5 = vrot.slane %v4258_v14, %v8901_v37  ;;  %v4288_v2 = vrot.slane %v4258_v14, %v8902_v60  ;;  %v4263_v16 = vmul.f32 %v8263_v30, %v8263_v30  ;;  %v4262_v41 = vmul.f32 %v8247_v32, %v8247_v32  ;;  %vm8932_vm9 = vmmov %vm8908_vm0 }
 0x721   : > { %v4375_v55 = vadd.f32 %v4374_v53, %v4373_v62  ;;  %v4254_v4 = vadd.f32 %v4253_v57, %v4252_v8  ;;  %v4363_v36 = vsel %vm8923_vm7, %v4292_v31, 0.0  ;;  %v4364_v50 = vsel %vm8908_vm0, %v4296_v43, 0.0  ;;  %vm8933_vm10 = vmmov %vm8908_vm0 }
 0x722   : > { %4356 = vadd.xlane.f32.xlu1 %v4355_v61  ;;  %v4358_v45 = vsel %vm8924_vm4, %v4284_v5, 0.0  ;;  %v4324_v11 = vrot.slane %v4263_v16, %v8901_v37  ;;  %v4328_v42 = vrot.slane %v4263_v16, %v8902_v60  ;;  %v4359_v34 = vsel %vm8925_vm6, %v4288_v2, 0.0 }
 0x723   : > { %4235 = vadd.xlane.f32.xlu0 %v4234_v1  ;;  %v4316_v15 = vrot.slane %v4262_v41, %v8901_v37  ;;  %v4320_v20 = vrot.slane %v4262_v41, %v8902_v60  ;;  %v4260_v33 = vmul.f32 %v8295_v49, %v8295_v49  ;;  %v4365_v28 = vadd.f32 %v4364_v50, %v4363_v36 }
 0x724   : > { %v4360_v40 = vadd.f32 %v4359_v34, %v4358_v45  ;;  %v4383_v38 = vsel %vm8926_vm13, %v4324_v11, 0.0  ;;  %v4384_v22 = vsel %vm8927_vm5, %v4328_v42, 0.0  ;;  %v4264_v25 = vmul.f32 %v8309_v12, %v8309_v12 }
 0x725   : > { %v4378_v0 = vsel %vm8928_vm12, %v4316_v15, 0.0  ;;  %v4379_v63 = vsel %vm8929_vm3, %v4320_v20, 0.0  ;;  %v4300_v6 = vrot.slane %v4260_v33, %v8901_v37  ;;  %v4304_v58 = vrot.slane %v4260_v33, %v8902_v60 }
 0x726   : > { %4376 = vadd.xlane.f32.xlu1 %v4375_v55  ;;  %v4385_v19 = vadd.f32 %v4384_v22, %v4383_v38  ;;  %v4380_v44 = vadd.f32 %v4379_v63, %v4378_v0  ;;  %v4332_v51 = vrot.slane %v4264_v25, %v8901_v37  ;;  %v4336_v18 = vrot.slane %v4264_v25, %v8902_v60 }
 0x727   : > { %4255 = vadd.xlane.f32.xlu0 %v4254_v4  ;;  %v4368_v13 = vsel %vm8930_vm8, %v4300_v6, 0.0  ;;  %v4369_v59 = vsel %vm8931_vm15, %v4304_v58, 0.0 }
 0x728   : > { %v4370_v23 = vadd.f32 %v4369_v59, %v4368_v13  ;;  %v4388_v9 = vsel %vm8932_vm9, %v4332_v51, 0.0  ;;  %v4389_v54 = vsel %vm8933_vm10, %v4336_v18, 0.0 }
 0x729   : > { %v4390_v27 = vadd.f32 %v4389_v54, %v4388_v9 }
 0x72a   : > { %4366 = vadd.xlane.f32.xlu1 %v4365_v28 }
 0x72b   : > { %4361 = vadd.xlane.f32.xlu0 %v4360_v40 }
 0x72e   : > { %4386 = vadd.xlane.f32.xlu1 %v4385_v19 }
 0x72f   : > { %4381 = vadd.xlane.f32.xlu0 %v4380_v44 }
 0x733   : > { %4371 = vadd.xlane.f32.xlu0 %v4370_v23 }
 0x737   : > { %4391 = vadd.xlane.f32.xlu0 %v4390_v27 }
 0x79f   : > { %v4241_v46 = vpop.xlane.xlu1 %4240 }
 0x7a0   : > { %v4221_v56 = vpop.xlane.xlu0 %4220  ;;  %v8369_v31 = vmul.f32 0.00390625, %v4241_v46 }
 0x7a1   : > { %v8361_v14 = vmul.f32 0.00390625, %v4221_v56 }
 0x7a2   : > { %v4413_v50 = vmul.f32 %v8369_v31, %v8369_v31 }
 0x7a3   : > { %v4226_v29 = vpop.xlane.xlu1 %4225  ;;  %v4409_v62 = vmul.f32 %v8361_v14, %v8361_v14 }
 0x7a4   : > { %v4231_v3 = vpop.xlane.xlu0 %4230  ;;  %v8365_v1 = vmul.f32 0.00390625, %v4226_v29 }
 0x7a5   : > { %v8363_v21 = vmul.f32 0.00390625, %v4231_v3 }
 0x7a6   : > { %v4410_v16 = vmul.f32 %v8365_v1, %v8365_v1 }
 0x7a7   : > { %v4251_v39 = vpop.xlane.xlu1 %4250  ;;  %v4411_v53 = vmul.f32 %v8363_v21, %v8363_v21 }
 0x7a8   : > { %v4246_v24 = vpop.xlane.xlu0 %4245  ;;  %v8373_v8 = vmul.f32 0.00390625, %v4251_v39 }
 0x7a9   : > { %v4398_v41 = vmul.f32 0.00390625, %v4246_v24  ;;  %v4436_v24 = vrot.slane %v8361_v14, %v8901_v37 }
 0x7aa   : > { %v4415_v42 = vmul.f32 %v8373_v8, %v8373_v8 }
 0x7ab   : > { %v4357_v26 = vpop.xlane.xlu1 %4356  ;;  %v4414_v28 = vmul.f32 %v4398_v41, %v4398_v41 }
 0x7ac   : > { %v4236_v47 = vpop.xlane.xlu0 %4235  ;;  %v4401_v10 = vmul.f32 0.00390625, %v4357_v26  ;;  %v4440_v26 = vrot.slane %v8365_v1, %v8901_v37 }
 0x7ad   : > { %v4396_v15 = vmul.f32 0.00390625, %v4236_v47 }
 0x7ae   : > { %v4417_v57 = vsub.f32 %v4401_v10, %v4409_v62  ;;  %v4456_v10 = vrot.slane %v4398_v41, %v8901_v37  ;;  %v4474_v1 = vsub.f32 %v8244_v7, %v4440_v26 }
 0x7af   : > { %v4377_v60 = vpop.xlane.xlu1 %4376  ;;  %v4412_v6 = vmul.f32 %v4396_v15, %v4396_v15 }
 0x7b0   : > { %v4256_v61 = vpop.xlane.xlu0 %4255  ;;  %v4405_v55 = vmul.f32 0.00390625, %v4377_v60  ;;  %v4481_v34 = vadd.f32 1e-05, %v4417_v57  ;;  %v4444_v60 = vrot.slane %v8363_v21, %v8901_v37 }
 0x7b1   : > { %v4400_v58 = vmul.f32 0.00390625, %v4256_v61  ;;  %v4448_v61 = vrot.slane %v4396_v15, %v8901_v37 }
 0x7b2   : > { %v4421_v40 = vsub.f32 %v4405_v55, %v4413_v50  ;;  %4857 = vrsqrt.f32 %v4481_v34  ;;  %v4475_v41 = vsub.f32 %v8259_v48, %v4444_v60  ;;  %v4478_v55 = vsub.f32 %v8247_v32, %v4456_v10 }
 0x7b3   : > { %v4367_v43 = vpop.xlane.xlu1 %4366  ;;  %v4416_v9 = vmul.f32 %v4400_v58, %v4400_v58 }
 0x7b4   : > { %v4403_v5 = vmul.f32 0.00390625, %v4367_v43  ;;  %v4362_v2 = vpop.xlane.xlu0 %4361  ;;  %v4485_v44 = vadd.f32 1e-05, %v4421_v40 }
 0x7b5   : > { %v4402_v4 = vmul.f32 0.00390625, %v4362_v2 }
 0x7b6   : > { %v4419_v36 = vsub.f32 %v4403_v5, %v4411_v53  ;;  %v4452_v53 = vrot.slane %v8369_v31, %v8901_v37  ;;  %v4473_v5 = vsub.f32 %v8238_v17, %v4436_v24  ;;  %v4464_v31 = vrot.slane %v4400_v58, %v8901_v37 }
 0x7b7   : > { %v4418_v45 = vsub.f32 %v4402_v4, %v4410_v16  ;;  %v4387_v11 = vpop.xlane.xlu1 %4386  ;;  %v4460_v4 = vrot.slane %v8373_v8, %v8901_v37 }
 0x7b8   : > { %v4407_v20 = vmul.f32 0.00390625, %v4387_v11  ;;  %v4382_v33 = vpop.xlane.xlu0 %4381  ;;  %v4483_v25 = vadd.f32 1e-05, %v4419_v36  ;;  %v4476_v36 = vsub.f32 %v8295_v49, %v4448_v61 }
 0x7b9   : > { %v4482_v38 = vadd.f32 1e-05, %v4418_v45  ;;  %v4406_v22 = vmul.f32 0.00390625, %v4382_v33  ;;  %v4477_v45 = vsub.f32 %v8241_v52, %v4452_v53  ;;  %v4479_v8 = vsub.f32 %v8263_v30, %v4460_v4 }
 0x7ba   : > { %v4423_v0 = vsub.f32 %v4407_v20, %v4415_v42  ;;  %v4480_v20 = vsub.f32 %v8309_v12, %v4464_v31 }
 0x7bb   : > { %v4422_v63 = vsub.f32 %v4406_v22, %v4414_v28  ;;  %4859 = vrsqrt.f32 %v4482_v38 }
 0x7bc   : > { %v4372_v19 = vpop.xlane.xlu0 %4371  ;;  %4861 = vrsqrt.f32 %v4483_v25  ;;  %v4487_v51 = vadd.f32 1e-05, %v4423_v0 }
 0x7bd   : > { %v4486_v13 = vadd.f32 1e-05, %v4422_v63  ;;  %v4404_v59 = vmul.f32 0.00390625, %v4372_v19 }
 0x7bf   : > { %4863 = vrsqrt.f32 %v4486_v13  ;;  %v4420_v18 = vsub.f32 %v4404_v59, %v4412_v6  ;;  %v4858_v29 = vpop.eup %4857 }
 0x7c0   : > { %v4392_v23 = vpop.xlane.xlu0 %4391  ;;  %4865 = vrsqrt.f32 %v4485_v44  ;;  %v4508_v57 = vrot.slane %v4858_v29, %v8901_v37 }
 0x7c1   : > { %v4484_v54 = vadd.f32 1e-05, %v4420_v18  ;;  %v4408_v27 = vmul.f32 0.00390625, %v4392_v23  ;;  %4867 = vrsqrt.f32 %v4487_v51 }
 0x7c2   : > { %v4545_v11 = vmul.f32 %v4508_v57, %v4473_v5 }
 0x7c3   : > { %4869 = vrsqrt.f32 %v4484_v54  ;;  %v4424_v46 = vsub.f32 %v4408_v27, %v4416_v9  ;;  %v4873_v9 = vld [vmem:[%s5186_s30] sm:$0xff]  ;;  %v4874_v27 = vld [vmem:[%s5186_s30 + $0x8] sm:$0xff] }
 0x7c5   : > { %v4488_v56 = vadd.f32 1e-05, %v4424_v46 }
 0x7c7   : > { %4871 = vrsqrt.f32 %v4488_v56 }
 0x7c8   : > { %v4860_v3 = vpop.eup %4859 }
 0x7c9   : > { %v4862_v39 = vpop.eup %4861  ;;  %v4512_v62 = vrot.slane %v4860_v3, %v8901_v37 }
 0x7ca   : > { %v4516_v2 = vrot.slane %v4862_v39, %v8901_v37 }
 0x7cb   : > { %v4546_v50 = vmul.f32 %v4512_v62, %v4474_v1 }
 0x7cc   : > { %v4864_v47 = vpop.eup %4863  ;;  %v4547_v42 = vmul.f32 %v4516_v2, %v4475_v41 }
 0x7cd   : > { %v4866_v43 = vpop.eup %4865  ;;  %v4528_v21 = vrot.slane %v4864_v47, %v8901_v37  ;;  %v4561_v49 = vcombine.low %v4545_v11, %v4546_v50 }
 0x7ce   : > { %v4868_v14 = vpop.eup %4867  ;;  %v4524_v17 = vrot.slane %v4866_v43, %v8901_v37 }
 0x7cf   : > { %v4532_v48 = vrot.slane %v4868_v14, %v8901_v37  ;;  %v4550_v34 = vmul.f32 %v4528_v21, %v4478_v55  ;;  %v4571_v63 = vrot.slane %v4561_v49, %v8900_v35 }
 0x7d0   : > { %v4870_v16 = vpop.eup %4869  ;;  %v4549_v33 = vmul.f32 %v4524_v17, %v4477_v45 }
 0x7d1   : > { %v4520_v7 = vrot.slane %v4870_v16, %v8901_v37  ;;  %v4551_v38 = vmul.f32 %v4532_v48, %v4479_v8 }
 0x7d2   : > { %v4563_v22 = vcombine.low %v4549_v33, %v4550_v34 }
 0x7d3   : > { %v4548_v32 = vmul.f32 %v4520_v7, %v4476_v36 }
 0x7d4   : > { %v4872_v15 = vpop.eup %4871  ;;  %v4585_v30 = vrot.slane %v4563_v22, %v8900_v35 }
 0x7d5   : > { %v4562_v28 = vcombine.low %v4547_v42, %v4548_v32  ;;  %v4536_v40 = vrot.slane %v4872_v15, %v8901_v37 }
 0x7d7   : > { %v4552_v52 = vmul.f32 %v4536_v40, %v4480_v20  ;;  %v4578_v25 = vrot.slane %v4562_v28, %v8900_v35 }
 0x7d9   : > { %v4564_v0 = vcombine.low %v4551_v38, %v4552_v52  ;;  %v4593_v6 = vcombine.low %v4571_v63, %v4578_v25  ;;  %v4594_v58 = vcombine.high %v4571_v63, %v4578_v25 }
 0x7db   : > { %v4592_v12 = vrot.slane %v4564_v0, %v8900_v35  ;;  %v4603_v44 = vrot.slane %v4593_v6, %v8900_v35  ;;  %v4610_v13 = vrot.slane %v4594_v58, %v8900_v35 }
 0x7dd   : > { %v4595_v19 = vcombine.low %v4585_v30, %v4592_v12  ;;  %v4596_v37 = vcombine.high %v4585_v30, %v4592_v12 }
 0x7df   : > { %v4617_v59 = vrot.slane %v4595_v19, %v8900_v35  ;;  %v4624_v51 = vrot.slane %v4596_v37, %v8900_v35 }
 0x7e1   : > { %v4625_v18 = vcombine.low %v4603_v44, %v4617_v59  ;;  %v4626_v23 = vcombine.low %v4610_v13, %v4624_v51 }
 0x7e3   : > { %v4629_v54 = vadd.f32 %v4873_v9, %v4625_v18  ;;  %v4630_v46 = vadd.f32 %v4874_v27, %v4626_v23 }
 0x7e5   : > { %4631 = vst [vmem:[%s211_s17] sm:$0xff] %v4629_v54  ;;  %4632 = vst [vmem:[%s211_s17 + $0x8] sm:$0xff] %v4630_v46 }
 0x7e6   : > { %4968 = shalt.err (!%p4965_p12)
}
 0x7e7   : > { %s4969_s30 = scalar_lea.hbm %s8426_s20, 256  ;;  %s4973_s4 = scalar_lea.hbm %s8466_s3, 512 }
 0x7e8   : > { %p4970_p3 = scmp.ne.s32.totalorder %s8426_s20, %s4969_s30  ;;  %p4974_p9 = scmp.lt.s32.totalorder %s8426_s20, %s8466_s3 }
 0x7e9   : > { %p4975_p11 = scmp.lt.s32.totalorder %s4973_s4, %s4969_s30 }
 0x7ea   : > { %p4971_p7 = pnand %p4970_p3, %p8934_p0 }
 0x7eb   : > { %p4976_p5 = por %p4975_p11, %p4974_p9 }
 0x7ec   : > { %p4972_p10 = pneg %p4971_p7 }
 0x7ee   : > { %p4977_p13 = pnand %p4976_p5, %p4972_p10 }
 0x7f0   : > { %4980 = shalt.err (!%p4977_p13)
}
 0x7f1   : > { %4769 = dma.vmem_to_hbm [thread:$0]  (%p8934_p0), %s4649_s21, 256, %s8426_s20, %s4634_s23  }
 0x7f2 PF: > { %s4660_s7 = sand.u32 1, %s5011_s12   ;;  %p8935_p1 = scmp.ne.s32.totalorder %s8545_s19, 0 }
 0x7f3   : > { %p8936_p2 = scmp.ge.s32.totalorder %s5023_s15, 2  ;;  %s4661_s11 = scalar_lea.sflag [#allocation6], %s4660_s7 }
 0x7f5   : > { %p4783_p4 = pnand %p8936_p2, %p8935_p1 }
 0x7f7   : > { %p4784_p6 = pneg %p4783_p4 }
 0x7f9   : > { %5006 = dma.done.wait (%p4784_p6), %s4661_s11, 256  }
 0x7fa   : > { %5008 = vsyncadd (%p4784_p6), %s4661_s11, 4294967040  ;;  %p17_p8 = scmp.ge.s32.totalorder %s5116_s26, 4   ;;  %s8937_s12 = smov %s5015_s13 }
 0x7fb   : > { %s8938_s13 = smov %s5019_s14  ;;  %s8939_s14 = smov %s5143_s8 }
 0x7fc   : > { %s8940_s15 = smov %s5116_s26  ;;  %19 = sbr.rel (!%p17_p8) target bundleno = 6 (0x6), region = 85 }
 0x801   :  { %4666 = vsyncpa [#allocation5], 1 }
 0x802   :  { %4668 = vsyncpa [#allocation5 + $0x1], 1 }
 0x803   :  { %4669 = vsyncpa [#allocation8], 1 }
 0x804   :  { %4670 = vsyncpa [#allocation6], 1 }
 0x805   :  { %4672 = vsyncpa [#allocation6 + $0x1], 1 }

</bundles_post_ra>
